<compile_context>
chip_gen: v6e
topology: v6e:2x2x1
jax: 0.10.0
libtpu: 0.0.40
codegen_flags: <defaults>
</compile_context>

<pallas_src>
import math
import functools

import jax
import jax.numpy as jnp
from jax.experimental import pallas as pl
from jax.experimental.pallas import tpu as pltpu


_GELU_C = math.sqrt(2.0 / math.pi)


# ----------------------------------------------------------------------------
# In-kernel helpers (operate on values, not refs)
# ----------------------------------------------------------------------------

def _ln(z, g, b, eps=1e-5):
    mu = jnp.mean(z, axis=-1, keepdims=True)
    var = jnp.mean((z - mu) ** 2, axis=-1, keepdims=True)
    return (z - mu) * jax.lax.rsqrt(var + eps) * g + b


def _gelu(x):
    # OpenAI-GPT gelu (tanh approximation); x*x*x avoids generic pow lowering.
    return 0.5 * x * (1.0 + jnp.tanh(_GELU_C * (x + 0.044715 * (x * x * x))))


def _encoder_block(h, nb, L, n_head,
                   wqkv, bqkv, wo, bo, g1, be1,
                   wfc, bfc, wproj, bproj, g2, be2):
    """One GPT-style EncoderBlock (post-LN): a = attn(x); n = LN(x+a);
    m = MLP_gelu(n); out = LN(n+m).

    h: (nb*L, D) float32 slab of `nb` sequences of length L.
    Weights are bf16; biases / LN params are f32 with shape (1, X).
    """
    M, D = h.shape
    dh = D // n_head
    scale = 1.0 / math.sqrt(dh)
    cdt = wqkv.dtype  # matmul compute dtype (bf16)

    # QKV for the whole (nb*L, D) slab in one MXU pass.
    qkv = jnp.dot(h.astype(cdt), wqkv, preferred_element_type=jnp.float32) + bqkv
    q = qkv[:, :D].reshape(nb, L, D)
    k = qkv[:, D:2 * D].reshape(nb, L, D)
    v = qkv[:, 2 * D:].reshape(nb, L, D)

    # Per-head attention, batched over the nb sequences.  No concatenate:
    # attn @ Wo == sum_h (head_h @ Wo[h*dh:(h+1)*dh, :]), so each head's PV
    # result is folded straight into the output projection accumulator.
    acc = None
    for hh in range(n_head):                                  # static, unrolled
        sl = slice(hh * dh, (hh + 1) * dh)
        qh = q[:, :, sl].astype(cdt)
        kh = k[:, :, sl].astype(cdt)
        vh = v[:, :, sl].astype(cdt)
        # contract on the last dim of both operands -> no explicit transpose
        s = jnp.einsum('bid,bjd->bij', qh, kh,
                       preferred_element_type=jnp.float32) * scale
        s = s - jnp.max(s, axis=-1, keepdims=True)
        p = jnp.exp(s)
        p = p * pl.reciprocal(jnp.sum(p, axis=-1, keepdims=True), approx=True)
        ah = jnp.einsum('bij,bjd->bid', p.astype(cdt), vh,
                        preferred_element_type=jnp.float32)   # (nb, L, dh)
        contrib = jnp.dot(ah.reshape(M, dh).astype(cdt),
                          wo[hh * dh:(hh + 1) * dh, :],
                          preferred_element_type=jnp.float32)
        acc = contrib if acc is None else acc + contrib
    a = acc + bo

    n = _ln(h + a, g1, be1)

    h1 = jnp.dot(n.astype(cdt), wfc, preferred_element_type=jnp.float32) + bfc
    h1 = _gelu(h1)
    m = jnp.dot(h1.astype(cdt), wproj, preferred_element_type=jnp.float32) + bproj
    return _ln(n + m, g2, be2)


# ----------------------------------------------------------------------------
# Pallas kernels
# ----------------------------------------------------------------------------

def token_encoder_kernel(x_ref, wqkv_ref, bqkv_ref, wo_ref, bo_ref,
                         g1_ref, be1_ref, wfc_ref, bfc_ref,
                         wproj_ref, bproj_ref, g2_ref, be2_ref,
                         out_ref, *, n_head, n_layer):
    """MeetingTransformerEncoder: n_layer EncoderBlocks fused into one kernel.
    Processes a block of `nb` sequences (nb, L, D) per grid step; the
    activation stays in registers/VMEM between the fused layers (no HBM
    round-trip and no second kernel launch)."""
    nb, L, D = x_ref.shape

    # Hoist weight loads / bias broadcasts out of the layer loop.
    wqkv = wqkv_ref[...]
    bqkv = bqkv_ref[...]
    wo = wo_ref[...]
    bo = bo_ref[...]
    g1 = g1_ref[...]
    be1 = be1_ref[...]
    wfc = wfc_ref[...]
    bfc = bfc_ref[...]
    wproj = wproj_ref[...]
    bproj = bproj_ref[...]
    g2 = g2_ref[...]
    be2 = be2_ref[...]

    h = x_ref[...].astype(jnp.float32).reshape(nb * L, D)
    for _ in range(n_layer):        # reference layers are deepcopies of one
        h = _encoder_block(h, nb, L, n_head,          # block -> shared weights
                           wqkv, bqkv, wo, bo, g1, be1,
                           wfc, bfc, wproj, bproj, g2, be2)
    out_ref[...] = h.reshape(nb, L, D).astype(out_ref.dtype)


def sent_head_kernel(x_ref, ent_ref,
                     wqkv_ref, bqkv_ref, wo_ref, bo_ref, g1_ref, be1_ref,
                     wfc_ref, bfc_ref, wproj_ref, bproj_ref, g2_ref, be2_ref,
                     went_ref, bent_ref, gf_ref, bf_ref, wcls_ref, bcls_ref,
                     sent_ref, logits_ref, *, n_head):
    """TurnLevelEncoder (transformer block) + ERNIE-style knowledge fusion
    (entity dense + add + LayerNorm) + TopicSegment classifier matmul — fused
    into a single kernel over the whole (B, S, D) slab."""
    B, S, D = x_ref.shape

    h = x_ref[...].astype(jnp.float32).reshape(B * S, D)
    h = _encoder_block(h, B, S, n_head,
                       wqkv_ref[...], bqkv_ref[...], wo_ref[...], bo_ref[...],
                       g1_ref[...], be1_ref[...], wfc_ref[...], bfc_ref[...],
                       wproj_ref[...], bproj_ref[...], g2_ref[...], be2_ref[...])

    # ERNIE fusion: project role/entity embedding into hidden space, add, LN.
    ent = ent_ref[...].astype(went_ref.dtype).reshape(B * S, -1)
    proj = jnp.dot(ent, went_ref[...],
                   preferred_element_type=jnp.float32) + bent_ref[...]
    fused = _ln(h + proj, gf_ref[...], bf_ref[...])
    sent_ref[...] = fused.reshape(B, S, D).astype(sent_ref.dtype)

    # topic-segment classifier (eval-mode dropout = identity)
    logits = jnp.dot(fused.astype(wcls_ref.dtype), wcls_ref[...],
                     preferred_element_type=jnp.float32) + bcls_ref[...]
    logits_ref[...] = logits.reshape(B, S, -1).astype(logits_ref.dtype)


# ----------------------------------------------------------------------------
# Pallas wrappers
# ----------------------------------------------------------------------------

def run_token_encoder(h, params, n_head, n_layer, n_blk):
    """h: (N, L, D) -> (N, L, D).  n_blk sequences per grid step."""
    N, L, D = h.shape
    assert N % n_blk == 0
    (wqkv, bqkv, wo, bo, g1, be1, wfc, bfc, wproj, bproj, g2, be2) = params
    ff = wfc.shape[1]

    seq_spec = pl.BlockSpec((n_blk, L, D), lambda i: (i, 0, 0))

    def c2(shape):
        return pl.BlockSpec(shape, lambda i: (0, 0))

    kernel = functools.partial(token_encoder_kernel, n_head=n_head,
                               n_layer=n_layer)
    return pl.pallas_call(
        kernel,
        out_shape=jax.ShapeDtypeStruct((N, L, D), h.dtype),
        grid=(N // n_blk,),
        in_specs=[
            seq_spec,
            c2((D, 3 * D)), c2((1, 3 * D)),
            c2((D, D)), c2((1, D)),
            c2((1, D)), c2((1, D)),
            c2((D, ff)), c2((1, ff)),
            c2((ff, D)), c2((1, D)),
            c2((1, D)), c2((1, D)),
        ],
        out_specs=seq_spec,
        compiler_params=pltpu.CompilerParams(dimension_semantics=("parallel",)),
    )(h, wqkv, bqkv, wo, bo, g1, be1, wfc, bfc, wproj, bproj, g2, be2)


def run_sent_head(x, ent, block_params, went, bent, gf, bf, wcls, bcls, n_head):
    """x: (B, S, D), ent: (B, S, E) -> (sent_out (B,S,D), logits (B,S,K))."""
    B, S, D = x.shape
    K = wcls.shape[1]
    kernel = functools.partial(sent_head_kernel, n_head=n_head)
    sent_out, logits = pl.pallas_call(
        kernel,
        out_shape=(jax.ShapeDtypeStruct((B, S, D), x.dtype),
                   jax.ShapeDtypeStruct((B, S, K), jnp.float32)),
    )(x, ent, *block_params, went, bent, gf, bf, wcls, bcls)
    return sent_out, logits


# ----------------------------------------------------------------------------
# CRF (torchcrf semantics, reduction='sum') — tiny dynamic program, plain JAX.
# ----------------------------------------------------------------------------

def crf_log_likelihood(emissions, tags, mask, start_t, end_t, trans):
    B, S, K = emissions.shape
    bidx = jnp.arange(B)
    maskf = mask.astype(emissions.dtype)

    score = start_t[tags[:, 0]] + emissions[bidx, 0, tags[:, 0]]
    for i in range(1, S):
        step = trans[tags[:, i - 1], tags[:, i]] + emissions[bidx, i, tags[:, i]]
        score = score + step * maskf[:, i]
    seq_ends = jnp.sum(mask.astype(jnp.int32), axis=1) - 1
    score = score + end_t[tags[bidx, seq_ends]]

    alpha = start_t[None, :] + emissions[:, 0]
    for i in range(1, S):
        bc = alpha[:, :, None] + trans[None, :, :] + emissions[:, i][:, None, :]
        nxt = jax.nn.logsumexp(bc, axis=1)
        alpha = jnp.where(mask[:, i][:, None], nxt, alpha)
    denom = jax.nn.logsumexp(alpha + end_t[None, :], axis=1)
    return jnp.sum(score - denom)


# ----------------------------------------------------------------------------
# Parameter construction (deterministic, synthetic).  Weights in bf16 for the
# MXU; biases / LayerNorm params in f32 (elementwise math stays f32).
# ----------------------------------------------------------------------------

def init_block_params(key, D, ff, wdt=jnp.bfloat16):
    ks = jax.random.split(key, 4)
    s = 0.02
    return (
        (jax.random.normal(ks[0], (D, 3 * D), jnp.float32) * s).astype(wdt),
        jnp.zeros((1, 3 * D), jnp.float32),
        (jax.random.normal(ks[1], (D, D), jnp.float32) * s).astype(wdt),
        jnp.zeros((1, D), jnp.float32),
        jnp.ones((1, D), jnp.float32), jnp.zeros((1, D), jnp.float32),
        (jax.random.normal(ks[2], (D, ff), jnp.float32) * s).astype(wdt),
        jnp.zeros((1, ff), jnp.float32),
        (jax.random.normal(ks[3], (ff, D), jnp.float32) * s).astype(wdt),
        jnp.zeros((1, D), jnp.float32),
        jnp.ones((1, D), jnp.float32), jnp.zeros((1, D), jnp.float32),
    )


def init_encoder_params(key, vocab_size, embed_size, role_vocab, role_dim, n_head):
    ks = jax.random.split(key, 8)
    D = embed_size
    params = {
        "embed_table": jax.random.normal(ks[0], (vocab_size, D), jnp.float32) * 0.02,
        "role_table": jax.random.normal(ks[1], (role_vocab, role_dim), jnp.float32) * 0.02,
        # MeetingTransformerEncoder: blocks are copy.deepcopy of one block, so all
        # layers share the same initial weights -> one param set reused n_layer times.
        "token_block": init_block_params(ks[2], D, 4 * D),
        # TurnLevelEncoder (ERNIE BertForPreTraining, simplified): one transformer
        # block + entity-fusion dense + LN.
        "sent_block": init_block_params(ks[3], D, 4 * D),
        "w_ent": (jax.random.normal(ks[4], (role_dim, D), jnp.float32) * 0.02
                  ).astype(jnp.bfloat16),
        "b_ent": jnp.zeros((1, D), jnp.float32),
        "g_fuse": jnp.ones((1, D), jnp.float32),
        "b_fuse": jnp.zeros((1, D), jnp.float32),
        # TopicSegment: Linear(D, 2) + CRF(num_tags=2)
        "w_cls": (jax.random.normal(ks[5], (D, 2), jnp.float32) * 0.02
                  ).astype(jnp.bfloat16),
        "b_cls": jnp.zeros((1, 2), jnp.float32),
        "crf_start": jnp.array([0.05, -0.05], jnp.float32),
        "crf_end": jnp.array([-0.03, 0.03], jnp.float32),
        "crf_trans": jnp.array([[0.02, -0.01], [0.04, -0.02]], jnp.float32),
        "n_head": n_head,
    }
    return params


# ----------------------------------------------------------------------------
# Encoder forward (mirrors Encoder.forward under opt without optional features)
# ----------------------------------------------------------------------------

OPT = {
    "vocab_size": 50,
    "WORLDLEVEL_LAYER": 2,
    "DROPOUT": 0.1,
    # no 'USE_POSENT', 'USE_ROLE', 'USE_ENTMASK', 'VARIATIONAL_DROPOUT'
}


def encoder_forward(params, x, x_role, x_pos, x_ent, topic_labels, topics_mask,
                    crf_decode=None):
    vocab_size = OPT["vocab_size"]
    n_layer = OPT["WORLDLEVEL_LAYER"]
    B, S, L = x.shape

    # vocab_x[vocab_x >= vocab_size] = 1
    vocab_x = jnp.where(x >= vocab_size, 1, x)
    embedded = jnp.take(params["embed_table"], vocab_x.reshape(-1), axis=0)
    D = embedded.shape[-1]
    # (no USE_POSENT -> no pos/ent embedding concat; x_pos / x_ent unused)

    # token-level transformer encoder over (B*S, L, D): both layers fused in one
    # pallas_call; half the sequences per grid step (2 parallel steps -> both
    # v7x TensorCores busy, overhead amortized on v5e/v6e).
    N = B * S
    n_blk = N // 2 if N % 2 == 0 else N
    h = embedded.reshape(N, L, D)
    h = run_token_encoder(h, params["token_block"], params["n_head"],
                          n_layer, n_blk)
    token_transformer_output = h.reshape(B, S, L, D)

    # sentence-level (turn-level) encoder on the [CLS]-position token, fused
    # with the ERNIE entity-fusion and the topic classifier in one pallas_call.
    sent_encoder_inputs = token_transformer_output[:, :, 0, :]          # (B, S, D)
    ent_emb = jnp.take(params["role_table"], x_role.reshape(-1), axis=0)
    ent_emb = ent_emb.reshape(B, S, -1)
    sent_encoder_outputs, logits = run_sent_head(
        sent_encoder_inputs, ent_emb, params["sent_block"],
        params["w_ent"], params["b_ent"], params["g_fuse"], params["b_fuse"],
        params["w_cls"], params["b_cls"], params["n_head"])
    # TODO(synk): full ERNIE BertForPreTraining (multi-layer knowledge fusion +
    # entity-candidate prediction head) approximated; role_ae_loss is zeroed by
    # the reference when 'USE_ENTMASK' not in opt, and is not returned anyway.

    # topic segmentation head loss (eval-mode dropout = identity)
    llh = crf_log_likelihood(logits, topic_labels, topics_mask,
                             params["crf_start"], params["crf_end"],
                             params["crf_trans"])
    # TODO(synk): crf_decode (nbest Viterbi decode) path not implemented.
    topic_segment_output = (-1.0 * llh, logits)

    return token_transformer_output, sent_encoder_outputs, topic_segment_output


# ----------------------------------------------------------------------------
# Main
# ----------------------------------------------------------------------------

if __name__ == "__main__":
    key = jax.random.PRNGKey(0)
    k_param, k_x, k_role, k_pos, k_ent, k_lab = jax.random.split(key, 6)

    B, S, L = 2, 4, 8            # batch, sent_num, x_len
    D = 32                       # embed_size == token_transformer_dim
    n_head = 4
    vocab_size = OPT["vocab_size"]
    role_vocab, role_dim = 8, 16

    params = init_encoder_params(k_param, vocab_size, D, role_vocab, role_dim, n_head)

    # some ids >= vocab_size to exercise the clipping-to-1 path
    x = jax.random.randint(k_x, (B, S, L), 0, vocab_size + 10, dtype=jnp.int32)
    x_role = jax.random.randint(k_role, (B, S), 0, role_vocab, dtype=jnp.int32)
    x_pos = jax.random.randint(k_pos, (B, S, L), 0, 5, dtype=jnp.int32)   # unused (no USE_POSENT)
    x_ent = jax.random.randint(k_ent, (B, S, L), 0, 5, dtype=jnp.int32)   # unused (no USE_POSENT)
    topic_labels = jax.random.randint(k_lab, (B, S), 0, 2, dtype=jnp.int32)
    topics_mask = jnp.ones((B, S), dtype=bool)

    fwd = jax.jit(functools.partial(encoder_forward, params))
    token_out, sent_out, (neg_loss, logits) = jax.block_until_ready(
        fwd(x, x_role, x_pos, x_ent, topic_labels, topics_mask)
    )

    assert token_out.shape == (B, S, L, D)
    assert sent_out.shape == (B, S, D)
    assert logits.shape == (B, S, 2)
    assert neg_loss.shape == ()
    assert jnp.isfinite(neg_loss)
    print("KERNEL_OK")
</pallas_src>

<mosaic_0001>
module attributes {stable_mosaic.version = 11 : i64} {
  func.func @token_encoder_kernel(%arg0: i32, %arg1: memref<4x8x32xf32, #tpu.memory_space<vmem>>, %arg2: memref<32x96xbf16, #tpu.memory_space<vmem>>, %arg3: memref<1x96xf32, #tpu.memory_space<vmem>>, %arg4: memref<32x32xbf16, #tpu.memory_space<vmem>>, %arg5: memref<1x32xf32, #tpu.memory_space<vmem>>, %arg6: memref<1x32xf32, #tpu.memory_space<vmem>>, %arg7: memref<1x32xf32, #tpu.memory_space<vmem>>, %arg8: memref<32x128xbf16, #tpu.memory_space<vmem>>, %arg9: memref<1x128xf32, #tpu.memory_space<vmem>>, %arg10: memref<128x32xbf16, #tpu.memory_space<vmem>>, %arg11: memref<1x32xf32, #tpu.memory_space<vmem>>, %arg12: memref<1x32xf32, #tpu.memory_space<vmem>>, %arg13: memref<1x32xf32, #tpu.memory_space<vmem>>, %arg14: memref<4x8x32xf32, #tpu.memory_space<vmem>>) attributes {dimension_semantics = [#tpu.dimension_semantics<parallel>], iteration_bounds = array<i64: 2>, scalar_prefetch = 0 : i64, scratch_operands = 0 : i64, tpu.core_type = #tpu.core_type<tc>, window_params = [{transform_indices = @transform_0, window_bounds = array<i64: 4, 8, 32>}, {pipeline_mode = #tpu.pipeline_mode<synchronous>, transform_indices = @transform_1, window_bounds = array<i64: 32, 96>}, {pipeline_mode = #tpu.pipeline_mode<synchronous>, transform_indices = @transform_2, window_bounds = array<i64: 1, 96>}, {pipeline_mode = #tpu.pipeline_mode<synchronous>, transform_indices = @transform_3, window_bounds = array<i64: 32, 32>}, {pipeline_mode = #tpu.pipeline_mode<synchronous>, transform_indices = @transform_4, window_bounds = array<i64: 1, 32>}, {pipeline_mode = #tpu.pipeline_mode<synchronous>, transform_indices = @transform_5, window_bounds = array<i64: 1, 32>}, {pipeline_mode = #tpu.pipeline_mode<synchronous>, transform_indices = @transform_6, window_bounds = array<i64: 1, 32>}, {pipeline_mode = #tpu.pipeline_mode<synchronous>, transform_indices = @transform_7, window_bounds = array<i64: 32, 128>}, {pipeline_mode = #tpu.pipeline_mode<synchronous>, transform_indices = @transform_8, window_bounds = array<i64: 1, 128>}, {pipeline_mode = #tpu.pipeline_mode<synchronous>, transform_indices = @transform_9, window_bounds = array<i64: 128, 32>}, {pipeline_mode = #tpu.pipeline_mode<synchronous>, transform_indices = @transform_10, window_bounds = array<i64: 1, 32>}, {pipeline_mode = #tpu.pipeline_mode<synchronous>, transform_indices = @transform_11, window_bounds = array<i64: 1, 32>}, {pipeline_mode = #tpu.pipeline_mode<synchronous>, transform_indices = @transform_12, window_bounds = array<i64: 1, 32>}, {transform_indices = @transform_13, window_bounds = array<i64: 4, 8, 32>}]} {
    %c0 = arith.constant 0 : index
    %c0_0 = arith.constant 0 : index
    %0 = vector.load %arg2[%c0, %c0_0] : memref<32x96xbf16, #tpu.memory_space<vmem>>, vector<32x96xbf16>
    %c0_1 = arith.constant 0 : index
    %c0_2 = arith.constant 0 : index
    %1 = vector.load %arg3[%c0_1, %c0_2] : memref<1x96xf32, #tpu.memory_space<vmem>>, vector<1x96xf32>
    %c0_3 = arith.constant 0 : index
    %c0_4 = arith.constant 0 : index
    %2 = vector.load %arg4[%c0_3, %c0_4] : memref<32x32xbf16, #tpu.memory_space<vmem>>, vector<32x32xbf16>
    %c0_5 = arith.constant 0 : index
    %c0_6 = arith.constant 0 : index
    %3 = vector.load %arg5[%c0_5, %c0_6] : memref<1x32xf32, #tpu.memory_space<vmem>>, vector<1x32xf32>
    %c0_7 = arith.constant 0 : index
    %c0_8 = arith.constant 0 : index
    %4 = vector.load %arg6[%c0_7, %c0_8] : memref<1x32xf32, #tpu.memory_space<vmem>>, vector<1x32xf32>
    %c0_9 = arith.constant 0 : index
    %c0_10 = arith.constant 0 : index
    %5 = vector.load %arg7[%c0_9, %c0_10] : memref<1x32xf32, #tpu.memory_space<vmem>>, vector<1x32xf32>
    %c0_11 = arith.constant 0 : index
    %c0_12 = arith.constant 0 : index
    %6 = vector.load %arg8[%c0_11, %c0_12] : memref<32x128xbf16, #tpu.memory_space<vmem>>, vector<32x128xbf16>
    %c0_13 = arith.constant 0 : index
    %c0_14 = arith.constant 0 : index
    %7 = vector.load %arg9[%c0_13, %c0_14] : memref<1x128xf32, #tpu.memory_space<vmem>>, vector<1x128xf32>
    %c0_15 = arith.constant 0 : index
    %c0_16 = arith.constant 0 : index
    %8 = vector.load %arg10[%c0_15, %c0_16] : memref<128x32xbf16, #tpu.memory_space<vmem>>, vector<128x32xbf16>
    %c0_17 = arith.constant 0 : index
    %c0_18 = arith.constant 0 : index
    %9 = vector.load %arg11[%c0_17, %c0_18] : memref<1x32xf32, #tpu.memory_space<vmem>>, vector<1x32xf32>
    %c0_19 = arith.constant 0 : index
    %c0_20 = arith.constant 0 : index
    %10 = vector.load %arg12[%c0_19, %c0_20] : memref<1x32xf32, #tpu.memory_space<vmem>>, vector<1x32xf32>
    %c0_21 = arith.constant 0 : index
    %c0_22 = arith.constant 0 : index
    %11 = vector.load %arg13[%c0_21, %c0_22] : memref<1x32xf32, #tpu.memory_space<vmem>>, vector<1x32xf32>
    %c0_23 = arith.constant 0 : index
    %c0_24 = arith.constant 0 : index
    %c0_25 = arith.constant 0 : index
    %12 = vector.load %arg1[%c0_23, %c0_24, %c0_25] : memref<4x8x32xf32, #tpu.memory_space<vmem>>, vector<4x8x32xf32>
    %13 = vector.shape_cast %12 : vector<4x8x32xf32> to vector<32x32xf32>
    %14 = arith.truncf %13 : vector<32x32xf32> to vector<32x32xbf16>
    %cst = arith.constant dense<0.000000e+00> : vector<32x96xf32>
    %15 = tpu.matmul %14, %0, %cst {dimension_numbers = #tpu.dot_dimension_numbers<[1], [0], [0], [1], [0, 0, 1, 1], [], []>} : vector<32x32xbf16>, vector<32x96xbf16>, vector<32x96xf32> -> vector<32x96xf32>
    %16 = vector.broadcast %1 : vector<1x96xf32> to vector<32x96xf32>
    %17 = arith.addf %15, %16 : vector<32x96xf32>
    %18 = vector.extract_strided_slice %17 {offsets = [0, 0], sizes = [32, 32], strides = [1, 1]} : vector<32x96xf32> to vector<32x32xf32>
    %19 = vector.shape_cast %18 : vector<32x32xf32> to vector<4x8x32xf32>
    %20 = vector.extract_strided_slice %17 {offsets = [0, 32], sizes = [32, 32], strides = [1, 1]} : vector<32x96xf32> to vector<32x32xf32>
    %21 = vector.shape_cast %20 : vector<32x32xf32> to vector<4x8x32xf32>
    %22 = vector.extract_strided_slice %17 {offsets = [0, 64], sizes = [32, 32], strides = [1, 1]} : vector<32x96xf32> to vector<32x32xf32>
    %23 = vector.shape_cast %22 : vector<32x32xf32> to vector<4x8x32xf32>
    %24 = vector.extract_strided_slice %19 {offsets = [0, 0, 0], sizes = [4, 8, 8], strides = [1, 1, 1]} : vector<4x8x32xf32> to vector<4x8x8xf32>
    %25 = arith.truncf %24 : vector<4x8x8xf32> to vector<4x8x8xbf16>
    %26 = vector.extract_strided_slice %21 {offsets = [0, 0, 0], sizes = [4, 8, 8], strides = [1, 1, 1]} : vector<4x8x32xf32> to vector<4x8x8xf32>
    %27 = arith.truncf %26 : vector<4x8x8xf32> to vector<4x8x8xbf16>
    %28 = vector.extract_strided_slice %23 {offsets = [0, 0, 0], sizes = [4, 8, 8], strides = [1, 1, 1]} : vector<4x8x32xf32> to vector<4x8x8xf32>
    %29 = arith.truncf %28 : vector<4x8x8xf32> to vector<4x8x8xbf16>
    "tpu.trace_start"() <{level = 10 : i32, message = "bid,bjd->bij"}> : () -> ()
    %cst_26 = arith.constant dense<0.000000e+00> : vector<4x8x8xf32>
    %30 = tpu.matmul %25, %27, %cst_26 {dimension_numbers = #tpu.dot_dimension_numbers<[2], [2], [1], [1], [0, 0, 0, 1, 1, 1], [0], [0]>} : vector<4x8x8xbf16>, vector<4x8x8xbf16>, vector<4x8x8xf32> -> vector<4x8x8xf32>
    "tpu.trace_stop"() : () -> ()
    %cst_27 = arith.constant 0.353553385 : f32
    %31 = vector.broadcast %cst_27 : f32 to vector<4x8x8xf32>
    %32 = arith.mulf %30, %31 : vector<4x8x8xf32>
    %cst_28 = arith.constant dense<0xFF800000> : vector<4x8xf32>
    %33 = vector.multi_reduction <maximumf>, %32, %cst_28 [2] : vector<4x8x8xf32> to vector<4x8xf32>
    %34 = vector.shape_cast %33 : vector<4x8xf32> to vector<4x8x1xf32>
    %35 = vector.broadcast %34 : vector<4x8x1xf32> to vector<4x8x8xf32>
    %36 = arith.subf %32, %35 : vector<4x8x8xf32>
    %37 = math.exp %36 : vector<4x8x8xf32>
    %cst_29 = arith.constant dense<0.000000e+00> : vector<4x8xf32>
    %38 = vector.multi_reduction <add>, %37, %cst_29 [2] : vector<4x8x8xf32> to vector<4x8xf32>
    %39 = vector.shape_cast %38 : vector<4x8xf32> to vector<4x8x1xf32>
    %40 = tpu.reciprocal %39 {approx = true} : vector<4x8x1xf32> -> vector<4x8x1xf32>
    %41 = vector.broadcast %40 : vector<4x8x1xf32> to vector<4x8x8xf32>
    %42 = arith.mulf %37, %41 : vector<4x8x8xf32>
    %43 = arith.truncf %42 : vector<4x8x8xf32> to vector<4x8x8xbf16>
    "tpu.trace_start"() <{level = 10 : i32, message = "bij,bjd->bid"}> : () -> ()
    %cst_30 = arith.constant dense<0.000000e+00> : vector<4x8x8xf32>
    %44 = tpu.matmul %43, %29, %cst_30 {dimension_numbers = #tpu.dot_dimension_numbers<[2], [1], [1], [2], [0, 0, 0, 1, 1, 2], [0], [0]>} : vector<4x8x8xbf16>, vector<4x8x8xbf16>, vector<4x8x8xf32> -> vector<4x8x8xf32>
    "tpu.trace_stop"() : () -> ()
    %45 = vector.shape_cast %44 : vector<4x8x8xf32> to vector<32x8xf32>
    %46 = arith.truncf %45 : vector<32x8xf32> to vector<32x8xbf16>
    %47 = vector.extract_strided_slice %2 {offsets = [0, 0], sizes = [8, 32], strides = [1, 1]} : vector<32x32xbf16> to vector<8x32xbf16>
    %cst_31 = arith.constant dense<0.000000e+00> : vector<32x32xf32>
    %48 = tpu.matmul %46, %47, %cst_31 {dimension_numbers = #tpu.dot_dimension_numbers<[1], [0], [0], [1], [0, 0, 1, 1], [], []>} : vector<32x8xbf16>, vector<8x32xbf16>, vector<32x32xf32> -> vector<32x32xf32>
    %49 = vector.extract_strided_slice %19 {offsets = [0, 0, 8], sizes = [4, 8, 8], strides = [1, 1, 1]} : vector<4x8x32xf32> to vector<4x8x8xf32>
    %50 = arith.truncf %49 : vector<4x8x8xf32> to vector<4x8x8xbf16>
    %51 = vector.extract_strided_slice %21 {offsets = [0, 0, 8], sizes = [4, 8, 8], strides = [1, 1, 1]} : vector<4x8x32xf32> to vector<4x8x8xf32>
    %52 = arith.truncf %51 : vector<4x8x8xf32> to vector<4x8x8xbf16>
    %53 = vector.extract_strided_slice %23 {offsets = [0, 0, 8], sizes = [4, 8, 8], strides = [1, 1, 1]} : vector<4x8x32xf32> to vector<4x8x8xf32>
    %54 = arith.truncf %53 : vector<4x8x8xf32> to vector<4x8x8xbf16>
    "tpu.trace_start"() <{level = 10 : i32, message = "bid,bjd->bij"}> : () -> ()
    %cst_32 = arith.constant dense<0.000000e+00> : vector<4x8x8xf32>
    %55 = tpu.matmul %50, %52, %cst_32 {dimension_numbers = #tpu.dot_dimension_numbers<[2], [2], [1], [1], [0, 0, 0, 1, 1, 1], [0], [0]>} : vector<4x8x8xbf16>, vector<4x8x8xbf16>, vector<4x8x8xf32> -> vector<4x8x8xf32>
    "tpu.trace_stop"() : () -> ()
    %cst_33 = arith.constant 0.353553385 : f32
    %56 = vector.broadcast %cst_33 : f32 to vector<4x8x8xf32>
    %57 = arith.mulf %55, %56 : vector<4x8x8xf32>
    %cst_34 = arith.constant dense<0xFF800000> : vector<4x8xf32>
    %58 = vector.multi_reduction <maximumf>, %57, %cst_34 [2] : vector<4x8x8xf32> to vector<4x8xf32>
    %59 = vector.shape_cast %58 : vector<4x8xf32> to vector<4x8x1xf32>
    %60 = vector.broadcast %59 : vector<4x8x1xf32> to vector<4x8x8xf32>
    %61 = arith.subf %57, %60 : vector<4x8x8xf32>
    %62 = math.exp %61 : vector<4x8x8xf32>
    %cst_35 = arith.constant dense<0.000000e+00> : vector<4x8xf32>
    %63 = vector.multi_reduction <add>, %62, %cst_35 [2] : vector<4x8x8xf32> to vector<4x8xf32>
    %64 = vector.shape_cast %63 : vector<4x8xf32> to vector<4x8x1xf32>
    %65 = tpu.reciprocal %64 {approx = true} : vector<4x8x1xf32> -> vector<4x8x1xf32>
    %66 = vector.broadcast %65 : vector<4x8x1xf32> to vector<4x8x8xf32>
    %67 = arith.mulf %62, %66 : vector<4x8x8xf32>
    %68 = arith.truncf %67 : vector<4x8x8xf32> to vector<4x8x8xbf16>
    "tpu.trace_start"() <{level = 10 : i32, message = "bij,bjd->bid"}> : () -> ()
    %cst_36 = arith.constant dense<0.000000e+00> : vector<4x8x8xf32>
    %69 = tpu.matmul %68, %54, %cst_36 {dimension_numbers = #tpu.dot_dimension_numbers<[2], [1], [1], [2], [0, 0, 0, 1, 1, 2], [0], [0]>} : vector<4x8x8xbf16>, vector<4x8x8xbf16>, vector<4x8x8xf32> -> vector<4x8x8xf32>
    "tpu.trace_stop"() : () -> ()
    %70 = vector.shape_cast %69 : vector<4x8x8xf32> to vector<32x8xf32>
    %71 = arith.truncf %70 : vector<32x8xf32> to vector<32x8xbf16>
    %72 = vector.extract_strided_slice %2 {offsets = [8, 0], sizes = [8, 32], strides = [1, 1]} : vector<32x32xbf16> to vector<8x32xbf16>
    %cst_37 = arith.constant dense<0.000000e+00> : vector<32x32xf32>
    %73 = tpu.matmul %71, %72, %cst_37 {dimension_numbers = #tpu.dot_dimension_numbers<[1], [0], [0], [1], [0, 0, 1, 1], [], []>} : vector<32x8xbf16>, vector<8x32xbf16>, vector<32x32xf32> -> vector<32x32xf32>
    %74 = arith.addf %48, %73 : vector<32x32xf32>
    %75 = vector.extract_strided_slice %19 {offsets = [0, 0, 16], sizes = [4, 8, 8], strides = [1, 1, 1]} : vector<4x8x32xf32> to vector<4x8x8xf32>
    %76 = arith.truncf %75 : vector<4x8x8xf32> to vector<4x8x8xbf16>
    %77 = vector.extract_strided_slice %21 {offsets = [0, 0, 16], sizes = [4, 8, 8], strides = [1, 1, 1]} : vector<4x8x32xf32> to vector<4x8x8xf32>
    %78 = arith.truncf %77 : vector<4x8x8xf32> to vector<4x8x8xbf16>
    %79 = vector.extract_strided_slice %23 {offsets = [0, 0, 16], sizes = [4, 8, 8], strides = [1, 1, 1]} : vector<4x8x32xf32> to vector<4x8x8xf32>
    %80 = arith.truncf %79 : vector<4x8x8xf32> to vector<4x8x8xbf16>
    "tpu.trace_start"() <{level = 10 : i32, message = "bid,bjd->bij"}> : () -> ()
    %cst_38 = arith.constant dense<0.000000e+00> : vector<4x8x8xf32>
    %81 = tpu.matmul %76, %78, %cst_38 {dimension_numbers = #tpu.dot_dimension_numbers<[2], [2], [1], [1], [0, 0, 0, 1, 1, 1], [0], [0]>} : vector<4x8x8xbf16>, vector<4x8x8xbf16>, vector<4x8x8xf32> -> vector<4x8x8xf32>
    "tpu.trace_stop"() : () -> ()
    %cst_39 = arith.constant 0.353553385 : f32
    %82 = vector.broadcast %cst_39 : f32 to vector<4x8x8xf32>
    %83 = arith.mulf %81, %82 : vector<4x8x8xf32>
    %cst_40 = arith.constant dense<0xFF800000> : vector<4x8xf32>
    %84 = vector.multi_reduction <maximumf>, %83, %cst_40 [2] : vector<4x8x8xf32> to vector<4x8xf32>
    %85 = vector.shape_cast %84 : vector<4x8xf32> to vector<4x8x1xf32>
    %86 = vector.broadcast %85 : vector<4x8x1xf32> to vector<4x8x8xf32>
    %87 = arith.subf %83, %86 : vector<4x8x8xf32>
    %88 = math.exp %87 : vector<4x8x8xf32>
    %cst_41 = arith.constant dense<0.000000e+00> : vector<4x8xf32>
    %89 = vector.multi_reduction <add>, %88, %cst_41 [2] : vector<4x8x8xf32> to vector<4x8xf32>
    %90 = vector.shape_cast %89 : vector<4x8xf32> to vector<4x8x1xf32>
    %91 = tpu.reciprocal %90 {approx = true} : vector<4x8x1xf32> -> vector<4x8x1xf32>
    %92 = vector.broadcast %91 : vector<4x8x1xf32> to vector<4x8x8xf32>
    %93 = arith.mulf %88, %92 : vector<4x8x8xf32>
    %94 = arith.truncf %93 : vector<4x8x8xf32> to vector<4x8x8xbf16>
    "tpu.trace_start"() <{level = 10 : i32, message = "bij,bjd->bid"}> : () -> ()
    %cst_42 = arith.constant dense<0.000000e+00> : vector<4x8x8xf32>
    %95 = tpu.matmul %94, %80, %cst_42 {dimension_numbers = #tpu.dot_dimension_numbers<[2], [1], [1], [2], [0, 0, 0, 1, 1, 2], [0], [0]>} : vector<4x8x8xbf16>, vector<4x8x8xbf16>, vector<4x8x8xf32> -> vector<4x8x8xf32>
    "tpu.trace_stop"() : () -> ()
    %96 = vector.shape_cast %95 : vector<4x8x8xf32> to vector<32x8xf32>
    %97 = arith.truncf %96 : vector<32x8xf32> to vector<32x8xbf16>
    %98 = vector.extract_strided_slice %2 {offsets = [16, 0], sizes = [8, 32], strides = [1, 1]} : vector<32x32xbf16> to vector<8x32xbf16>
    %cst_43 = arith.constant dense<0.000000e+00> : vector<32x32xf32>
    %99 = tpu.matmul %97, %98, %cst_43 {dimension_numbers = #tpu.dot_dimension_numbers<[1], [0], [0], [1], [0, 0, 1, 1], [], []>} : vector<32x8xbf16>, vector<8x32xbf16>, vector<32x32xf32> -> vector<32x32xf32>
    %100 = arith.addf %74, %99 : vector<32x32xf32>
    %101 = vector.extract_strided_slice %19 {offsets = [0, 0, 24], sizes = [4, 8, 8], strides = [1, 1, 1]} : vector<4x8x32xf32> to vector<4x8x8xf32>
    %102 = arith.truncf %101 : vector<4x8x8xf32> to vector<4x8x8xbf16>
    %103 = vector.extract_strided_slice %21 {offsets = [0, 0, 24], sizes = [4, 8, 8], strides = [1, 1, 1]} : vector<4x8x32xf32> to vector<4x8x8xf32>
    %104 = arith.truncf %103 : vector<4x8x8xf32> to vector<4x8x8xbf16>
    %105 = vector.extract_strided_slice %23 {offsets = [0, 0, 24], sizes = [4, 8, 8], strides = [1, 1, 1]} : vector<4x8x32xf32> to vector<4x8x8xf32>
    %106 = arith.truncf %105 : vector<4x8x8xf32> to vector<4x8x8xbf16>
    "tpu.trace_start"() <{level = 10 : i32, message = "bid,bjd->bij"}> : () -> ()
    %cst_44 = arith.constant dense<0.000000e+00> : vector<4x8x8xf32>
    %107 = tpu.matmul %102, %104, %cst_44 {dimension_numbers = #tpu.dot_dimension_numbers<[2], [2], [1], [1], [0, 0, 0, 1, 1, 1], [0], [0]>} : vector<4x8x8xbf16>, vector<4x8x8xbf16>, vector<4x8x8xf32> -> vector<4x8x8xf32>
    "tpu.trace_stop"() : () -> ()
    %cst_45 = arith.constant 0.353553385 : f32
    %108 = vector.broadcast %cst_45 : f32 to vector<4x8x8xf32>
    %109 = arith.mulf %107, %108 : vector<4x8x8xf32>
    %cst_46 = arith.constant dense<0xFF800000> : vector<4x8xf32>
    %110 = vector.multi_reduction <maximumf>, %109, %cst_46 [2] : vector<4x8x8xf32> to vector<4x8xf32>
    %111 = vector.shape_cast %110 : vector<4x8xf32> to vector<4x8x1xf32>
    %112 = vector.broadcast %111 : vector<4x8x1xf32> to vector<4x8x8xf32>
    %113 = arith.subf %109, %112 : vector<4x8x8xf32>
    %114 = math.exp %113 : vector<4x8x8xf32>
    %cst_47 = arith.constant dense<0.000000e+00> : vector<4x8xf32>
    %115 = vector.multi_reduction <add>, %114, %cst_47 [2] : vector<4x8x8xf32> to vector<4x8xf32>
    %116 = vector.shape_cast %115 : vector<4x8xf32> to vector<4x8x1xf32>
    %117 = tpu.reciprocal %116 {approx = true} : vector<4x8x1xf32> -> vector<4x8x1xf32>
    %118 = vector.broadcast %117 : vector<4x8x1xf32> to vector<4x8x8xf32>
    %119 = arith.mulf %114, %118 : vector<4x8x8xf32>
    %120 = arith.truncf %119 : vector<4x8x8xf32> to vector<4x8x8xbf16>
    "tpu.trace_start"() <{level = 10 : i32, message = "bij,bjd->bid"}> : () -> ()
    %cst_48 = arith.constant dense<0.000000e+00> : vector<4x8x8xf32>
    %121 = tpu.matmul %120, %106, %cst_48 {dimension_numbers = #tpu.dot_dimension_numbers<[2], [1], [1], [2], [0, 0, 0, 1, 1, 2], [0], [0]>} : vector<4x8x8xbf16>, vector<4x8x8xbf16>, vector<4x8x8xf32> -> vector<4x8x8xf32>
    "tpu.trace_stop"() : () -> ()
    %122 = vector.shape_cast %121 : vector<4x8x8xf32> to vector<32x8xf32>
    %123 = arith.truncf %122 : vector<32x8xf32> to vector<32x8xbf16>
    %124 = vector.extract_strided_slice %2 {offsets = [24, 0], sizes = [8, 32], strides = [1, 1]} : vector<32x32xbf16> to vector<8x32xbf16>
    %cst_49 = arith.constant dense<0.000000e+00> : vector<32x32xf32>
    %125 = tpu.matmul %123, %124, %cst_49 {dimension_numbers = #tpu.dot_dimension_numbers<[1], [0], [0], [1], [0, 0, 1, 1], [], []>} : vector<32x8xbf16>, vector<8x32xbf16>, vector<32x32xf32> -> vector<32x32xf32>
    %126 = arith.addf %100, %125 : vector<32x32xf32>
    %127 = vector.broadcast %3 : vector<1x32xf32> to vector<32x32xf32>
    %128 = arith.addf %126, %127 : vector<32x32xf32>
    %129 = arith.addf %13, %128 : vector<32x32xf32>
    %cst_50 = arith.constant dense<0.000000e+00> : vector<32xf32>
    %130 = vector.multi_reduction <add>, %129, %cst_50 [1] : vector<32x32xf32> to vector<32xf32>
    %131 = vector.shape_cast %130 : vector<32xf32> to vector<32x1xf32>
    %cst_51 = arith.constant 3.200000e+01 : f32
    %132 = vector.broadcast %cst_51 : f32 to vector<32x1xf32>
    %133 = arith.divf %131, %132 : vector<32x1xf32>
    %134 = vector.broadcast %133 : vector<32x1xf32> to vector<32x32xf32>
    %135 = arith.subf %129, %134 : vector<32x32xf32>
    %136 = arith.mulf %135, %135 : vector<32x32xf32>
    %cst_52 = arith.constant dense<0.000000e+00> : vector<32xf32>
    %137 = vector.multi_reduction <add>, %136, %cst_52 [1] : vector<32x32xf32> to vector<32xf32>
    %138 = vector.shape_cast %137 : vector<32xf32> to vector<32x1xf32>
    %cst_53 = arith.constant 3.200000e+01 : f32
    %139 = vector.broadcast %cst_53 : f32 to vector<32x1xf32>
    %140 = arith.divf %138, %139 : vector<32x1xf32>
    %141 = vector.broadcast %133 : vector<32x1xf32> to vector<32x32xf32>
    %142 = arith.subf %129, %141 : vector<32x32xf32>
    %cst_54 = arith.constant 9.99999974E-6 : f32
    %143 = vector.broadcast %cst_54 : f32 to vector<32x1xf32>
    %144 = arith.addf %140, %143 : vector<32x1xf32>
    %145 = math.rsqrt %144 : vector<32x1xf32>
    %146 = vector.broadcast %145 : vector<32x1xf32> to vector<32x32xf32>
    %147 = arith.mulf %142, %146 : vector<32x32xf32>
    %148 = vector.broadcast %4 : vector<1x32xf32> to vector<32x32xf32>
    %149 = arith.mulf %147, %148 : vector<32x32xf32>
    %150 = vector.broadcast %5 : vector<1x32xf32> to vector<32x32xf32>
    %151 = arith.addf %149, %150 : vector<32x32xf32>
    %152 = arith.truncf %151 : vector<32x32xf32> to vector<32x32xbf16>
    %cst_55 = arith.constant dense<0.000000e+00> : vector<32x128xf32>
    %153 = tpu.matmul %152, %6, %cst_55 {dimension_numbers = #tpu.dot_dimension_numbers<[1], [0], [0], [1], [0, 0, 1, 1], [], []>} : vector<32x32xbf16>, vector<32x128xbf16>, vector<32x128xf32> -> vector<32x128xf32>
    %154 = vector.broadcast %7 : vector<1x128xf32> to vector<32x128xf32>
    %155 = arith.addf %153, %154 : vector<32x128xf32>
    %cst_56 = arith.constant 5.000000e-01 : f32
    %156 = vector.broadcast %cst_56 : f32 to vector<32x128xf32>
    %157 = arith.mulf %156, %155 : vector<32x128xf32>
    %158 = arith.mulf %155, %155 : vector<32x128xf32>
    %159 = arith.mulf %158, %155 : vector<32x128xf32>
    %cst_57 = arith.constant 4.471500e-02 : f32
    %160 = vector.broadcast %cst_57 : f32 to vector<32x128xf32>
    %161 = arith.mulf %160, %159 : vector<32x128xf32>
    %162 = arith.addf %155, %161 : vector<32x128xf32>
    %cst_58 = arith.constant 0.797884583 : f32
    %163 = vector.broadcast %cst_58 : f32 to vector<32x128xf32>
    %164 = arith.mulf %163, %162 : vector<32x128xf32>
    %165 = math.tanh %164 : vector<32x128xf32>
    %cst_59 = arith.constant 1.000000e+00 : f32
    %166 = vector.broadcast %cst_59 : f32 to vector<32x128xf32>
    %167 = arith.addf %166, %165 : vector<32x128xf32>
    %168 = arith.mulf %157, %167 : vector<32x128xf32>
    %169 = arith.truncf %168 : vector<32x128xf32> to vector<32x128xbf16>
    %cst_60 = arith.constant dense<0.000000e+00> : vector<32x32xf32>
    %170 = tpu.matmul %169, %8, %cst_60 {dimension_numbers = #tpu.dot_dimension_numbers<[1], [0], [0], [1], [0, 0, 1, 1], [], []>} : vector<32x128xbf16>, vector<128x32xbf16>, vector<32x32xf32> -> vector<32x32xf32>
    %171 = vector.broadcast %9 : vector<1x32xf32> to vector<32x32xf32>
    %172 = arith.addf %170, %171 : vector<32x32xf32>
    %173 = arith.addf %151, %172 : vector<32x32xf32>
    %cst_61 = arith.constant dense<0.000000e+00> : vector<32xf32>
    %174 = vector.multi_reduction <add>, %173, %cst_61 [1] : vector<32x32xf32> to vector<32xf32>
    %175 = vector.shape_cast %174 : vector<32xf32> to vector<32x1xf32>
    %cst_62 = arith.constant 3.200000e+01 : f32
    %176 = vector.broadcast %cst_62 : f32 to vector<32x1xf32>
    %177 = arith.divf %175, %176 : vector<32x1xf32>
    %178 = vector.broadcast %177 : vector<32x1xf32> to vector<32x32xf32>
    %179 = arith.subf %173, %178 : vector<32x32xf32>
    %180 = arith.mulf %179, %179 : vector<32x32xf32>
    %cst_63 = arith.constant dense<0.000000e+00> : vector<32xf32>
    %181 = vector.multi_reduction <add>, %180, %cst_63 [1] : vector<32x32xf32> to vector<32xf32>
    %182 = vector.shape_cast %181 : vector<32xf32> to vector<32x1xf32>
    %cst_64 = arith.constant 3.200000e+01 : f32
    %183 = vector.broadcast %cst_64 : f32 to vector<32x1xf32>
    %184 = arith.divf %182, %183 : vector<32x1xf32>
    %185 = vector.broadcast %177 : vector<32x1xf32> to vector<32x32xf32>
    %186 = arith.subf %173, %185 : vector<32x32xf32>
    %cst_65 = arith.constant 9.99999974E-6 : f32
    %187 = vector.broadcast %cst_65 : f32 to vector<32x1xf32>
    %188 = arith.addf %184, %187 : vector<32x1xf32>
    %189 = math.rsqrt %188 : vector<32x1xf32>
    %190 = vector.broadcast %189 : vector<32x1xf32> to vector<32x32xf32>
    %191 = arith.mulf %186, %190 : vector<32x32xf32>
    %192 = vector.broadcast %10 : vector<1x32xf32> to vector<32x32xf32>
    %193 = arith.mulf %191, %192 : vector<32x32xf32>
    %194 = vector.broadcast %11 : vector<1x32xf32> to vector<32x32xf32>
    %195 = arith.addf %193, %194 : vector<32x32xf32>
    %196 = arith.truncf %195 : vector<32x32xf32> to vector<32x32xbf16>
    %cst_66 = arith.constant dense<0.000000e+00> : vector<32x96xf32>
    %197 = tpu.matmul %196, %0, %cst_66 {dimension_numbers = #tpu.dot_dimension_numbers<[1], [0], [0], [1], [0, 0, 1, 1], [], []>} : vector<32x32xbf16>, vector<32x96xbf16>, vector<32x96xf32> -> vector<32x96xf32>
    %198 = vector.broadcast %1 : vector<1x96xf32> to vector<32x96xf32>
    %199 = arith.addf %197, %198 : vector<32x96xf32>
    %200 = vector.extract_strided_slice %199 {offsets = [0, 0], sizes = [32, 32], strides = [1, 1]} : vector<32x96xf32> to vector<32x32xf32>
    %201 = vector.shape_cast %200 : vector<32x32xf32> to vector<4x8x32xf32>
    %202 = vector.extract_strided_slice %199 {offsets = [0, 32], sizes = [32, 32], strides = [1, 1]} : vector<32x96xf32> to vector<32x32xf32>
    %203 = vector.shape_cast %202 : vector<32x32xf32> to vector<4x8x32xf32>
    %204 = vector.extract_strided_slice %199 {offsets = [0, 64], sizes = [32, 32], strides = [1, 1]} : vector<32x96xf32> to vector<32x32xf32>
    %205 = vector.shape_cast %204 : vector<32x32xf32> to vector<4x8x32xf32>
    %206 = vector.extract_strided_slice %201 {offsets = [0, 0, 0], sizes = [4, 8, 8], strides = [1, 1, 1]} : vector<4x8x32xf32> to vector<4x8x8xf32>
    %207 = arith.truncf %206 : vector<4x8x8xf32> to vector<4x8x8xbf16>
    %208 = vector.extract_strided_slice %203 {offsets = [0, 0, 0], sizes = [4, 8, 8], strides = [1, 1, 1]} : vector<4x8x32xf32> to vector<4x8x8xf32>
    %209 = arith.truncf %208 : vector<4x8x8xf32> to vector<4x8x8xbf16>
    %210 = vector.extract_strided_slice %205 {offsets = [0, 0, 0], sizes = [4, 8, 8], strides = [1, 1, 1]} : vector<4x8x32xf32> to vector<4x8x8xf32>
    %211 = arith.truncf %210 : vector<4x8x8xf32> to vector<4x8x8xbf16>
    "tpu.trace_start"() <{level = 10 : i32, message = "bid,bjd->bij"}> : () -> ()
    %cst_67 = arith.constant dense<0.000000e+00> : vector<4x8x8xf32>
    %212 = tpu.matmul %207, %209, %cst_67 {dimension_numbers = #tpu.dot_dimension_numbers<[2], [2], [1], [1], [0, 0, 0, 1, 1, 1], [0], [0]>} : vector<4x8x8xbf16>, vector<4x8x8xbf16>, vector<4x8x8xf32> -> vector<4x8x8xf32>
    "tpu.trace_stop"() : () -> ()
    %cst_68 = arith.constant 0.353553385 : f32
    %213 = vector.broadcast %cst_68 : f32 to vector<4x8x8xf32>
    %214 = arith.mulf %212, %213 : vector<4x8x8xf32>
    %cst_69 = arith.constant dense<0xFF800000> : vector<4x8xf32>
    %215 = vector.multi_reduction <maximumf>, %214, %cst_69 [2] : vector<4x8x8xf32> to vector<4x8xf32>
    %216 = vector.shape_cast %215 : vector<4x8xf32> to vector<4x8x1xf32>
    %217 = vector.broadcast %216 : vector<4x8x1xf32> to vector<4x8x8xf32>
    %218 = arith.subf %214, %217 : vector<4x8x8xf32>
    %219 = math.exp %218 : vector<4x8x8xf32>
    %cst_70 = arith.constant dense<0.000000e+00> : vector<4x8xf32>
    %220 = vector.multi_reduction <add>, %219, %cst_70 [2] : vector<4x8x8xf32> to vector<4x8xf32>
    %221 = vector.shape_cast %220 : vector<4x8xf32> to vector<4x8x1xf32>
    %222 = tpu.reciprocal %221 {approx = true} : vector<4x8x1xf32> -> vector<4x8x1xf32>
    %223 = vector.broadcast %222 : vector<4x8x1xf32> to vector<4x8x8xf32>
    %224 = arith.mulf %219, %223 : vector<4x8x8xf32>
    %225 = arith.truncf %224 : vector<4x8x8xf32> to vector<4x8x8xbf16>
    "tpu.trace_start"() <{level = 10 : i32, message = "bij,bjd->bid"}> : () -> ()
    %cst_71 = arith.constant dense<0.000000e+00> : vector<4x8x8xf32>
    %226 = tpu.matmul %225, %211, %cst_71 {dimension_numbers = #tpu.dot_dimension_numbers<[2], [1], [1], [2], [0, 0, 0, 1, 1, 2], [0], [0]>} : vector<4x8x8xbf16>, vector<4x8x8xbf16>, vector<4x8x8xf32> -> vector<4x8x8xf32>
    "tpu.trace_stop"() : () -> ()
    %227 = vector.shape_cast %226 : vector<4x8x8xf32> to vector<32x8xf32>
    %228 = arith.truncf %227 : vector<32x8xf32> to vector<32x8xbf16>
    %229 = vector.extract_strided_slice %2 {offsets = [0, 0], sizes = [8, 32], strides = [1, 1]} : vector<32x32xbf16> to vector<8x32xbf16>
    %cst_72 = arith.constant dense<0.000000e+00> : vector<32x32xf32>
    %230 = tpu.matmul %228, %229, %cst_72 {dimension_numbers = #tpu.dot_dimension_numbers<[1], [0], [0], [1], [0, 0, 1, 1], [], []>} : vector<32x8xbf16>, vector<8x32xbf16>, vector<32x32xf32> -> vector<32x32xf32>
    %231 = vector.extract_strided_slice %201 {offsets = [0, 0, 8], sizes = [4, 8, 8], strides = [1, 1, 1]} : vector<4x8x32xf32> to vector<4x8x8xf32>
    %232 = arith.truncf %231 : vector<4x8x8xf32> to vector<4x8x8xbf16>
    %233 = vector.extract_strided_slice %203 {offsets = [0, 0, 8], sizes = [4, 8, 8], strides = [1, 1, 1]} : vector<4x8x32xf32> to vector<4x8x8xf32>
    %234 = arith.truncf %233 : vector<4x8x8xf32> to vector<4x8x8xbf16>
    %235 = vector.extract_strided_slice %205 {offsets = [0, 0, 8], sizes = [4, 8, 8], strides = [1, 1, 1]} : vector<4x8x32xf32> to vector<4x8x8xf32>
    %236 = arith.truncf %235 : vector<4x8x8xf32> to vector<4x8x8xbf16>
    "tpu.trace_start"() <{level = 10 : i32, message = "bid,bjd->bij"}> : () -> ()
    %cst_73 = arith.constant dense<0.000000e+00> : vector<4x8x8xf32>
    %237 = tpu.matmul %232, %234, %cst_73 {dimension_numbers = #tpu.dot_dimension_numbers<[2], [2], [1], [1], [0, 0, 0, 1, 1, 1], [0], [0]>} : vector<4x8x8xbf16>, vector<4x8x8xbf16>, vector<4x8x8xf32> -> vector<4x8x8xf32>
    "tpu.trace_stop"() : () -> ()
    %cst_74 = arith.constant 0.353553385 : f32
    %238 = vector.broadcast %cst_74 : f32 to vector<4x8x8xf32>
    %239 = arith.mulf %237, %238 : vector<4x8x8xf32>
    %cst_75 = arith.constant dense<0xFF800000> : vector<4x8xf32>
    %240 = vector.multi_reduction <maximumf>, %239, %cst_75 [2] : vector<4x8x8xf32> to vector<4x8xf32>
    %241 = vector.shape_cast %240 : vector<4x8xf32> to vector<4x8x1xf32>
    %242 = vector.broadcast %241 : vector<4x8x1xf32> to vector<4x8x8xf32>
    %243 = arith.subf %239, %242 : vector<4x8x8xf32>
    %244 = math.exp %243 : vector<4x8x8xf32>
    %cst_76 = arith.constant dense<0.000000e+00> : vector<4x8xf32>
    %245 = vector.multi_reduction <add>, %244, %cst_76 [2] : vector<4x8x8xf32> to vector<4x8xf32>
    %246 = vector.shape_cast %245 : vector<4x8xf32> to vector<4x8x1xf32>
    %247 = tpu.reciprocal %246 {approx = true} : vector<4x8x1xf32> -> vector<4x8x1xf32>
    %248 = vector.broadcast %247 : vector<4x8x1xf32> to vector<4x8x8xf32>
    %249 = arith.mulf %244, %248 : vector<4x8x8xf32>
    %250 = arith.truncf %249 : vector<4x8x8xf32> to vector<4x8x8xbf16>
    "tpu.trace_start"() <{level = 10 : i32, message = "bij,bjd->bid"}> : () -> ()
    %cst_77 = arith.constant dense<0.000000e+00> : vector<4x8x8xf32>
    %251 = tpu.matmul %250, %236, %cst_77 {dimension_numbers = #tpu.dot_dimension_numbers<[2], [1], [1], [2], [0, 0, 0, 1, 1, 2], [0], [0]>} : vector<4x8x8xbf16>, vector<4x8x8xbf16>, vector<4x8x8xf32> -> vector<4x8x8xf32>
    "tpu.trace_stop"() : () -> ()
    %252 = vector.shape_cast %251 : vector<4x8x8xf32> to vector<32x8xf32>
    %253 = arith.truncf %252 : vector<32x8xf32> to vector<32x8xbf16>
    %254 = vector.extract_strided_slice %2 {offsets = [8, 0], sizes = [8, 32], strides = [1, 1]} : vector<32x32xbf16> to vector<8x32xbf16>
    %cst_78 = arith.constant dense<0.000000e+00> : vector<32x32xf32>
    %255 = tpu.matmul %253, %254, %cst_78 {dimension_numbers = #tpu.dot_dimension_numbers<[1], [0], [0], [1], [0, 0, 1, 1], [], []>} : vector<32x8xbf16>, vector<8x32xbf16>, vector<32x32xf32> -> vector<32x32xf32>
    %256 = arith.addf %230, %255 : vector<32x32xf32>
    %257 = vector.extract_strided_slice %201 {offsets = [0, 0, 16], sizes = [4, 8, 8], strides = [1, 1, 1]} : vector<4x8x32xf32> to vector<4x8x8xf32>
    %258 = arith.truncf %257 : vector<4x8x8xf32> to vector<4x8x8xbf16>
    %259 = vector.extract_strided_slice %203 {offsets = [0, 0, 16], sizes = [4, 8, 8], strides = [1, 1, 1]} : vector<4x8x32xf32> to vector<4x8x8xf32>
    %260 = arith.truncf %259 : vector<4x8x8xf32> to vector<4x8x8xbf16>
    %261 = vector.extract_strided_slice %205 {offsets = [0, 0, 16], sizes = [4, 8, 8], strides = [1, 1, 1]} : vector<4x8x32xf32> to vector<4x8x8xf32>
    %262 = arith.truncf %261 : vector<4x8x8xf32> to vector<4x8x8xbf16>
    "tpu.trace_start"() <{level = 10 : i32, message = "bid,bjd->bij"}> : () -> ()
    %cst_79 = arith.constant dense<0.000000e+00> : vector<4x8x8xf32>
    %263 = tpu.matmul %258, %260, %cst_79 {dimension_numbers = #tpu.dot_dimension_numbers<[2], [2], [1], [1], [0, 0, 0, 1, 1, 1], [0], [0]>} : vector<4x8x8xbf16>, vector<4x8x8xbf16>, vector<4x8x8xf32> -> vector<4x8x8xf32>
    "tpu.trace_stop"() : () -> ()
    %cst_80 = arith.constant 0.353553385 : f32
    %264 = vector.broadcast %cst_80 : f32 to vector<4x8x8xf32>
    %265 = arith.mulf %263, %264 : vector<4x8x8xf32>
    %cst_81 = arith.constant dense<0xFF800000> : vector<4x8xf32>
    %266 = vector.multi_reduction <maximumf>, %265, %cst_81 [2] : vector<4x8x8xf32> to vector<4x8xf32>
    %267 = vector.shape_cast %266 : vector<4x8xf32> to vector<4x8x1xf32>
    %268 = vector.broadcast %267 : vector<4x8x1xf32> to vector<4x8x8xf32>
    %269 = arith.subf %265, %268 : vector<4x8x8xf32>
    %270 = math.exp %269 : vector<4x8x8xf32>
    %cst_82 = arith.constant dense<0.000000e+00> : vector<4x8xf32>
    %271 = vector.multi_reduction <add>, %270, %cst_82 [2] : vector<4x8x8xf32> to vector<4x8xf32>
    %272 = vector.shape_cast %271 : vector<4x8xf32> to vector<4x8x1xf32>
    %273 = tpu.reciprocal %272 {approx = true} : vector<4x8x1xf32> -> vector<4x8x1xf32>
    %274 = vector.broadcast %273 : vector<4x8x1xf32> to vector<4x8x8xf32>
    %275 = arith.mulf %270, %274 : vector<4x8x8xf32>
    %276 = arith.truncf %275 : vector<4x8x8xf32> to vector<4x8x8xbf16>
    "tpu.trace_start"() <{level = 10 : i32, message = "bij,bjd->bid"}> : () -> ()
    %cst_83 = arith.constant dense<0.000000e+00> : vector<4x8x8xf32>
    %277 = tpu.matmul %276, %262, %cst_83 {dimension_numbers = #tpu.dot_dimension_numbers<[2], [1], [1], [2], [0, 0, 0, 1, 1, 2], [0], [0]>} : vector<4x8x8xbf16>, vector<4x8x8xbf16>, vector<4x8x8xf32> -> vector<4x8x8xf32>
    "tpu.trace_stop"() : () -> ()
    %278 = vector.shape_cast %277 : vector<4x8x8xf32> to vector<32x8xf32>
    %279 = arith.truncf %278 : vector<32x8xf32> to vector<32x8xbf16>
    %280 = vector.extract_strided_slice %2 {offsets = [16, 0], sizes = [8, 32], strides = [1, 1]} : vector<32x32xbf16> to vector<8x32xbf16>
    %cst_84 = arith.constant dense<0.000000e+00> : vector<32x32xf32>
    %281 = tpu.matmul %279, %280, %cst_84 {dimension_numbers = #tpu.dot_dimension_numbers<[1], [0], [0], [1], [0, 0, 1, 1], [], []>} : vector<32x8xbf16>, vector<8x32xbf16>, vector<32x32xf32> -> vector<32x32xf32>
    %282 = arith.addf %256, %281 : vector<32x32xf32>
    %283 = vector.extract_strided_slice %201 {offsets = [0, 0, 24], sizes = [4, 8, 8], strides = [1, 1, 1]} : vector<4x8x32xf32> to vector<4x8x8xf32>
    %284 = arith.truncf %283 : vector<4x8x8xf32> to vector<4x8x8xbf16>
    %285 = vector.extract_strided_slice %203 {offsets = [0, 0, 24], sizes = [4, 8, 8], strides = [1, 1, 1]} : vector<4x8x32xf32> to vector<4x8x8xf32>
    %286 = arith.truncf %285 : vector<4x8x8xf32> to vector<4x8x8xbf16>
    %287 = vector.extract_strided_slice %205 {offsets = [0, 0, 24], sizes = [4, 8, 8], strides = [1, 1, 1]} : vector<4x8x32xf32> to vector<4x8x8xf32>
    %288 = arith.truncf %287 : vector<4x8x8xf32> to vector<4x8x8xbf16>
    "tpu.trace_start"() <{level = 10 : i32, message = "bid,bjd->bij"}> : () -> ()
    %cst_85 = arith.constant dense<0.000000e+00> : vector<4x8x8xf32>
    %289 = tpu.matmul %284, %286, %cst_85 {dimension_numbers = #tpu.dot_dimension_numbers<[2], [2], [1], [1], [0, 0, 0, 1, 1, 1], [0], [0]>} : vector<4x8x8xbf16>, vector<4x8x8xbf16>, vector<4x8x8xf32> -> vector<4x8x8xf32>
    "tpu.trace_stop"() : () -> ()
    %cst_86 = arith.constant 0.353553385 : f32
    %290 = vector.broadcast %cst_86 : f32 to vector<4x8x8xf32>
    %291 = arith.mulf %289, %290 : vector<4x8x8xf32>
    %cst_87 = arith.constant dense<0xFF800000> : vector<4x8xf32>
    %292 = vector.multi_reduction <maximumf>, %291, %cst_87 [2] : vector<4x8x8xf32> to vector<4x8xf32>
    %293 = vector.shape_cast %292 : vector<4x8xf32> to vector<4x8x1xf32>
    %294 = vector.broadcast %293 : vector<4x8x1xf32> to vector<4x8x8xf32>
    %295 = arith.subf %291, %294 : vector<4x8x8xf32>
    %296 = math.exp %295 : vector<4x8x8xf32>
    %cst_88 = arith.constant dense<0.000000e+00> : vector<4x8xf32>
    %297 = vector.multi_reduction <add>, %296, %cst_88 [2] : vector<4x8x8xf32> to vector<4x8xf32>
    %298 = vector.shape_cast %297 : vector<4x8xf32> to vector<4x8x1xf32>
    %299 = tpu.reciprocal %298 {approx = true} : vector<4x8x1xf32> -> vector<4x8x1xf32>
    %300 = vector.broadcast %299 : vector<4x8x1xf32> to vector<4x8x8xf32>
    %301 = arith.mulf %296, %300 : vector<4x8x8xf32>
    %302 = arith.truncf %301 : vector<4x8x8xf32> to vector<4x8x8xbf16>
    "tpu.trace_start"() <{level = 10 : i32, message = "bij,bjd->bid"}> : () -> ()
    %cst_89 = arith.constant dense<0.000000e+00> : vector<4x8x8xf32>
    %303 = tpu.matmul %302, %288, %cst_89 {dimension_numbers = #tpu.dot_dimension_numbers<[2], [1], [1], [2], [0, 0, 0, 1, 1, 2], [0], [0]>} : vector<4x8x8xbf16>, vector<4x8x8xbf16>, vector<4x8x8xf32> -> vector<4x8x8xf32>
    "tpu.trace_stop"() : () -> ()
    %304 = vector.shape_cast %303 : vector<4x8x8xf32> to vector<32x8xf32>
    %305 = arith.truncf %304 : vector<32x8xf32> to vector<32x8xbf16>
    %306 = vector.extract_strided_slice %2 {offsets = [24, 0], sizes = [8, 32], strides = [1, 1]} : vector<32x32xbf16> to vector<8x32xbf16>
    %cst_90 = arith.constant dense<0.000000e+00> : vector<32x32xf32>
    %307 = tpu.matmul %305, %306, %cst_90 {dimension_numbers = #tpu.dot_dimension_numbers<[1], [0], [0], [1], [0, 0, 1, 1], [], []>} : vector<32x8xbf16>, vector<8x32xbf16>, vector<32x32xf32> -> vector<32x32xf32>
    %308 = arith.addf %282, %307 : vector<32x32xf32>
    %309 = vector.broadcast %3 : vector<1x32xf32> to vector<32x32xf32>
    %310 = arith.addf %308, %309 : vector<32x32xf32>
    %311 = arith.addf %195, %310 : vector<32x32xf32>
    %cst_91 = arith.constant dense<0.000000e+00> : vector<32xf32>
    %312 = vector.multi_reduction <add>, %311, %cst_91 [1] : vector<32x32xf32> to vector<32xf32>
    %313 = vector.shape_cast %312 : vector<32xf32> to vector<32x1xf32>
    %cst_92 = arith.constant 3.200000e+01 : f32
    %314 = vector.broadcast %cst_92 : f32 to vector<32x1xf32>
    %315 = arith.divf %313, %314 : vector<32x1xf32>
    %316 = vector.broadcast %315 : vector<32x1xf32> to vector<32x32xf32>
    %317 = arith.subf %311, %316 : vector<32x32xf32>
    %318 = arith.mulf %317, %317 : vector<32x32xf32>
    %cst_93 = arith.constant dense<0.000000e+00> : vector<32xf32>
    %319 = vector.multi_reduction <add>, %318, %cst_93 [1] : vector<32x32xf32> to vector<32xf32>
    %320 = vector.shape_cast %319 : vector<32xf32> to vector<32x1xf32>
    %cst_94 = arith.constant 3.200000e+01 : f32
    %321 = vector.broadcast %cst_94 : f32 to vector<32x1xf32>
    %322 = arith.divf %320, %321 : vector<32x1xf32>
    %323 = vector.broadcast %315 : vector<32x1xf32> to vector<32x32xf32>
    %324 = arith.subf %311, %323 : vector<32x32xf32>
    %cst_95 = arith.constant 9.99999974E-6 : f32
    %325 = vector.broadcast %cst_95 : f32 to vector<32x1xf32>
    %326 = arith.addf %322, %325 : vector<32x1xf32>
    %327 = math.rsqrt %326 : vector<32x1xf32>
    %328 = vector.broadcast %327 : vector<32x1xf32> to vector<32x32xf32>
    %329 = arith.mulf %324, %328 : vector<32x32xf32>
    %330 = vector.broadcast %4 : vector<1x32xf32> to vector<32x32xf32>
    %331 = arith.mulf %329, %330 : vector<32x32xf32>
    %332 = vector.broadcast %5 : vector<1x32xf32> to vector<32x32xf32>
    %333 = arith.addf %331, %332 : vector<32x32xf32>
    %334 = arith.truncf %333 : vector<32x32xf32> to vector<32x32xbf16>
    %cst_96 = arith.constant dense<0.000000e+00> : vector<32x128xf32>
    %335 = tpu.matmul %334, %6, %cst_96 {dimension_numbers = #tpu.dot_dimension_numbers<[1], [0], [0], [1], [0, 0, 1, 1], [], []>} : vector<32x32xbf16>, vector<32x128xbf16>, vector<32x128xf32> -> vector<32x128xf32>
    %336 = vector.broadcast %7 : vector<1x128xf32> to vector<32x128xf32>
    %337 = arith.addf %335, %336 : vector<32x128xf32>
    %cst_97 = arith.constant 5.000000e-01 : f32
    %338 = vector.broadcast %cst_97 : f32 to vector<32x128xf32>
    %339 = arith.mulf %338, %337 : vector<32x128xf32>
    %340 = arith.mulf %337, %337 : vector<32x128xf32>
    %341 = arith.mulf %340, %337 : vector<32x128xf32>
    %cst_98 = arith.constant 4.471500e-02 : f32
    %342 = vector.broadcast %cst_98 : f32 to vector<32x128xf32>
    %343 = arith.mulf %342, %341 : vector<32x128xf32>
    %344 = arith.addf %337, %343 : vector<32x128xf32>
    %cst_99 = arith.constant 0.797884583 : f32
    %345 = vector.broadcast %cst_99 : f32 to vector<32x128xf32>
    %346 = arith.mulf %345, %344 : vector<32x128xf32>
    %347 = math.tanh %346 : vector<32x128xf32>
    %cst_100 = arith.constant 1.000000e+00 : f32
    %348 = vector.broadcast %cst_100 : f32 to vector<32x128xf32>
    %349 = arith.addf %348, %347 : vector<32x128xf32>
    %350 = arith.mulf %339, %349 : vector<32x128xf32>
    %351 = arith.truncf %350 : vector<32x128xf32> to vector<32x128xbf16>
    %cst_101 = arith.constant dense<0.000000e+00> : vector<32x32xf32>
    %352 = tpu.matmul %351, %8, %cst_101 {dimension_numbers = #tpu.dot_dimension_numbers<[1], [0], [0], [1], [0, 0, 1, 1], [], []>} : vector<32x128xbf16>, vector<128x32xbf16>, vector<32x32xf32> -> vector<32x32xf32>
    %353 = vector.broadcast %9 : vector<1x32xf32> to vector<32x32xf32>
    %354 = arith.addf %352, %353 : vector<32x32xf32>
    %355 = arith.addf %333, %354 : vector<32x32xf32>
    %cst_102 = arith.constant dense<0.000000e+00> : vector<32xf32>
    %356 = vector.multi_reduction <add>, %355, %cst_102 [1] : vector<32x32xf32> to vector<32xf32>
    %357 = vector.shape_cast %356 : vector<32xf32> to vector<32x1xf32>
    %cst_103 = arith.constant 3.200000e+01 : f32
    %358 = vector.broadcast %cst_103 : f32 to vector<32x1xf32>
    %359 = arith.divf %357, %358 : vector<32x1xf32>
    %360 = vector.broadcast %359 : vector<32x1xf32> to vector<32x32xf32>
    %361 = arith.subf %355, %360 : vector<32x32xf32>
    %362 = arith.mulf %361, %361 : vector<32x32xf32>
    %cst_104 = arith.constant dense<0.000000e+00> : vector<32xf32>
    %363 = vector.multi_reduction <add>, %362, %cst_104 [1] : vector<32x32xf32> to vector<32xf32>
    %364 = vector.shape_cast %363 : vector<32xf32> to vector<32x1xf32>
    %cst_105 = arith.constant 3.200000e+01 : f32
    %365 = vector.broadcast %cst_105 : f32 to vector<32x1xf32>
    %366 = arith.divf %364, %365 : vector<32x1xf32>
    %367 = vector.broadcast %359 : vector<32x1xf32> to vector<32x32xf32>
    %368 = arith.subf %355, %367 : vector<32x32xf32>
    %cst_106 = arith.constant 9.99999974E-6 : f32
    %369 = vector.broadcast %cst_106 : f32 to vector<32x1xf32>
    %370 = arith.addf %366, %369 : vector<32x1xf32>
    %371 = math.rsqrt %370 : vector<32x1xf32>
    %372 = vector.broadcast %371 : vector<32x1xf32> to vector<32x32xf32>
    %373 = arith.mulf %368, %372 : vector<32x32xf32>
    %374 = vector.broadcast %10 : vector<1x32xf32> to vector<32x32xf32>
    %375 = arith.mulf %373, %374 : vector<32x32xf32>
    %376 = vector.broadcast %11 : vector<1x32xf32> to vector<32x32xf32>
    %377 = arith.addf %375, %376 : vector<32x32xf32>
    %378 = vector.shape_cast %377 : vector<32x32xf32> to vector<4x8x32xf32>
    %c0_107 = arith.constant 0 : index
    %c0_108 = arith.constant 0 : index
    %c0_109 = arith.constant 0 : index
    %379 = vector.load %arg14[%c0_107, %c0_108, %c0_109] : memref<4x8x32xf32, #tpu.memory_space<vmem>>, vector<4x8x32xf32>
    tpu.vector_store %arg14[%c0_107, %c0_108, %c0_109], %378 {strides = array<i32>} : memref<4x8x32xf32, #tpu.memory_space<vmem>>, vector<4x8x32xf32>,
    return
  }
  func.func @transform_0(%arg0: i32) -> (i32, i32, i32) {
    %c0_i32 = arith.constant 0 : i32
    %c0_i32_0 = arith.constant 0 : i32
    %c0_i32_1 = arith.constant 0 : i32
    return %arg0, %c0_i32, %c0_i32_0 : i32, i32, i32
  }
  func.func @transform_1(%arg0: i32) -> (i32, i32) {
    %c0_i32 = arith.constant 0 : i32
    %c0_i32_0 = arith.constant 0 : i32
    %c0_i32_1 = arith.constant 0 : i32
    return %c0_i32, %c0_i32_0 : i32, i32
  }
  func.func @transform_2(%arg0: i32) -> (i32, i32) {
    %c0_i32 = arith.constant 0 : i32
    %c0_i32_0 = arith.constant 0 : i32
    %c0_i32_1 = arith.constant 0 : i32
    return %c0_i32, %c0_i32_0 : i32, i32
  }
  func.func @transform_3(%arg0: i32) -> (i32, i32) {
    %c0_i32 = arith.constant 0 : i32
    %c0_i32_0 = arith.constant 0 : i32
    %c0_i32_1 = arith.constant 0 : i32
    return %c0_i32, %c0_i32_0 : i32, i32
  }
  func.func @transform_4(%arg0: i32) -> (i32, i32) {
    %c0_i32 = arith.constant 0 : i32
    %c0_i32_0 = arith.constant 0 : i32
    %c0_i32_1 = arith.constant 0 : i32
    return %c0_i32, %c0_i32_0 : i32, i32
  }
  func.func @transform_5(%arg0: i32) -> (i32, i32) {
    %c0_i32 = arith.constant 0 : i32
    %c0_i32_0 = arith.constant 0 : i32
    %c0_i32_1 = arith.constant 0 : i32
    return %c0_i32, %c0_i32_0 : i32, i32
  }
  func.func @transform_6(%arg0: i32) -> (i32, i32) {
    %c0_i32 = arith.constant 0 : i32
    %c0_i32_0 = arith.constant 0 : i32
    %c0_i32_1 = arith.constant 0 : i32
    return %c0_i32, %c0_i32_0 : i32, i32
  }
  func.func @transform_7(%arg0: i32) -> (i32, i32) {
    %c0_i32 = arith.constant 0 : i32
    %c0_i32_0 = arith.constant 0 : i32
    %c0_i32_1 = arith.constant 0 : i32
    return %c0_i32, %c0_i32_0 : i32, i32
  }
  func.func @transform_8(%arg0: i32) -> (i32, i32) {
    %c0_i32 = arith.constant 0 : i32
    %c0_i32_0 = arith.constant 0 : i32
    %c0_i32_1 = arith.constant 0 : i32
    return %c0_i32, %c0_i32_0 : i32, i32
  }
  func.func @transform_9(%arg0: i32) -> (i32, i32) {
    %c0_i32 = arith.constant 0 : i32
    %c0_i32_0 = arith.constant 0 : i32
    %c0_i32_1 = arith.constant 0 : i32
    return %c0_i32, %c0_i32_0 : i32, i32
  }
  func.func @transform_10(%arg0: i32) -> (i32, i32) {
    %c0_i32 = arith.constant 0 : i32
    %c0_i32_0 = arith.constant 0 : i32
    %c0_i32_1 = arith.constant 0 : i32
    return %c0_i32, %c0_i32_0 : i32, i32
  }
  func.func @transform_11(%arg0: i32) -> (i32, i32) {
    %c0_i32 = arith.constant 0 : i32
    %c0_i32_0 = arith.constant 0 : i32
    %c0_i32_1 = arith.constant 0 : i32
    return %c0_i32, %c0_i32_0 : i32, i32
  }
  func.func @transform_12(%arg0: i32) -> (i32, i32) {
    %c0_i32 = arith.constant 0 : i32
    %c0_i32_0 = arith.constant 0 : i32
    %c0_i32_1 = arith.constant 0 : i32
    return %c0_i32, %c0_i32_0 : i32, i32
  }
  func.func @transform_13(%arg0: i32) -> (i32, i32, i32) {
    %c0_i32 = arith.constant 0 : i32
    %c0_i32_0 = arith.constant 0 : i32
    %c0_i32_1 = arith.constant 0 : i32
    return %arg0, %c0_i32, %c0_i32_0 : i32, i32, i32
  }
}

module attributes {stable_mosaic.version = 11 : i64} {
  func.func @sent_head_kernel(%arg0: memref<2x4x32xf32, #tpu.memory_space<vmem>>, %arg1: memref<2x4x16xf32, #tpu.memory_space<vmem>>, %arg2: memref<32x96xbf16, #tpu.memory_space<vmem>>, %arg3: memref<1x96xf32, #tpu.memory_space<vmem>>, %arg4: memref<32x32xbf16, #tpu.memory_space<vmem>>, %arg5: memref<1x32xf32, #tpu.memory_space<vmem>>, %arg6: memref<1x32xf32, #tpu.memory_space<vmem>>, %arg7: memref<1x32xf32, #tpu.memory_space<vmem>>, %arg8: memref<32x128xbf16, #tpu.memory_space<vmem>>, %arg9: memref<1x128xf32, #tpu.memory_space<vmem>>, %arg10: memref<128x32xbf16, #tpu.memory_space<vmem>>, %arg11: memref<1x32xf32, #tpu.memory_space<vmem>>, %arg12: memref<1x32xf32, #tpu.memory_space<vmem>>, %arg13: memref<1x32xf32, #tpu.memory_space<vmem>>, %arg14: memref<16x32xbf16, #tpu.memory_space<vmem>>, %arg15: memref<1x32xf32, #tpu.memory_space<vmem>>, %arg16: memref<1x32xf32, #tpu.memory_space<vmem>>, %arg17: memref<1x32xf32, #tpu.memory_space<vmem>>, %arg18: memref<32x2xbf16, #tpu.memory_space<vmem>>, %arg19: memref<1x2xf32, #tpu.memory_space<vmem>>, %arg20: memref<2x4x32xf32, #tpu.memory_space<vmem>>, %arg21: memref<2x4x2xf32, #tpu.memory_space<vmem>>) attributes {dimension_semantics = [], scalar_prefetch = 0 : i64, scratch_operands = 0 : i64, tpu.core_type = #tpu.core_type<tc>} {
    %c0 = arith.constant 0 : index
    %c0_0 = arith.constant 0 : index
    %c0_1 = arith.constant 0 : index
    %0 = vector.load %arg0[%c0, %c0_0, %c0_1] : memref<2x4x32xf32, #tpu.memory_space<vmem>>, vector<2x4x32xf32>
    %1 = vector.shape_cast %0 : vector<2x4x32xf32> to vector<8x32xf32>
    %c0_2 = arith.constant 0 : index
    %c0_3 = arith.constant 0 : index
    %2 = vector.load %arg2[%c0_2, %c0_3] : memref<32x96xbf16, #tpu.memory_space<vmem>>, vector<32x96xbf16>
    %c0_4 = arith.constant 0 : index
    %c0_5 = arith.constant 0 : index
    %3 = vector.load %arg3[%c0_4, %c0_5] : memref<1x96xf32, #tpu.memory_space<vmem>>, vector<1x96xf32>
    %c0_6 = arith.constant 0 : index
    %c0_7 = arith.constant 0 : index
    %4 = vector.load %arg4[%c0_6, %c0_7] : memref<32x32xbf16, #tpu.memory_space<vmem>>, vector<32x32xbf16>
    %c0_8 = arith.constant 0 : index
    %c0_9 = arith.constant 0 : index
    %5 = vector.load %arg5[%c0_8, %c0_9] : memref<1x32xf32, #tpu.memory_space<vmem>>, vector<1x32xf32>
    %c0_10 = arith.constant 0 : index
    %c0_11 = arith.constant 0 : index
    %6 = vector.load %arg6[%c0_10, %c0_11] : memref<1x32xf32, #tpu.memory_space<vmem>>, vector<1x32xf32>
    %c0_12 = arith.constant 0 : index
    %c0_13 = arith.constant 0 : index
    %7 = vector.load %arg7[%c0_12, %c0_13] : memref<1x32xf32, #tpu.memory_space<vmem>>, vector<1x32xf32>
    %c0_14 = arith.constant 0 : index
    %c0_15 = arith.constant 0 : index
    %8 = vector.load %arg8[%c0_14, %c0_15] : memref<32x128xbf16, #tpu.memory_space<vmem>>, vector<32x128xbf16>
    %c0_16 = arith.constant 0 : index
    %c0_17 = arith.constant 0 : index
    %9 = vector.load %arg9[%c0_16, %c0_17] : memref<1x128xf32, #tpu.memory_space<vmem>>, vector<1x128xf32>
    %c0_18 = arith.constant 0 : index
    %c0_19 = arith.constant 0 : index
    %10 = vector.load %arg10[%c0_18, %c0_19] : memref<128x32xbf16, #tpu.memory_space<vmem>>, vector<128x32xbf16>
    %c0_20 = arith.constant 0 : index
    %c0_21 = arith.constant 0 : index
    %11 = vector.load %arg11[%c0_20, %c0_21] : memref<1x32xf32, #tpu.memory_space<vmem>>, vector<1x32xf32>
    %c0_22 = arith.constant 0 : index
    %c0_23 = arith.constant 0 : index
    %12 = vector.load %arg12[%c0_22, %c0_23] : memref<1x32xf32, #tpu.memory_space<vmem>>, vector<1x32xf32>
    %c0_24 = arith.constant 0 : index
    %c0_25 = arith.constant 0 : index
    %13 = vector.load %arg13[%c0_24, %c0_25] : memref<1x32xf32, #tpu.memory_space<vmem>>, vector<1x32xf32>
    %14 = arith.truncf %1 : vector<8x32xf32> to vector<8x32xbf16>
    %cst = arith.constant dense<0.000000e+00> : vector<8x96xf32>
    %15 = tpu.matmul %14, %2, %cst {dimension_numbers = #tpu.dot_dimension_numbers<[1], [0], [0], [1], [0, 0, 1, 1], [], []>} : vector<8x32xbf16>, vector<32x96xbf16>, vector<8x96xf32> -> vector<8x96xf32>
    %16 = vector.broadcast %3 : vector<1x96xf32> to vector<8x96xf32>
    %17 = arith.addf %15, %16 : vector<8x96xf32>
    %18 = vector.extract_strided_slice %17 {offsets = [0, 0], sizes = [8, 32], strides = [1, 1]} : vector<8x96xf32> to vector<8x32xf32>
    %19 = vector.shape_cast %18 : vector<8x32xf32> to vector<2x4x32xf32>
    %20 = vector.extract_strided_slice %17 {offsets = [0, 32], sizes = [8, 32], strides = [1, 1]} : vector<8x96xf32> to vector<8x32xf32>
    %21 = vector.shape_cast %20 : vector<8x32xf32> to vector<2x4x32xf32>
    %22 = vector.extract_strided_slice %17 {offsets = [0, 64], sizes = [8, 32], strides = [1, 1]} : vector<8x96xf32> to vector<8x32xf32>
    %23 = vector.shape_cast %22 : vector<8x32xf32> to vector<2x4x32xf32>
    %24 = vector.extract_strided_slice %19 {offsets = [0, 0, 0], sizes = [2, 4, 8], strides = [1, 1, 1]} : vector<2x4x32xf32> to vector<2x4x8xf32>
    %25 = arith.truncf %24 : vector<2x4x8xf32> to vector<2x4x8xbf16>
    %26 = vector.extract_strided_slice %21 {offsets = [0, 0, 0], sizes = [2, 4, 8], strides = [1, 1, 1]} : vector<2x4x32xf32> to vector<2x4x8xf32>
    %27 = arith.truncf %26 : vector<2x4x8xf32> to vector<2x4x8xbf16>
    %28 = vector.extract_strided_slice %23 {offsets = [0, 0, 0], sizes = [2, 4, 8], strides = [1, 1, 1]} : vector<2x4x32xf32> to vector<2x4x8xf32>
    %29 = arith.truncf %28 : vector<2x4x8xf32> to vector<2x4x8xbf16>
    "tpu.trace_start"() <{level = 10 : i32, message = "bid,bjd->bij"}> : () -> ()
    %cst_26 = arith.constant dense<0.000000e+00> : vector<2x4x4xf32>
    %30 = tpu.matmul %25, %27, %cst_26 {dimension_numbers = #tpu.dot_dimension_numbers<[2], [2], [1], [1], [0, 0, 0, 1, 1, 1], [0], [0]>} : vector<2x4x8xbf16>, vector<2x4x8xbf16>, vector<2x4x4xf32> -> vector<2x4x4xf32>
    "tpu.trace_stop"() : () -> ()
    %cst_27 = arith.constant 0.353553385 : f32
    %31 = vector.broadcast %cst_27 : f32 to vector<2x4x4xf32>
    %32 = arith.mulf %30, %31 : vector<2x4x4xf32>
    %cst_28 = arith.constant dense<0xFF800000> : vector<2x4xf32>
    %33 = vector.multi_reduction <maximumf>, %32, %cst_28 [2] : vector<2x4x4xf32> to vector<2x4xf32>
    %34 = vector.shape_cast %33 : vector<2x4xf32> to vector<2x4x1xf32>
    %35 = vector.broadcast %34 : vector<2x4x1xf32> to vector<2x4x4xf32>
    %36 = arith.subf %32, %35 : vector<2x4x4xf32>
    %37 = math.exp %36 : vector<2x4x4xf32>
    %cst_29 = arith.constant dense<0.000000e+00> : vector<2x4xf32>
    %38 = vector.multi_reduction <add>, %37, %cst_29 [2] : vector<2x4x4xf32> to vector<2x4xf32>
    %39 = vector.shape_cast %38 : vector<2x4xf32> to vector<2x4x1xf32>
    %40 = tpu.reciprocal %39 {approx = true} : vector<2x4x1xf32> -> vector<2x4x1xf32>
    %41 = vector.broadcast %40 : vector<2x4x1xf32> to vector<2x4x4xf32>
    %42 = arith.mulf %37, %41 : vector<2x4x4xf32>
    %43 = arith.truncf %42 : vector<2x4x4xf32> to vector<2x4x4xbf16>
    "tpu.trace_start"() <{level = 10 : i32, message = "bij,bjd->bid"}> : () -> ()
    %cst_30 = arith.constant dense<0.000000e+00> : vector<2x4x8xf32>
    %44 = tpu.matmul %43, %29, %cst_30 {dimension_numbers = #tpu.dot_dimension_numbers<[2], [1], [1], [2], [0, 0, 0, 1, 1, 2], [0], [0]>} : vector<2x4x4xbf16>, vector<2x4x8xbf16>, vector<2x4x8xf32> -> vector<2x4x8xf32>
    "tpu.trace_stop"() : () -> ()
    %45 = vector.shape_cast %44 : vector<2x4x8xf32> to vector<8x8xf32>
    %46 = arith.truncf %45 : vector<8x8xf32> to vector<8x8xbf16>
    %47 = vector.extract_strided_slice %4 {offsets = [0, 0], sizes = [8, 32], strides = [1, 1]} : vector<32x32xbf16> to vector<8x32xbf16>
    %cst_31 = arith.constant dense<0.000000e+00> : vector<8x32xf32>
    %48 = tpu.matmul %46, %47, %cst_31 {dimension_numbers = #tpu.dot_dimension_numbers<[1], [0], [0], [1], [0, 0, 1, 1], [], []>} : vector<8x8xbf16>, vector<8x32xbf16>, vector<8x32xf32> -> vector<8x32xf32>
    %49 = vector.extract_strided_slice %19 {offsets = [0, 0, 8], sizes = [2, 4, 8], strides = [1, 1, 1]} : vector<2x4x32xf32> to vector<2x4x8xf32>
    %50 = arith.truncf %49 : vector<2x4x8xf32> to vector<2x4x8xbf16>
    %51 = vector.extract_strided_slice %21 {offsets = [0, 0, 8], sizes = [2, 4, 8], strides = [1, 1, 1]} : vector<2x4x32xf32> to vector<2x4x8xf32>
    %52 = arith.truncf %51 : vector<2x4x8xf32> to vector<2x4x8xbf16>
    %53 = vector.extract_strided_slice %23 {offsets = [0, 0, 8], sizes = [2, 4, 8], strides = [1, 1, 1]} : vector<2x4x32xf32> to vector<2x4x8xf32>
    %54 = arith.truncf %53 : vector<2x4x8xf32> to vector<2x4x8xbf16>
    "tpu.trace_start"() <{level = 10 : i32, message = "bid,bjd->bij"}> : () -> ()
    %cst_32 = arith.constant dense<0.000000e+00> : vector<2x4x4xf32>
    %55 = tpu.matmul %50, %52, %cst_32 {dimension_numbers = #tpu.dot_dimension_numbers<[2], [2], [1], [1], [0, 0, 0, 1, 1, 1], [0], [0]>} : vector<2x4x8xbf16>, vector<2x4x8xbf16>, vector<2x4x4xf32> -> vector<2x4x4xf32>
    "tpu.trace_stop"() : () -> ()
    %cst_33 = arith.constant 0.353553385 : f32
    %56 = vector.broadcast %cst_33 : f32 to vector<2x4x4xf32>
    %57 = arith.mulf %55, %56 : vector<2x4x4xf32>
    %cst_34 = arith.constant dense<0xFF800000> : vector<2x4xf32>
    %58 = vector.multi_reduction <maximumf>, %57, %cst_34 [2] : vector<2x4x4xf32> to vector<2x4xf32>
    %59 = vector.shape_cast %58 : vector<2x4xf32> to vector<2x4x1xf32>
    %60 = vector.broadcast %59 : vector<2x4x1xf32> to vector<2x4x4xf32>
    %61 = arith.subf %57, %60 : vector<2x4x4xf32>
    %62 = math.exp %61 : vector<2x4x4xf32>
    %cst_35 = arith.constant dense<0.000000e+00> : vector<2x4xf32>
    %63 = vector.multi_reduction <add>, %62, %cst_35 [2] : vector<2x4x4xf32> to vector<2x4xf32>
    %64 = vector.shape_cast %63 : vector<2x4xf32> to vector<2x4x1xf32>
    %65 = tpu.reciprocal %64 {approx = true} : vector<2x4x1xf32> -> vector<2x4x1xf32>
    %66 = vector.broadcast %65 : vector<2x4x1xf32> to vector<2x4x4xf32>
    %67 = arith.mulf %62, %66 : vector<2x4x4xf32>
    %68 = arith.truncf %67 : vector<2x4x4xf32> to vector<2x4x4xbf16>
    "tpu.trace_start"() <{level = 10 : i32, message = "bij,bjd->bid"}> : () -> ()
    %cst_36 = arith.constant dense<0.000000e+00> : vector<2x4x8xf32>
    %69 = tpu.matmul %68, %54, %cst_36 {dimension_numbers = #tpu.dot_dimension_numbers<[2], [1], [1], [2], [0, 0, 0, 1, 1, 2], [0], [0]>} : vector<2x4x4xbf16>, vector<2x4x8xbf16>, vector<2x4x8xf32> -> vector<2x4x8xf32>
    "tpu.trace_stop"() : () -> ()
    %70 = vector.shape_cast %69 : vector<2x4x8xf32> to vector<8x8xf32>
    %71 = arith.truncf %70 : vector<8x8xf32> to vector<8x8xbf16>
    %72 = vector.extract_strided_slice %4 {offsets = [8, 0], sizes = [8, 32], strides = [1, 1]} : vector<32x32xbf16> to vector<8x32xbf16>
    %cst_37 = arith.constant dense<0.000000e+00> : vector<8x32xf32>
    %73 = tpu.matmul %71, %72, %cst_37 {dimension_numbers = #tpu.dot_dimension_numbers<[1], [0], [0], [1], [0, 0, 1, 1], [], []>} : vector<8x8xbf16>, vector<8x32xbf16>, vector<8x32xf32> -> vector<8x32xf32>
    %74 = arith.addf %48, %73 : vector<8x32xf32>
    %75 = vector.extract_strided_slice %19 {offsets = [0, 0, 16], sizes = [2, 4, 8], strides = [1, 1, 1]} : vector<2x4x32xf32> to vector<2x4x8xf32>
    %76 = arith.truncf %75 : vector<2x4x8xf32> to vector<2x4x8xbf16>
    %77 = vector.extract_strided_slice %21 {offsets = [0, 0, 16], sizes = [2, 4, 8], strides = [1, 1, 1]} : vector<2x4x32xf32> to vector<2x4x8xf32>
    %78 = arith.truncf %77 : vector<2x4x8xf32> to vector<2x4x8xbf16>
    %79 = vector.extract_strided_slice %23 {offsets = [0, 0, 16], sizes = [2, 4, 8], strides = [1, 1, 1]} : vector<2x4x32xf32> to vector<2x4x8xf32>
    %80 = arith.truncf %79 : vector<2x4x8xf32> to vector<2x4x8xbf16>
    "tpu.trace_start"() <{level = 10 : i32, message = "bid,bjd->bij"}> : () -> ()
    %cst_38 = arith.constant dense<0.000000e+00> : vector<2x4x4xf32>
    %81 = tpu.matmul %76, %78, %cst_38 {dimension_numbers = #tpu.dot_dimension_numbers<[2], [2], [1], [1], [0, 0, 0, 1, 1, 1], [0], [0]>} : vector<2x4x8xbf16>, vector<2x4x8xbf16>, vector<2x4x4xf32> -> vector<2x4x4xf32>
    "tpu.trace_stop"() : () -> ()
    %cst_39 = arith.constant 0.353553385 : f32
    %82 = vector.broadcast %cst_39 : f32 to vector<2x4x4xf32>
    %83 = arith.mulf %81, %82 : vector<2x4x4xf32>
    %cst_40 = arith.constant dense<0xFF800000> : vector<2x4xf32>
    %84 = vector.multi_reduction <maximumf>, %83, %cst_40 [2] : vector<2x4x4xf32> to vector<2x4xf32>
    %85 = vector.shape_cast %84 : vector<2x4xf32> to vector<2x4x1xf32>
    %86 = vector.broadcast %85 : vector<2x4x1xf32> to vector<2x4x4xf32>
    %87 = arith.subf %83, %86 : vector<2x4x4xf32>
    %88 = math.exp %87 : vector<2x4x4xf32>
    %cst_41 = arith.constant dense<0.000000e+00> : vector<2x4xf32>
    %89 = vector.multi_reduction <add>, %88, %cst_41 [2] : vector<2x4x4xf32> to vector<2x4xf32>
    %90 = vector.shape_cast %89 : vector<2x4xf32> to vector<2x4x1xf32>
    %91 = tpu.reciprocal %90 {approx = true} : vector<2x4x1xf32> -> vector<2x4x1xf32>
    %92 = vector.broadcast %91 : vector<2x4x1xf32> to vector<2x4x4xf32>
    %93 = arith.mulf %88, %92 : vector<2x4x4xf32>
    %94 = arith.truncf %93 : vector<2x4x4xf32> to vector<2x4x4xbf16>
    "tpu.trace_start"() <{level = 10 : i32, message = "bij,bjd->bid"}> : () -> ()
    %cst_42 = arith.constant dense<0.000000e+00> : vector<2x4x8xf32>
    %95 = tpu.matmul %94, %80, %cst_42 {dimension_numbers = #tpu.dot_dimension_numbers<[2], [1], [1], [2], [0, 0, 0, 1, 1, 2], [0], [0]>} : vector<2x4x4xbf16>, vector<2x4x8xbf16>, vector<2x4x8xf32> -> vector<2x4x8xf32>
    "tpu.trace_stop"() : () -> ()
    %96 = vector.shape_cast %95 : vector<2x4x8xf32> to vector<8x8xf32>
    %97 = arith.truncf %96 : vector<8x8xf32> to vector<8x8xbf16>
    %98 = vector.extract_strided_slice %4 {offsets = [16, 0], sizes = [8, 32], strides = [1, 1]} : vector<32x32xbf16> to vector<8x32xbf16>
    %cst_43 = arith.constant dense<0.000000e+00> : vector<8x32xf32>
    %99 = tpu.matmul %97, %98, %cst_43 {dimension_numbers = #tpu.dot_dimension_numbers<[1], [0], [0], [1], [0, 0, 1, 1], [], []>} : vector<8x8xbf16>, vector<8x32xbf16>, vector<8x32xf32> -> vector<8x32xf32>
    %100 = arith.addf %74, %99 : vector<8x32xf32>
    %101 = vector.extract_strided_slice %19 {offsets = [0, 0, 24], sizes = [2, 4, 8], strides = [1, 1, 1]} : vector<2x4x32xf32> to vector<2x4x8xf32>
    %102 = arith.truncf %101 : vector<2x4x8xf32> to vector<2x4x8xbf16>
    %103 = vector.extract_strided_slice %21 {offsets = [0, 0, 24], sizes = [2, 4, 8], strides = [1, 1, 1]} : vector<2x4x32xf32> to vector<2x4x8xf32>
    %104 = arith.truncf %103 : vector<2x4x8xf32> to vector<2x4x8xbf16>
    %105 = vector.extract_strided_slice %23 {offsets = [0, 0, 24], sizes = [2, 4, 8], strides = [1, 1, 1]} : vector<2x4x32xf32> to vector<2x4x8xf32>
    %106 = arith.truncf %105 : vector<2x4x8xf32> to vector<2x4x8xbf16>
    "tpu.trace_start"() <{level = 10 : i32, message = "bid,bjd->bij"}> : () -> ()
    %cst_44 = arith.constant dense<0.000000e+00> : vector<2x4x4xf32>
    %107 = tpu.matmul %102, %104, %cst_44 {dimension_numbers = #tpu.dot_dimension_numbers<[2], [2], [1], [1], [0, 0, 0, 1, 1, 1], [0], [0]>} : vector<2x4x8xbf16>, vector<2x4x8xbf16>, vector<2x4x4xf32> -> vector<2x4x4xf32>
    "tpu.trace_stop"() : () -> ()
    %cst_45 = arith.constant 0.353553385 : f32
    %108 = vector.broadcast %cst_45 : f32 to vector<2x4x4xf32>
    %109 = arith.mulf %107, %108 : vector<2x4x4xf32>
    %cst_46 = arith.constant dense<0xFF800000> : vector<2x4xf32>
    %110 = vector.multi_reduction <maximumf>, %109, %cst_46 [2] : vector<2x4x4xf32> to vector<2x4xf32>
    %111 = vector.shape_cast %110 : vector<2x4xf32> to vector<2x4x1xf32>
    %112 = vector.broadcast %111 : vector<2x4x1xf32> to vector<2x4x4xf32>
    %113 = arith.subf %109, %112 : vector<2x4x4xf32>
    %114 = math.exp %113 : vector<2x4x4xf32>
    %cst_47 = arith.constant dense<0.000000e+00> : vector<2x4xf32>
    %115 = vector.multi_reduction <add>, %114, %cst_47 [2] : vector<2x4x4xf32> to vector<2x4xf32>
    %116 = vector.shape_cast %115 : vector<2x4xf32> to vector<2x4x1xf32>
    %117 = tpu.reciprocal %116 {approx = true} : vector<2x4x1xf32> -> vector<2x4x1xf32>
    %118 = vector.broadcast %117 : vector<2x4x1xf32> to vector<2x4x4xf32>
    %119 = arith.mulf %114, %118 : vector<2x4x4xf32>
    %120 = arith.truncf %119 : vector<2x4x4xf32> to vector<2x4x4xbf16>
    "tpu.trace_start"() <{level = 10 : i32, message = "bij,bjd->bid"}> : () -> ()
    %cst_48 = arith.constant dense<0.000000e+00> : vector<2x4x8xf32>
    %121 = tpu.matmul %120, %106, %cst_48 {dimension_numbers = #tpu.dot_dimension_numbers<[2], [1], [1], [2], [0, 0, 0, 1, 1, 2], [0], [0]>} : vector<2x4x4xbf16>, vector<2x4x8xbf16>, vector<2x4x8xf32> -> vector<2x4x8xf32>
    "tpu.trace_stop"() : () -> ()
    %122 = vector.shape_cast %121 : vector<2x4x8xf32> to vector<8x8xf32>
    %123 = arith.truncf %122 : vector<8x8xf32> to vector<8x8xbf16>
    %124 = vector.extract_strided_slice %4 {offsets = [24, 0], sizes = [8, 32], strides = [1, 1]} : vector<32x32xbf16> to vector<8x32xbf16>
    %cst_49 = arith.constant dense<0.000000e+00> : vector<8x32xf32>
    %125 = tpu.matmul %123, %124, %cst_49 {dimension_numbers = #tpu.dot_dimension_numbers<[1], [0], [0], [1], [0, 0, 1, 1], [], []>} : vector<8x8xbf16>, vector<8x32xbf16>, vector<8x32xf32> -> vector<8x32xf32>
    %126 = arith.addf %100, %125 : vector<8x32xf32>
    %127 = vector.broadcast %5 : vector<1x32xf32> to vector<8x32xf32>
    %128 = arith.addf %126, %127 : vector<8x32xf32>
    %129 = arith.addf %1, %128 : vector<8x32xf32>
    %cst_50 = arith.constant dense<0.000000e+00> : vector<8xf32>
    %130 = vector.multi_reduction <add>, %129, %cst_50 [1] : vector<8x32xf32> to vector<8xf32>
    %131 = vector.shape_cast %130 : vector<8xf32> to vector<8x1xf32>
    %cst_51 = arith.constant 3.200000e+01 : f32
    %132 = vector.broadcast %cst_51 : f32 to vector<8x1xf32>
    %133 = arith.divf %131, %132 : vector<8x1xf32>
    %134 = vector.broadcast %133 : vector<8x1xf32> to vector<8x32xf32>
    %135 = arith.subf %129, %134 : vector<8x32xf32>
    %136 = arith.mulf %135, %135 : vector<8x32xf32>
    %cst_52 = arith.constant dense<0.000000e+00> : vector<8xf32>
    %137 = vector.multi_reduction <add>, %136, %cst_52 [1] : vector<8x32xf32> to vector<8xf32>
    %138 = vector.shape_cast %137 : vector<8xf32> to vector<8x1xf32>
    %cst_53 = arith.constant 3.200000e+01 : f32
    %139 = vector.broadcast %cst_53 : f32 to vector<8x1xf32>
    %140 = arith.divf %138, %139 : vector<8x1xf32>
    %141 = vector.broadcast %133 : vector<8x1xf32> to vector<8x32xf32>
    %142 = arith.subf %129, %141 : vector<8x32xf32>
    %cst_54 = arith.constant 9.99999974E-6 : f32
    %143 = vector.broadcast %cst_54 : f32 to vector<8x1xf32>
    %144 = arith.addf %140, %143 : vector<8x1xf32>
    %145 = math.rsqrt %144 : vector<8x1xf32>
    %146 = vector.broadcast %145 : vector<8x1xf32> to vector<8x32xf32>
    %147 = arith.mulf %142, %146 : vector<8x32xf32>
    %148 = vector.broadcast %6 : vector<1x32xf32> to vector<8x32xf32>
    %149 = arith.mulf %147, %148 : vector<8x32xf32>
    %150 = vector.broadcast %7 : vector<1x32xf32> to vector<8x32xf32>
    %151 = arith.addf %149, %150 : vector<8x32xf32>
    %152 = arith.truncf %151 : vector<8x32xf32> to vector<8x32xbf16>
    %cst_55 = arith.constant dense<0.000000e+00> : vector<8x128xf32>
    %153 = tpu.matmul %152, %8, %cst_55 {dimension_numbers = #tpu.dot_dimension_numbers<[1], [0], [0], [1], [0, 0, 1, 1], [], []>} : vector<8x32xbf16>, vector<32x128xbf16>, vector<8x128xf32> -> vector<8x128xf32>
    %154 = vector.broadcast %9 : vector<1x128xf32> to vector<8x128xf32>
    %155 = arith.addf %153, %154 : vector<8x128xf32>
    %cst_56 = arith.constant 5.000000e-01 : f32
    %156 = vector.broadcast %cst_56 : f32 to vector<8x128xf32>
    %157 = arith.mulf %156, %155 : vector<8x128xf32>
    %158 = arith.mulf %155, %155 : vector<8x128xf32>
    %159 = arith.mulf %158, %155 : vector<8x128xf32>
    %cst_57 = arith.constant 4.471500e-02 : f32
    %160 = vector.broadcast %cst_57 : f32 to vector<8x128xf32>
    %161 = arith.mulf %160, %159 : vector<8x128xf32>
    %162 = arith.addf %155, %161 : vector<8x128xf32>
    %cst_58 = arith.constant 0.797884583 : f32
    %163 = vector.broadcast %cst_58 : f32 to vector<8x128xf32>
    %164 = arith.mulf %163, %162 : vector<8x128xf32>
    %165 = math.tanh %164 : vector<8x128xf32>
    %cst_59 = arith.constant 1.000000e+00 : f32
    %166 = vector.broadcast %cst_59 : f32 to vector<8x128xf32>
    %167 = arith.addf %166, %165 : vector<8x128xf32>
    %168 = arith.mulf %157, %167 : vector<8x128xf32>
    %169 = arith.truncf %168 : vector<8x128xf32> to vector<8x128xbf16>
    %cst_60 = arith.constant dense<0.000000e+00> : vector<8x32xf32>
    %170 = tpu.matmul %169, %10, %cst_60 {dimension_numbers = #tpu.dot_dimension_numbers<[1], [0], [0], [1], [0, 0, 1, 1], [], []>} : vector<8x128xbf16>, vector<128x32xbf16>, vector<8x32xf32> -> vector<8x32xf32>
    %171 = vector.broadcast %11 : vector<1x32xf32> to vector<8x32xf32>
    %172 = arith.addf %170, %171 : vector<8x32xf32>
    %173 = arith.addf %151, %172 : vector<8x32xf32>
    %cst_61 = arith.constant dense<0.000000e+00> : vector<8xf32>
    %174 = vector.multi_reduction <add>, %173, %cst_61 [1] : vector<8x32xf32> to vector<8xf32>
    %175 = vector.shape_cast %174 : vector<8xf32> to vector<8x1xf32>
    %cst_62 = arith.constant 3.200000e+01 : f32
    %176 = vector.broadcast %cst_62 : f32 to vector<8x1xf32>
    %177 = arith.divf %175, %176 : vector<8x1xf32>
    %178 = vector.broadcast %177 : vector<8x1xf32> to vector<8x32xf32>
    %179 = arith.subf %173, %178 : vector<8x32xf32>
    %180 = arith.mulf %179, %179 : vector<8x32xf32>
    %cst_63 = arith.constant dense<0.000000e+00> : vector<8xf32>
    %181 = vector.multi_reduction <add>, %180, %cst_63 [1] : vector<8x32xf32> to vector<8xf32>
    %182 = vector.shape_cast %181 : vector<8xf32> to vector<8x1xf32>
    %cst_64 = arith.constant 3.200000e+01 : f32
    %183 = vector.broadcast %cst_64 : f32 to vector<8x1xf32>
    %184 = arith.divf %182, %183 : vector<8x1xf32>
    %185 = vector.broadcast %177 : vector<8x1xf32> to vector<8x32xf32>
    %186 = arith.subf %173, %185 : vector<8x32xf32>
    %cst_65 = arith.constant 9.99999974E-6 : f32
    %187 = vector.broadcast %cst_65 : f32 to vector<8x1xf32>
    %188 = arith.addf %184, %187 : vector<8x1xf32>
    %189 = math.rsqrt %188 : vector<8x1xf32>
    %190 = vector.broadcast %189 : vector<8x1xf32> to vector<8x32xf32>
    %191 = arith.mulf %186, %190 : vector<8x32xf32>
    %192 = vector.broadcast %12 : vector<1x32xf32> to vector<8x32xf32>
    %193 = arith.mulf %191, %192 : vector<8x32xf32>
    %194 = vector.broadcast %13 : vector<1x32xf32> to vector<8x32xf32>
    %195 = arith.addf %193, %194 : vector<8x32xf32>
    %c0_66 = arith.constant 0 : index
    %c0_67 = arith.constant 0 : index
    %c0_68 = arith.constant 0 : index
    %196 = vector.load %arg1[%c0_66, %c0_67, %c0_68] : memref<2x4x16xf32, #tpu.memory_space<vmem>>, vector<2x4x16xf32>
    %197 = arith.truncf %196 : vector<2x4x16xf32> to vector<2x4x16xbf16>
    %198 = vector.shape_cast %197 : vector<2x4x16xbf16> to vector<8x16xbf16>
    %c0_69 = arith.constant 0 : index
    %c0_70 = arith.constant 0 : index
    %199 = vector.load %arg14[%c0_69, %c0_70] : memref<16x32xbf16, #tpu.memory_space<vmem>>, vector<16x32xbf16>
    %cst_71 = arith.constant dense<0.000000e+00> : vector<8x32xf32>
    %200 = tpu.matmul %198, %199, %cst_71 {dimension_numbers = #tpu.dot_dimension_numbers<[1], [0], [0], [1], [0, 0, 1, 1], [], []>} : vector<8x16xbf16>, vector<16x32xbf16>, vector<8x32xf32> -> vector<8x32xf32>
    %c0_72 = arith.constant 0 : index
    %c0_73 = arith.constant 0 : index
    %201 = vector.load %arg15[%c0_72, %c0_73] : memref<1x32xf32, #tpu.memory_space<vmem>>, vector<1x32xf32>
    %202 = vector.broadcast %201 : vector<1x32xf32> to vector<8x32xf32>
    %203 = arith.addf %200, %202 : vector<8x32xf32>
    %204 = arith.addf %195, %203 : vector<8x32xf32>
    %c0_74 = arith.constant 0 : index
    %c0_75 = arith.constant 0 : index
    %205 = vector.load %arg16[%c0_74, %c0_75] : memref<1x32xf32, #tpu.memory_space<vmem>>, vector<1x32xf32>
    %c0_76 = arith.constant 0 : index
    %c0_77 = arith.constant 0 : index
    %206 = vector.load %arg17[%c0_76, %c0_77] : memref<1x32xf32, #tpu.memory_space<vmem>>, vector<1x32xf32>
    %cst_78 = arith.constant dense<0.000000e+00> : vector<8xf32>
    %207 = vector.multi_reduction <add>, %204, %cst_78 [1] : vector<8x32xf32> to vector<8xf32>
    %208 = vector.shape_cast %207 : vector<8xf32> to vector<8x1xf32>
    %cst_79 = arith.constant 3.200000e+01 : f32
    %209 = vector.broadcast %cst_79 : f32 to vector<8x1xf32>
    %210 = arith.divf %208, %209 : vector<8x1xf32>
    %211 = vector.broadcast %210 : vector<8x1xf32> to vector<8x32xf32>
    %212 = arith.subf %204, %211 : vector<8x32xf32>
    %213 = arith.mulf %212, %212 : vector<8x32xf32>
    %cst_80 = arith.constant dense<0.000000e+00> : vector<8xf32>
    %214 = vector.multi_reduction <add>, %213, %cst_80 [1] : vector<8x32xf32> to vector<8xf32>
    %215 = vector.shape_cast %214 : vector<8xf32> to vector<8x1xf32>
    %cst_81 = arith.constant 3.200000e+01 : f32
    %216 = vector.broadcast %cst_81 : f32 to vector<8x1xf32>
    %217 = arith.divf %215, %216 : vector<8x1xf32>
    %218 = vector.broadcast %210 : vector<8x1xf32> to vector<8x32xf32>
    %219 = arith.subf %204, %218 : vector<8x32xf32>
    %cst_82 = arith.constant 9.99999974E-6 : f32
    %220 = vector.broadcast %cst_82 : f32 to vector<8x1xf32>
    %221 = arith.addf %217, %220 : vector<8x1xf32>
    %222 = math.rsqrt %221 : vector<8x1xf32>
    %223 = vector.broadcast %222 : vector<8x1xf32> to vector<8x32xf32>
    %224 = arith.mulf %219, %223 : vector<8x32xf32>
    %225 = vector.broadcast %205 : vector<1x32xf32> to vector<8x32xf32>
    %226 = arith.mulf %224, %225 : vector<8x32xf32>
    %227 = vector.broadcast %206 : vector<1x32xf32> to vector<8x32xf32>
    %228 = arith.addf %226, %227 : vector<8x32xf32>
    %229 = vector.shape_cast %228 : vector<8x32xf32> to vector<2x4x32xf32>
    %c0_83 = arith.constant 0 : index
    %c0_84 = arith.constant 0 : index
    %c0_85 = arith.constant 0 : index
    %230 = vector.load %arg20[%c0_83, %c0_84, %c0_85] : memref<2x4x32xf32, #tpu.memory_space<vmem>>, vector<2x4x32xf32>
    tpu.vector_store %arg20[%c0_83, %c0_84, %c0_85], %229 {strides = array<i32>} : memref<2x4x32xf32, #tpu.memory_space<vmem>>, vector<2x4x32xf32>,
    %231 = arith.truncf %228 : vector<8x32xf32> to vector<8x32xbf16>
    %c0_86 = arith.constant 0 : index
    %c0_87 = arith.constant 0 : index
    %232 = vector.load %arg18[%c0_86, %c0_87] : memref<32x2xbf16, #tpu.memory_space<vmem>>, vector<32x2xbf16>
    %cst_88 = arith.constant dense<0.000000e+00> : vector<8x2xf32>
    %233 = tpu.matmul %231, %232, %cst_88 {dimension_numbers = #tpu.dot_dimension_numbers<[1], [0], [0], [1], [0, 0, 1, 1], [], []>} : vector<8x32xbf16>, vector<32x2xbf16>, vector<8x2xf32> -> vector<8x2xf32>
    %c0_89 = arith.constant 0 : index
    %c0_90 = arith.constant 0 : index
    %234 = vector.load %arg19[%c0_89, %c0_90] : memref<1x2xf32, #tpu.memory_space<vmem>>, vector<1x2xf32>
    %235 = vector.broadcast %234 : vector<1x2xf32> to vector<8x2xf32>
    %236 = arith.addf %233, %235 : vector<8x2xf32>
    %237 = vector.shape_cast %236 : vector<8x2xf32> to vector<2x4x2xf32>
    %c0_91 = arith.constant 0 : index
    %c0_92 = arith.constant 0 : index
    %c0_93 = arith.constant 0 : index
    %238 = vector.load %arg21[%c0_91, %c0_92, %c0_93] : memref<2x4x2xf32, #tpu.memory_space<vmem>>, vector<2x4x2xf32>
    tpu.vector_store %arg21[%c0_91, %c0_92, %c0_93], %237 {strides = array<i32>} : memref<2x4x2xf32, #tpu.memory_space<vmem>>, vector<2x4x2xf32>,
    return
  }
}

</mosaic_0001>

<bundles_post_ra>
// kernel: encoder_forward.3
= control target key start
LH: loop header
LB: loop body
LE: loop exit
PB: predicated region body
PF: predicated region fallthrough
CT: control target
= control target key end

     0   :  { %s2731_s0 = inlined_call_operand.vmem [shape: f32[2,4,32], index: 0, kind: input, shape index: {}]   ;;  %s2732_s1 = inlined_call_operand.vmem [shape: f32[2,4,16], index: 1, kind: input, shape index: {}]   ;;  %s2733_s2 = inlined_call_operand.vmem [shape: bf16[32,96], index: 2, kind: input, shape index: {}]   ;;  %s2734_s3 = inlined_call_operand.vmem [shape: f32[1,96], index: 3, kind: input, shape index: {}]   ;;  %s2735_s4 = inlined_call_operand.vmem [shape: bf16[32,32], index: 4, kind: input, shape index: {}]   ;;  %s2736_s5 = inlined_call_operand.vmem [shape: f32[1,32], index: 5, kind: input, shape index: {}, may-alias: {5,7,11,13,15,17}]   ;;  %s2737_s6 = inlined_call_operand.vmem [shape: f32[1,32], index: 6, kind: input, shape index: {}, may-alias: {6,12,16}]   ;;  %s2738_s7 = inlined_call_operand.vmem [shape: f32[1,32], index: 7, kind: input, shape index: {}, may-alias: {5,7,11,13,15,17}]   ;;  %s2739_s8 = inlined_call_operand.vmem [shape: bf16[32,128], index: 8, kind: input, shape index: {}]   ;;  %s2740_s9 = inlined_call_operand.vmem [shape: f32[1,128], index: 9, kind: input, shape index: {}]   ;;  %s2741_s10 = inlined_call_operand.vmem [shape: bf16[128,32], index: 10, kind: input, shape index: {}]   ;;  %s2742_s11 = inlined_call_operand.vmem [shape: f32[1,32], index: 11, kind: input, shape index: {}, may-alias: {5,7,11,13,15,17}]   ;;  %s2743_s12 = inlined_call_operand.vmem [shape: f32[1,32], index: 12, kind: input, shape index: {}, may-alias: {6,12,16}]   ;;  %s2744_s13 = inlined_call_operand.vmem [shape: f32[1,32], index: 13, kind: input, shape index: {}, may-alias: {5,7,11,13,15,17}]   ;;  %s2745_s14 = inlined_call_operand.vmem [shape: bf16[16,32], index: 14, kind: input, shape index: {}]   ;;  %s2746_s15 = inlined_call_operand.vmem [shape: f32[1,32], index: 15, kind: input, shape index: {}, may-alias: {5,7,11,13,15,17}]   ;;  %s2747_s16 = inlined_call_operand.vmem [shape: f32[1,32], index: 16, kind: input, shape index: {}, may-alias: {6,12,16}]   ;;  %s2748_s17 = inlined_call_operand.vmem [shape: f32[1,32], index: 17, kind: input, shape index: {}, may-alias: {5,7,11,13,15,17}]   ;;  %s2749_s18 = inlined_call_operand.vmem [shape: bf16[32,2], index: 18, kind: input, shape index: {}]   ;;  %s2750_s19 = inlined_call_operand.vmem [shape: f32[1,2], index: 19, kind: input, shape index: {}]   ;;  %s2751_s20 = inlined_call_operand.hbm [shape: f32[2,4,32], index: 20, kind: output, shape index: {0}]   ;;  %s2752_s21 = inlined_call_operand.vmem [shape: f32[2,4,2], index: 21, kind: output, shape index: {1}]  }
   0x1   :  { %2757 = sst [smem:[#allocation5_spill]] %s2731_s0 }
   0x2   :  { %2758 = sst [smem:[#allocation6_spill]] %s2732_s1 }
   0x3   :  { %2759 = sst [smem:[#allocation7_spill]] %s2733_s2 }
   0x4   :  { %2760 = sst [smem:[#allocation8_spill]] %s2734_s3 }
   0x5   :  { %2761 = sst [smem:[#allocation9_spill]] %s2735_s4 }
   0x6   :  { %2762 = sst [smem:[#allocation10_spill]] %s2736_s5 }
   0x7   :  { %s2763_s26 = sld [smem:[#allocation7_spill]]  ;;  %v2256_v1 = vmov 0.0   ;;  %vm2257_vm0 = vmmov 0   ;;  %vm130_vm1 = vcmask 261120  }
   0x8   :  { %1990 = vmatprep.subr.bf16.mxu1 %v2256_v1  ;;  %2004 = vmatprep.subr.bf16.mxu0 %v2256_v1  ;;  %s2764_s0 = sld [smem:[#allocation5_spill]] }
   0x9   :  { %1994 = vmatprep.mubr.msk.bf16.mxu1 %vm2257_vm0, %v2256_v1  ;;  %2006 = vmatprep.mubr.msk.bf16.mxu0 %vm2257_vm0, %v2256_v1 }
   0xd   :  { %v2178_v0 = vld [vmem:[%s2763_s26 + $0x8] sm:$0xff]   ;;  %v2179_v2 = vld [vmem:[%s2763_s26] sm:$0xff]  }
   0xe   :  { %1991 = vmatpush3.bf16.msra.mxu1 %v2178_v0  ;;  %v2397_v3 = vld [vmem:[%s2764_s0] sm:$0xf]  ;;  %v2402_v4 = vld [vmem:[%s2764_s0 + $0x4] sm:$0xf] }
   0xf   :  { %1992 = vmatprep.subr.bf16.mxu1 %v2256_v1  ;;  %v109_v5 = vcombine.low %v2397_v3, %v2402_v4 }
  0x11   :  { %v111_v6 = vpack.c.bf16 %v109_v5, %v109_v5 }
  0x12   :  { %1993 = vmatpush3.bf16.msra.mxu1 %v2179_v2 }
  0x13   :  { %1998 = vmatprep.subr.bf16.mxu1 %v2256_v1 }
  0x15   :  { %1995 = vmatmul.mubr.msk.bf16.vlgmr.msra.gmra.mxu1 %vm130_vm1, %v111_v6 }
  0x16   :  { %2000 = vmatprep.mubr.msk.bf16.mxu1 %vm2257_vm0, %v2256_v1 }
  0x17   :  { %27 = vsyncpa [#allocation3], 0  ;;  %s2765_s23 = sld [smem:[#allocation8_spill]]  ;;  %s2258_s1 = smov 96   ;;  %vm182_vm2 = vcmask 64512   ;;  %vm280_vm3 = vcmask 27648  }
  0x18   :  { %s2259_s24 = smov 64   ;;  %s2260_s2 = smov 88   ;;  %vm311_vm4 = vcmask 1041408   ;;  %vm307_vm5 = vcmask 31744   ;;  %vm638_vm6 = vcmask 1043456   ;;  %vm1649_vm7 = vcmask 130048  }
  0x19   :  { %s2261_s25 = smov 120   ;;  %s2262_s26 = smov 56   ;;  %vm1778_vm8 = vcmask 257024  }
  0x1a   :  { %s2263_s27 = smov 112   ;;  %s2264_s3 = smov 80  }
  0x1b   :  { %s2766_s0 = sld [smem:[#allocation9_spill]]  ;;  %s2265_s5 = smov 48  }
  0x1c   :  { %s2266_s22 = smov 72   ;;  %s2767_s29 = sld [smem:[#allocation10_spill]] }
  0x1d   :  { %v1878_v7 = vld [vmem:[%s2765_s23] ss:$0 sm:$0xff]  ;;  %s2267_s23 = smov 104  }
  0xd5   :  { %v168_v8 = vpop.f32.mrf.mxu1 }
  0xd6   :  { %v169_v9 = vadd.f32 %v1878_v7, %v168_v8 }
  0xd7   :  { %v1996_v10 = vpop.f32.mrf.mxu1 }
  0xd8   :  { %v175_v11 = vcombine.high %v169_v9, %v169_v9  ;;  %v2416_v12 = vpack.c.bf16 %v169_v9, %v169_v9 }
  0xd9   :  { %v171_v13 = vpop.f32.mrf.mxu1 }
  0xda   :  { %180 = vrot.lane.b32.xlu0 %v2416_v12, %s2258_s1  ;;  %v2419_v15 = vpack.c.bf16 %v175_v11, %v175_v11 }
  0xdb   :  { %v1997_v14 = vpop.f32.mrf.mxu1 }
  0xde   :  { %230 = vrot.lane.b32.xlu0 %v2419_v15, %s2258_s1 }
 0x14c   :  { %v181_v16 = vpop.permute.xlu0 %180 }
 0x14d   :  { %v187_v17 = vsel %vm182_vm2, %v181_v16, 0 }
 0x14e   :  { %1999 = vmatpush3.bf16.xpose.msra.mxu1 %v187_v17 }
 0x14f   :  { %2010 = vmatprep.subr.bf16.mxu1 %v2256_v1 }
 0x150   :  { %v231_v18 = vpop.permute.xlu0 %230 }
 0x151   :  { %v236_v19 = vsel %vm182_vm2, %v231_v18, 0 }
 0x152   :  { %2005 = vmatpush3.bf16.xpose.msra.mxu0 %v236_v19 }
 0x153   :  { %2016 = vmatprep.subr.bf16.mxu0 %v2256_v1 }
 0x155   :  { %2001 = vmatmul.mubr.msk.bf16.vlgmr.msra.gmra.mxu1 %vm182_vm2, %v2416_v12 }
 0x156   :  { %2012 = vmatprep.mubr.msk.bf16.mxu1 %vm2257_vm0, %v2256_v1 }
 0x159   :  { %2007 = vmatmul.mubr.msk.bf16.vlgmr.msra.gmra.mxu0 %vm182_vm2, %v2419_v15 }
 0x15a   :  { %2018 = vmatprep.mubr.msk.bf16.mxu0 %vm2257_vm0, %v2256_v1 }
 0x215   :  { %v223_v20 = vpop.f32.mrf.mxu1 }
 0x216   :  { %v278_v21 = vmul.f32 0.35355338, %v223_v20 }
 0x217   :  { %v2002_v22 = vpop.f32.mrf.mxu1 }
 0x218   :  { %v281_v23 = vsel %vm280_vm3, %v278_v21, -inf }
 0x219   :  { %v272_v24 = vpop.f32.mrf.mxu0  ;;  %282 = vmax.xlane.f32.xlu1 %v281_v23  ;;  %v226_v25 = vpop.f32.mrf.mxu1 }
 0x21a   :  { %v279_v26 = vmul.f32 0.35355338, %v272_v24 }
 0x21b   :  { %v2003_v27 = vpop.f32.mrf.mxu1  ;;  %v2008_v28 = vpop.f32.mrf.mxu0 }
 0x21c   :  { %v284_v29 = vsel %vm280_vm3, %v279_v26, -inf }
 0x21d   :  { %v275_v30 = vpop.f32.mrf.mxu0  ;;  %285 = vmax.xlane.f32.xlu1 %v284_v29 }
 0x21f   :  { %v2009_v31 = vpop.f32.mrf.mxu0 }
 0x22e   :  { %305 = vrot.lane.b32.xlu1 %v2416_v12, %s2259_s24 }
 0x232   :  { %355 = vrot.lane.b32.xlu1 %v2419_v15, %s2259_s24 }
 0x236   :  { %410 = vrot.lane.b32.xlu1 %v2416_v12, %s2260_s2 }
 0x2a2   :  { %v283_v32 = vpop.xlane.xlu1 %282 }
 0x2a3   :  { %v287_v33 = vsub.f32 %v278_v21, %v283_v32 }
 0x2a5   :  { %v289_v34 = vmul.f32 1.442695, %v287_v33 }
 0x2a6   :  { %v286_v35 = vpop.xlane.xlu1 %285 }
 0x2a7   :  { %2194 = vpow2.f32 %v289_v34  ;;  %v288_v36 = vsub.f32 %v279_v26, %v286_v35 }
 0x2a9   :  { %v291_v37 = vmul.f32 1.442695, %v288_v36 }
 0x2aa   :  { %v306_v38 = vpop.permute.xlu1 %305 }
 0x2ab   :  { %2196 = vpow2.f32 %v291_v37  ;;  %v313_v39 = vsel %vm311_vm4, %v306_v38, 0 }
 0x2ac   :  { %2011 = vmatpush3.bf16.msra.mxu1 %v313_v39 }
 0x2ad   :  { %2022 = vmatprep.subr.bf16.mxu1 %v2256_v1 }
 0x2ae   :  { %v356_v40 = vpop.permute.xlu1 %355 }
 0x2af   :  { %v361_v41 = vsel %vm311_vm4, %v356_v40, 0 }
 0x2b0   :  { %2017 = vmatpush3.bf16.msra.mxu0 %v361_v41 }
 0x2b1   :  { %2028 = vmatprep.subr.bf16.mxu0 %v2256_v1 }
 0x2b2   :  { %v411_v46 = vpop.permute.xlu1 %410 }
 0x2b3   :  { %v416_v53 = vsel %vm182_vm2, %v411_v46, 0 }
 0x2b4   :  { %v2195_v42 = vpop.eup %2194 }
 0x2b5   :  { %v293_v43 = vsel %vm280_vm3, %v2195_v42, 0.0 }
 0x2b6   :  { %294 = vadd.xlane.f32.xlu0 %v293_v43 }
 0x2b8   :  { %v2197_v44 = vpop.eup %2196 }
 0x2b9   :  { %v296_v45 = vsel %vm280_vm3, %v2197_v44, 0.0 }
 0x2ba   :  { %297 = vadd.xlane.f32.xlu1 %v296_v45 }
 0x2cb   :  { %460 = vrot.lane.b32.xlu1 %v2419_v15, %s2260_s2 }
 0x2cc   :  { %408 = vrot.lane.b32.xlu0 %v2416_v12, %s2261_s25 }
 0x2cf   :  { %458 = vrot.lane.b32.xlu1 %v2419_v15, %s2261_s25  ;;  %s2268_s25 = smov 40  }
 0x33f   :  { %v295_v47 = vpop.xlane.xlu0 %294 }
 0x340   :  { %2198 = vrcp.f32 %v295_v47 }
 0x343   :  { %v298_v48 = vpop.xlane.xlu1 %297  ;;  %v409_v58 = vpop.permute.xlu0 %408 }
 0x344   :  { %2200 = vrcp.f32 %v298_v48 }
 0x347   :  { %v461_v55 = vpop.permute.xlu1 %460 }
 0x348   :  { %v466_v57 = vsel %vm182_vm2, %v461_v55, 0 }
 0x34b   :  { %v459_v59 = vpop.permute.xlu1 %458 }
 0x34d   :  { %v2199_v49 = vpop.eup %2198 }
 0x34e   :  { %v301_v50 = vmul.f32 %v2199_v49, %v2195_v42  ;;  %v76_v42 = vld [vmem:[%s2766_s0] sm:$0xf] }
 0x34f   :  { %v686_v45 = vsel %vm638_vm6, %v76_v42, 0 }
 0x350   :  { %v303_v51 = vpack.c.bf16 %v301_v50, %v301_v50 }
 0x351   :  { %v2201_v52 = vpop.eup %2200 }
 0x352   :  { %2013 = vmatmul.mubr.msk.bf16.vlgmr.msra.gmra.mxu1 %vm307_vm5, %v303_v51  ;;  %v302_v54 = vmul.f32 %v2201_v52, %v2197_v44  ;;  %v77_v51 = vld [vmem:[%s2766_s0 + $0x4] sm:$0xf] }
 0x353   :  { %2023 = vmatpush3.bf16.xpose.msra.mxu1 %v416_v53  ;;  %2024 = vmatprep.mubr.msk.bf16.mxu1 %vm2257_vm0, %v2256_v1  ;;  %v640_v52 = vsel %vm638_vm6, %v77_v51, 0  ;;  %v78_v51 = vld [vmem:[%s2766_s0 + $0x8] sm:$0xf] }
 0x354   :  { %v304_v56 = vpack.c.bf16 %v302_v54, %v302_v54  ;;  %2034 = vmatprep.subr.bf16.mxu1 %v2256_v1 }
 0x356   :  { %2019 = vmatmul.mubr.msk.bf16.vlgmr.msra.gmra.mxu0 %vm307_vm5, %v304_v56 }
 0x357   :  { %2029 = vmatpush3.bf16.xpose.msra.mxu0 %v466_v57  ;;  %2030 = vmatprep.mubr.msk.bf16.mxu0 %vm2257_vm0, %v2256_v1 }
 0x358   :  { %2040 = vmatprep.subr.bf16.mxu0 %v2256_v1 }
 0x35a   :  { %2025 = vmatmul.mubr.msk.bf16.vlgmr.msra.gmra.mxu1 %vm182_vm2, %v409_v58 }
 0x35b   :  { %2036 = vmatprep.mubr.msk.bf16.mxu1 %vm2257_vm0, %v2256_v1 }
 0x35e   :  { %2031 = vmatmul.mubr.msk.bf16.vlgmr.msra.gmra.mxu0 %vm182_vm2, %v459_v59 }
 0x35f   :  { %2042 = vmatprep.mubr.msk.bf16.mxu0 %vm2257_vm0, %v2256_v1 }
 0x412   :  { %v349_v60 = vpop.f32.mrf.mxu1 }
 0x414   :  { %v2014_v61 = vpop.f32.mrf.mxu1 }
 0x416   :  { %v352_v62 = vpop.f32.mrf.mxu1  ;;  %v397_v63 = vpop.f32.mrf.mxu0 }
 0x417   :  { %v2466_v0 = vcombine.low %v349_v60, %v397_v63 }
 0x418   :  { %v2015_v2 = vpop.f32.mrf.mxu1  ;;  %v2020_v5 = vpop.f32.mrf.mxu0 }
 0x419   :  { %v407_v48 = vpack.c.bf16 %v2466_v0, %v2466_v0 }
 0x41a   :  { %v400_v6 = vpop.f32.mrf.mxu0  ;;  %v452_v7 = vpop.f32.mrf.mxu1 }
 0x41b   :  { %v508_v8 = vmul.f32 0.35355338, %v452_v7 }
 0x41c   :  { %v2021_v9 = vpop.f32.mrf.mxu0  ;;  %v2026_v10 = vpop.f32.mrf.mxu1 }
 0x41d   :  { %v510_v11 = vsel %vm280_vm3, %v508_v8, -inf }
 0x41e   :  { %v502_v13 = vpop.f32.mrf.mxu0  ;;  %511 = vmax.xlane.f32.xlu1 %v510_v11  ;;  %v455_v14 = vpop.f32.mrf.mxu1 }
 0x41f   :  { %v509_v16 = vmul.f32 0.35355338, %v502_v13 }
 0x420   :  { %v2027_v17 = vpop.f32.mrf.mxu1  ;;  %v2032_v18 = vpop.f32.mrf.mxu0 }
 0x421   :  { %v513_v19 = vsel %vm280_vm3, %v509_v16, -inf }
 0x422   :  { %514 = vmax.xlane.f32.xlu0 %v513_v19  ;;  %v505_v20 = vpop.f32.mrf.mxu0 }
 0x424   :  { %v2033_v21 = vpop.f32.mrf.mxu0 }
 0x438   :  { %582 = vrot.lane.b32.xlu0 %v2419_v15, %s2262_s26 }
 0x43c   :  { %728 = vrot.lane.b32.xlu0 %v2416_v12, %s2263_s27 }
 0x4a7   :  { %v512_v22 = vpop.xlane.xlu1 %511 }
 0x4a8   :  { %v516_v23 = vsub.f32 %v508_v8, %v512_v22 }
 0x4aa   :  { %v518_v24 = vmul.f32 1.442695, %v516_v23 }
 0x4ab   :  { %v515_v25 = vpop.xlane.xlu0 %514 }
 0x4ac   :  { %2202 = vpow2.f32 %v518_v24  ;;  %v517_v26 = vsub.f32 %v509_v16, %v515_v25 }
 0x4ae   :  { %v520_v27 = vmul.f32 1.442695, %v517_v26 }
 0x4af   :  { %v583_v28 = vpop.permute.xlu0 %582 }
 0x4b0   :  { %2204 = vpow2.f32 %v520_v27  ;;  %v588_v29 = vsel %vm311_vm4, %v583_v28, 0 }
 0x4b1   :  { %2041 = vmatpush3.bf16.msra.mxu0 %v588_v29 }
 0x4b2   :  { %2052 = vmatprep.subr.bf16.mxu0 %v2256_v1 }
 0x4b3   :  { %v729_v5 = vpop.permute.xlu0 %728 }
 0x4b9   :  { %v2203_v30 = vpop.eup %2202 }
 0x4ba   :  { %v522_v31 = vsel %vm280_vm3, %v2203_v30, 0.0 }
 0x4bb   :  { %523 = vadd.xlane.f32.xlu1 %v522_v31 }
 0x4bd   :  { %v2205_v32 = vpop.eup %2204 }
 0x4be   :  { %v525_v33 = vsel %vm280_vm3, %v2205_v32, 0.0 }
 0x4bf   :  { %526 = vadd.xlane.f32.xlu1 %v525_v33 }
 0x4d0   :  { %534 = vrot.lane.b32.xlu1 %v2416_v12, %s2262_s26 }
 0x4d4   :  { %730 = vrot.lane.b32.xlu1 %v2416_v12, %s2264_s3 }
 0x4d8   :  { %780 = vrot.lane.b32.xlu1 %v2419_v15, %s2264_s3 }
 0x4dc   :  { %778 = vrot.lane.b32.xlu1 %v2419_v15, %s2263_s27 }
 0x544   :  { %v524_v34 = vpop.xlane.xlu1 %523 }
 0x545   :  { %2206 = vrcp.f32 %v524_v34 }
 0x548   :  { %v527_v35 = vpop.xlane.xlu1 %526 }
 0x549   :  { %2208 = vrcp.f32 %v527_v35 }
 0x54c   :  { %v535_v36 = vpop.permute.xlu1 %534 }
 0x54d   :  { %v540_v37 = vsel %vm311_vm4, %v535_v36, 0 }
 0x54e   :  { %2035 = vmatpush3.bf16.msra.mxu1 %v540_v37 }
 0x54f   :  { %2046 = vmatprep.subr.bf16.mxu1 %v2256_v1 }
 0x550   :  { %v731_v46 = vpop.permute.xlu1 %730 }
 0x551   :  { %v736_v62 = vsel %vm182_vm2, %v731_v46, 0 }
 0x552   :  { %v2207_v38 = vpop.eup %2206 }
 0x553   :  { %v530_v39 = vmul.f32 %v2207_v38, %v2203_v30 }
 0x554   :  { %v781_v47 = vpop.permute.xlu1 %780 }
 0x555   :  { %v532_v40 = vpack.c.bf16 %v530_v39, %v530_v39  ;;  %v786_v49 = vsel %vm182_vm2, %v781_v47, 0 }
 0x556   :  { %v2209_v41 = vpop.eup %2208 }
 0x557   :  { %2037 = vmatmul.mubr.msk.bf16.vlgmr.msra.gmra.mxu1 %vm307_vm5, %v532_v40  ;;  %v531_v43 = vmul.f32 %v2209_v41, %v2205_v32 }
 0x558   :  { %2048 = vmatprep.mubr.msk.bf16.mxu1 %vm2257_vm0, %v2256_v1  ;;  %v779_v50 = vpop.permute.xlu1 %778  ;;  %2047 = vmatpush3.bf16.msra.mxu1 %v640_v52  ;;  %v959_v52 = vsel %vm638_vm6, %v78_v51, 0 }
 0x559   :  { %v533_v44 = vpack.c.bf16 %v531_v43, %v531_v43  ;;  %2058 = vmatprep.subr.bf16.mxu1 %v2256_v1 }
 0x55b   :  { %2043 = vmatmul.mubr.msk.bf16.vlgmr.msra.gmra.mxu0 %vm307_vm5, %v533_v44 }
 0x55c   :  { %2053 = vmatpush3.bf16.msra.mxu0 %v686_v45  ;;  %2054 = vmatprep.mubr.msk.bf16.mxu0 %vm2257_vm0, %v2256_v1 }
 0x55d   :  { %2064 = vmatprep.subr.bf16.mxu0 %v2256_v1 }
 0x563   :  { %2055 = vmatmul.mubr.msk.bf16.vlgmr.msra.gmra.mxu0 %vm182_vm2, %v407_v48 }
 0x564   :  { %2065 = vmatpush3.bf16.xpose.msra.mxu0 %v786_v49  ;;  %2066 = vmatprep.mubr.msk.bf16.mxu0 %vm2257_vm0, %v2256_v1 }
 0x565   :  { %2076 = vmatprep.subr.bf16.mxu0 %v2256_v1 }
 0x56b   :  { %2067 = vmatmul.mubr.msk.bf16.vlgmr.msra.gmra.mxu0 %vm182_vm2, %v779_v50 }
 0x56c   :  { %2078 = vmatprep.mubr.msk.bf16.mxu0 %vm2257_vm0, %v2256_v1 }
 0x617   :  { %v576_v53 = vpop.f32.mrf.mxu1 }
 0x619   :  { %v2038_v54 = vpop.f32.mrf.mxu1 }
 0x61b   :  { %v579_v55 = vpop.f32.mrf.mxu1  ;;  %v624_v56 = vpop.f32.mrf.mxu0 }
 0x61c   :  { %v632_v57 = vcombine.low %v576_v53, %v624_v56 }
 0x61d   :  { %v2039_v58 = vpop.f32.mrf.mxu1  ;;  %v2044_v59 = vpop.f32.mrf.mxu0 }
 0x61e   :  { %v634_v60 = vpack.c.bf16 %v632_v57, %v632_v57 }
 0x61f   :  { %v627_v61 = vpop.f32.mrf.mxu0 }
 0x620   :  { %2049 = vmatmul.mubr.msk.bf16.vlgmr.msra.gmra.mxu1 %vm182_vm2, %v634_v60 }
 0x621   :  { %2059 = vmatpush3.bf16.xpose.msra.mxu1 %v736_v62  ;;  %v2045_v63 = vpop.f32.mrf.mxu0  ;;  %2060 = vmatprep.mubr.msk.bf16.mxu1 %vm2257_vm0, %v2256_v1 }
 0x622   :  { %2070 = vmatprep.subr.bf16.mxu1 %v2256_v1 }
 0x623   :  { %v2513_v0 = vpop.f32.mrf.mxu0 }
 0x625   :  { %v2056_v2 = vpop.f32.mrf.mxu0 }
 0x627   :  { %v725_v6 = vpop.f32.mrf.mxu0 }
 0x628   :  { %2061 = vmatmul.mubr.msk.bf16.vlgmr.msra.gmra.mxu1 %vm182_vm2, %v729_v5 }
 0x629   :  { %v2057_v7 = vpop.f32.mrf.mxu0  ;;  %2072 = vmatprep.mubr.msk.bf16.mxu1 %vm2257_vm0, %v2256_v1 }
 0x62b   :  { %v822_v8 = vpop.f32.mrf.mxu0 }
 0x62c   :  { %v829_v9 = vmul.f32 0.35355338, %v822_v8 }
 0x62d   :  { %v2068_v10 = vpop.f32.mrf.mxu0 }
 0x62e   :  { %v833_v11 = vsel %vm280_vm3, %v829_v9, -inf }
 0x62f   :  { %834 = vmax.xlane.f32.xlu1 %v833_v11  ;;  %v825_v13 = vpop.f32.mrf.mxu0 }
 0x631   :  { %v2069_v14 = vpop.f32.mrf.mxu0 }
 0x640   :  { %854 = vrot.lane.b32.xlu1 %v2416_v12, %s2265_s5 }
 0x644   :  { %1004 = vrot.lane.b32.xlu1 %v2416_v12, %s2266_s22 }
 0x648   :  { %1054 = vrot.lane.b32.xlu1 %v2419_v15, %s2266_s22 }
 0x64c   :  { %1052 = vrot.lane.b32.xlu1 %v2419_v15, %s2267_s23 }
 0x6b8   :  { %v835_v16 = vpop.xlane.xlu1 %834 }
 0x6b9   :  { %v837_v19 = vsub.f32 %v829_v9, %v835_v16 }
 0x6bb   :  { %v840_v20 = vmul.f32 1.442695, %v837_v19 }
 0x6bc   :  { %v855_v17 = vpop.permute.xlu1 %854 }
 0x6bd   :  { %v860_v18 = vsel %vm311_vm4, %v855_v17, 0  ;;  %2210 = vpow2.f32 %v840_v20 }
 0x6be   :  { %2071 = vmatpush3.bf16.msra.mxu1 %v860_v18 }
 0x6bf   :  { %2082 = vmatprep.subr.bf16.mxu1 %v2256_v1 }
 0x6c0   :  { %v1005_v44 = vpop.permute.xlu1 %1004 }
 0x6c1   :  { %v1010_v46 = vsel %vm182_vm2, %v1005_v44, 0 }
 0x6c4   :  { %v1055_v61 = vpop.permute.xlu1 %1054 }
 0x6c5   :  { %v1060_v9 = vsel %vm182_vm2, %v1055_v61, 0 }
 0x6c8   :  { %v1053_v11 = vpop.permute.xlu1 %1052 }
 0x6ca   :  { %v2211_v29 = vpop.eup %2210 }
 0x6cb   :  { %v845_v32 = vsel %vm280_vm3, %v2211_v29, 0.0 }
 0x6e0   :  { %v2527_v21 = vpop.f32.mrf.mxu1 }
 0x6e1   :  { %v723_v19 = vadd.f32 %v2513_v0, %v2527_v21 }
 0x6e2   :  { %v2050_v22 = vpop.f32.mrf.mxu1 }
 0x6e4   :  { %v679_v23 = vpop.f32.mrf.mxu1 }
 0x6e6   :  { %v2051_v24 = vpop.f32.mrf.mxu1 }
 0x6e8   :  { %v772_v25 = vpop.f32.mrf.mxu1 }
 0x6e9   :  { %v828_v26 = vmul.f32 0.35355338, %v772_v25 }
 0x6ea   :  { %v2062_v27 = vpop.f32.mrf.mxu1 }
 0x6eb   :  { %v830_v28 = vsel %vm280_vm3, %v828_v26, -inf }
 0x6ec   :  { %831 = vmax.xlane.f32.xlu0 %v830_v28  ;;  %v775_v30 = vpop.f32.mrf.mxu1 }
 0x6ee   :  { %v2063_v31 = vpop.f32.mrf.mxu1 }
 0x6f0   :  { %846 = vadd.xlane.f32.xlu0 %v845_v32 }
 0x775   :  { %v832_v33 = vpop.xlane.xlu0 %831 }
 0x776   :  { %v836_v34 = vsub.f32 %v828_v26, %v832_v33 }
 0x778   :  { %v838_v35 = vmul.f32 1.442695, %v836_v34 }
 0x779   :  { %v847_v38 = vpop.xlane.xlu0 %846 }
 0x77a   :  { %2212 = vpow2.f32 %v838_v35 }
 0x77b   :  { %2214 = vrcp.f32 %v847_v38 }
 0x787   :  { %v2213_v36 = vpop.eup %2212 }
 0x788   :  { %v842_v37 = vsel %vm280_vm3, %v2213_v36, 0.0  ;;  %v2215_v39 = vpop.eup %2214 }
 0x789   :  { %843 = vadd.xlane.f32.xlu0 %v842_v37  ;;  %v851_v41 = vmul.f32 %v2215_v39, %v2211_v29 }
 0x78b   :  { %v853_v45 = vpack.c.bf16 %v851_v41, %v851_v41 }
 0x79f   :  { %902 = vrot.lane.b32.xlu0 %v2419_v15, %s2265_s5 }
 0x7a3   :  { %1002 = vrot.lane.b32.xlu0 %v2416_v12, %s2267_s23 }
 0x812   :  { %v844_v40 = vpop.xlane.xlu0 %843 }
 0x813   :  { %2216 = vrcp.f32 %v844_v40  ;;  %v79_v40 = vld [vmem:[%s2766_s0 + $0xc] sm:$0xf] }
 0x814   :  { %v1233_v41 = vsel %vm638_vm6, %v79_v40, 0 }
 0x816   :  { %v903_v42 = vpop.permute.xlu0 %902 }
 0x817   :  { %v908_v43 = vsel %vm311_vm4, %v903_v42, 0 }
 0x818   :  { %2077 = vmatpush3.bf16.msra.mxu0 %v908_v43 }
 0x819   :  { %2088 = vmatprep.subr.bf16.mxu0 %v2256_v1 }
 0x81a   :  { %v1003_v49 = vpop.permute.xlu0 %1002 }
 0x81b   :  { %2079 = vmatmul.mubr.msk.bf16.vlgmr.msra.gmra.mxu0 %vm307_vm5, %v853_v45 }
 0x81c   :  { %2089 = vmatpush3.bf16.xpose.msra.mxu0 %v1010_v46  ;;  %2090 = vmatprep.mubr.msk.bf16.mxu0 %vm2257_vm0, %v2256_v1 }
 0x81d   :  { %2100 = vmatprep.subr.bf16.mxu0 %v2256_v1 }
 0x820   :  { %v2217_v47 = vpop.eup %2216 }
 0x821   :  { %v850_v48 = vmul.f32 %v2217_v47, %v2213_v36 }
 0x823   :  { %2091 = vmatmul.mubr.msk.bf16.vlgmr.msra.gmra.mxu0 %vm182_vm2, %v1003_v49  ;;  %v852_v50 = vpack.c.bf16 %v850_v48, %v850_v48 }
 0x824   :  { %2102 = vmatprep.mubr.msk.bf16.mxu0 %vm2257_vm0, %v2256_v1 }
 0x825   :  { %2073 = vmatmul.mubr.msk.bf16.vlgmr.msra.gmra.mxu1 %vm307_vm5, %v852_v50 }
 0x826   :  { %2084 = vmatprep.mubr.msk.bf16.mxu1 %vm2257_vm0, %v2256_v1  ;;  %2083 = vmatpush3.bf16.msra.mxu1 %v959_v52 }
 0x827   :  { %2094 = vmatprep.subr.bf16.mxu1 %v2256_v1 }
 0x8db   :  { %v944_v53 = vpop.f32.mrf.mxu0 }
 0x8dd   :  { %v2080_v54 = vpop.f32.mrf.mxu0 }
 0x8df   :  { %v947_v55 = vpop.f32.mrf.mxu0 }
 0x8e1   :  { %v2081_v56 = vpop.f32.mrf.mxu0 }
 0x8e3   :  { %v1046_v57 = vpop.f32.mrf.mxu0 }
 0x8e4   :  { %v1102_v58 = vmul.f32 0.35355338, %v1046_v57  ;;  %v1902_v57 = vld [vmem:[%s2767_s29] ss:$0 sm:$0xff] }
 0x8e5   :  { %v896_v59 = vpop.f32.mrf.mxu1  ;;  %v2092_v60 = vpop.f32.mrf.mxu0 }
 0x8e6   :  { %v952_v62 = vcombine.low %v896_v59, %v944_v53  ;;  %v1104_v63 = vsel %vm280_vm3, %v1102_v58, -inf }
 0x8e7   :  { %1105 = vmax.xlane.f32.xlu0 %v1104_v63  ;;  %v2074_v2 = vpop.f32.mrf.mxu1  ;;  %v1049_v5 = vpop.f32.mrf.mxu0 }
 0x8e8   :  { %v954_v6 = vpack.c.bf16 %v952_v62, %v952_v62 }
 0x8e9   :  { %v899_v7 = vpop.f32.mrf.mxu1  ;;  %v2093_v8 = vpop.f32.mrf.mxu0 }
 0x8ea   :  { %2085 = vmatmul.mubr.msk.bf16.vlgmr.msra.gmra.mxu1 %vm182_vm2, %v954_v6 }
 0x8eb   :  { %2095 = vmatpush3.bf16.xpose.msra.mxu1 %v1060_v9  ;;  %v2075_v10 = vpop.f32.mrf.mxu1  ;;  %2096 = vmatprep.mubr.msk.bf16.mxu1 %vm2257_vm0, %v2256_v1  ;;  %v2269_v9 = vmov 839922192  }
 0x8ec   :  { %2106 = vmatprep.subr.bf16.mxu1 %v2256_v1  ;;  %v1299_v10 = vunpack.c.l.s4 %v2269_v9 }
 0x8f2   :  { %2097 = vmatmul.mubr.msk.bf16.vlgmr.msra.gmra.mxu1 %vm182_vm2, %v1053_v11  ;;  %v1301_v11 = vlaneseq }
 0x8f3   :  { %2108 = vmatprep.mubr.msk.bf16.mxu1 %vm2257_vm0, %v2256_v1 }
 0x970   :  { %v1106_v13 = vpop.xlane.xlu0 %1105 }
 0x971   :  { %v1110_v14 = vsub.f32 %v1102_v58, %v1106_v13  ;;  %v2270_v13 = vmov 1985246804  }
 0x973   :  { %v1112_v16 = vmul.f32 1.442695, %v1110_v14  ;;  %v1306_v14 = vunpack.c.l.s4 %v2270_v13 }
 0x975   :  { %2218 = vpow2.f32 %v1112_v16  ;;  %v1300_v16 = vunpack.c.0.s8 %v1299_v10  ;;  %v2191_v10 = vld [vmem:[%s2745_s14] sm:$0xff]  }
 0x982   :  { %v2219_v17 = vpop.eup %2218 }
 0x983   :  { %v1116_v18 = vsel %vm280_vm3, %v2219_v17, 0.0 }
 0x984   :  { %1117 = vadd.xlane.f32.xlu0 %v1116_v18  ;;  %v1307_v18 = vunpack.c.0.s8 %v1306_v14  ;;  %v2271_v14 = vmov 1983009808  }
 0x9aa   :  { %v995_v20 = vpop.f32.mrf.mxu1 }
 0x9ab   :  { %v1001_v22 = vadd.f32 %v995_v20, %v723_v19 }
 0x9ac   :  { %v2086_v23 = vpop.f32.mrf.mxu1 }
 0x9ae   :  { %v998_v24 = vpop.f32.mrf.mxu1 }
 0x9b0   :  { %v2087_v25 = vpop.f32.mrf.mxu1 }
 0x9b2   :  { %v1096_v26 = vpop.f32.mrf.mxu1 }
 0x9b3   :  { %v1103_v27 = vmul.f32 0.35355338, %v1096_v26 }
 0x9b4   :  { %v2098_v28 = vpop.f32.mrf.mxu1 }
 0x9b5   :  { %v1107_v29 = vsel %vm280_vm3, %v1103_v27, -inf }
 0x9b6   :  { %1108 = vmax.xlane.f32.xlu1 %v1107_v29  ;;  %v1099_v30 = vpop.f32.mrf.mxu1 }
 0x9b7   :  { %v2181_v30 = vld [vmem:[%s2739_s8 + $0x8] sm:$0xff]  }
 0x9b8   :  { %v2099_v31 = vpop.f32.mrf.mxu1 }
 0x9b9   :  { %v2182_v31 = vld [vmem:[%s2739_s8] sm:$0xff]  }
 0x9c7   :  { %1128 = vrot.lane.b32.xlu1 %v2416_v12, %s2268_s25 }
 0xa0d   :  { %v1118_v32 = vpop.xlane.xlu0 %1117 }
 0xa0e   :  { %2220 = vrcp.f32 %v1118_v32 }
 0xa1b   :  { %v2221_v33 = vpop.eup %2220 }
 0xa1c   :  { %v1124_v35 = vmul.f32 %v2221_v33, %v2219_v17  ;;  %v2594_v17 = vshrl.u32 %v1301_v11, 7 }
 0xa1e   :  { %v1126_v38 = vpack.c.bf16 %v1124_v35, %v1124_v35  ;;  %v2597_v19 = vsub.s32 %v1300_v16, %v2594_v17  ;;  %v1904_v35 = vld [vmem:[%s2738_s7] ss:$0 sm:$0xff]  ;;  %v1637_v16 = vunpack.c.l.s4 %v2271_v14 }
 0xa1f   :  { %v1363_v40 = vcombine.high %v1904_v35, %v1904_v35 }
 0xa3f   :  { %v1109_v0 = vpop.xlane.xlu1 %1108 }
 0xa40   :  { %v1111_v21 = vsub.f32 %v1103_v27, %v1109_v0 }
 0xa42   :  { %v1114_v34 = vmul.f32 1.442695, %v1111_v21  ;;  %v1903_v21 = vld [vmem:[%s2737_s6] ss:$0 sm:$0xff] }
 0xa43   :  { %v1129_v36 = vpop.permute.xlu1 %1128 }
 0xa44   :  { %2222 = vpow2.f32 %v1114_v34  ;;  %v1134_v37 = vsel %vm311_vm4, %v1129_v36, 0 }
 0xa45   :  { %2101 = vmatpush3.bf16.msra.mxu0 %v1134_v37 }
 0xa46   :  { %2112 = vmatprep.subr.bf16.mxu0 %v2256_v1 }
 0xa48   :  { %2103 = vmatmul.mubr.msk.bf16.vlgmr.msra.gmra.mxu0 %vm307_vm5, %v1126_v38  ;;  %v1353_v38 = vcombine.high %v1903_v21, %v1903_v21 }
 0xa49   :  { %2114 = vmatprep.mubr.msk.bf16.mxu0 %vm2257_vm0, %v2256_v1  ;;  %2113 = vmatpush3.bf16.msra.mxu0 %v1233_v41 }
 0xa4a   :  { %2126 = vmatprep.subr.bf16.mxu0 %v2256_v1 }
 0xa51   :  { %v2223_v12 = vpop.eup %2222 }
 0xa52   :  { %v1119_v39 = vsel %vm280_vm3, %v2223_v12, 0.0 }
 0xa53   :  { %1120 = vadd.xlane.f32.xlu0 %v1119_v39 }
 0xa69   :  { %1176 = vrot.lane.b32.xlu0 %v2419_v15, %s2268_s25  ;;  %s2768_s25 = sld [smem:[#allocation6_spill]] }
 0xa6f   :  { %v1620_v11 = vld [vmem:[%s2768_s25] sm:$0xf]  ;;  %v1621_v13 = vld [vmem:[%s2768_s25 + $0x4] sm:$0xf] }
 0xadc   :  { %v1121_v42 = vpop.xlane.xlu0 %1120 }
 0xadd   :  { %2224 = vrcp.f32 %v1121_v42 }
 0xae0   :  { %v1177_v43 = vpop.permute.xlu0 %1176 }
 0xae1   :  { %v1182_v44 = vsel %vm311_vm4, %v1177_v43, 0 }
 0xae2   :  { %2107 = vmatpush3.bf16.msra.mxu1 %v1182_v44 }
 0xae3   :  { %2118 = vmatprep.subr.bf16.mxu1 %v2256_v1 }
 0xaea   :  { %v2225_v45 = vpop.eup %2224 }
 0xaeb   :  { %v1125_v46 = vmul.f32 %v2225_v45, %v2223_v12 }
 0xaed   :  { %v1127_v15 = vpack.c.bf16 %v1125_v46, %v1125_v46 }
 0xaef   :  { %2109 = vmatmul.mubr.msk.bf16.vlgmr.msra.gmra.mxu1 %vm307_vm5, %v1127_v15  ;;  %v2183_v15 = vld [vmem:[%s2741_s10 + $0x38] sm:$0xff]  }
 0xaf0   :  { %2122 = vmatprep.mubr.msk.bf16.mxu1 %vm2257_vm0, %v2256_v1  ;;  %2119 = vmatpush3.bf16.msra.mxu1 %v2181_v30 }
 0xaf1   :  { %2120 = vmatprep.subr.bf16.mxu1 %v2256_v1 }
 0xaf4   :  { %2121 = vmatpush3.bf16.msra.mxu1 %v2182_v31 }
 0xaf5   :  { %2146 = vmatprep.subr.bf16.mxu1 %v2256_v1 }
 0xb08   :  { %v1170_v47 = vpop.f32.mrf.mxu0 }
 0xb0a   :  { %v2104_v48 = vpop.f32.mrf.mxu0 }
 0xb0b   :  { %v2185_v48 = vld [vmem:[%s2741_s10 + $0x28] sm:$0xff]  }
 0xb0c   :  { %v1173_v49 = vpop.f32.mrf.mxu0 }
 0xb0d   :  { %v2186_v49 = vld [vmem:[%s2741_s10 + $0x20] sm:$0xff]  }
 0xb0e   :  { %v2105_v50 = vpop.f32.mrf.mxu0 }
 0xb0f   :  { %v2187_v50 = vld [vmem:[%s2741_s10 + $0x18] sm:$0xff]  }
 0xbaf   :  { %v1218_v51 = vpop.f32.mrf.mxu1 }
 0xbb0   :  { %v1226_v52 = vcombine.low %v1170_v47, %v1218_v51  ;;  %v2184_v47 = vld [vmem:[%s2741_s10 + $0x30] sm:$0xff]  }
 0xbb1   :  { %v2110_v53 = vpop.f32.mrf.mxu1  ;;  %v2188_v51 = vld [vmem:[%s2741_s10 + $0x10] sm:$0xff]  }
 0xbb2   :  { %v1228_v54 = vpack.c.bf16 %v1226_v52, %v1226_v52  ;;  %v2189_v52 = vld [vmem:[%s2741_s10 + $0x8] sm:$0xff]   ;;  %v2190_v53 = vld [vmem:[%s2741_s10] sm:$0xff]  }
 0xbb3   :  { %v1221_v55 = vpop.f32.mrf.mxu1 }
 0xbb4   :  { %2115 = vmatmul.mubr.msk.bf16.vlgmr.msra.gmra.mxu0 %vm182_vm2, %v1228_v54  ;;  %v1905_v54 = vld [vmem:[%s2740_s9] ss:$0 sm:$0xff] }
 0xbb5   :  { %v2111_v56 = vpop.f32.mrf.mxu1  ;;  %2142 = vmatprep.mubr.msk.bf16.mxu0 %vm2257_vm0, %v2256_v1  ;;  %2127 = vmatpush3.bf16.msra.mxu0 %v2183_v15  ;;  %v1918_v15 = vld [vmem:[%s2743_s12] ss:$0 sm:$0xff] }
 0xbb6   :  { %2128 = vmatprep.subr.bf16.mxu0 %v2256_v1 }
 0xbb9   :  { %2129 = vmatpush3.bf16.msra.mxu0 %v2184_v47  ;;  %v1920_v47 = vld [vmem:[%s2746_s15] ss:$0 sm:$0xff] }
 0xbba   :  { %2130 = vmatprep.subr.bf16.mxu0 %v2256_v1 }
 0xbbd   :  { %2131 = vmatpush3.bf16.msra.mxu0 %v2185_v48 }
 0xbbe   :  { %2132 = vmatprep.subr.bf16.mxu0 %v2256_v1 }
 0xbc1   :  { %2133 = vmatpush3.bf16.msra.mxu0 %v2186_v49  ;;  %v1919_v49 = vld [vmem:[%s2744_s13] ss:$0 sm:$0xff] }
 0xbc2   :  { %2134 = vmatprep.subr.bf16.mxu0 %v2256_v1 }
 0xbc5   :  { %2135 = vmatpush3.bf16.msra.mxu0 %v2187_v50 }
 0xbc6   :  { %2136 = vmatprep.subr.bf16.mxu0 %v2256_v1 }
 0xbc9   :  { %2137 = vmatpush3.bf16.msra.mxu0 %v2188_v51  ;;  %v1606_v51 = vcombine.high %v1918_v15, %v1918_v15 }
 0xbca   :  { %2138 = vmatprep.subr.bf16.mxu0 %v2256_v1 }
 0xbcd   :  { %2139 = vmatpush3.bf16.msra.mxu0 %v2189_v52 }
 0xbce   :  { %2140 = vmatprep.subr.bf16.mxu0 %v2256_v1 }
 0xbd1   :  { %2141 = vmatpush3.bf16.msra.mxu0 %v2190_v53 }
 0xc74   :  { %v1269_v58 = vpop.f32.mrf.mxu0 }
 0xc75   :  { %v1275_v59 = vadd.f32 %v1269_v58, %v1001_v22 }
 0xc76   :  { %v2116_v60 = vpop.f32.mrf.mxu0 }
 0xc77   :  { %v1282_v61 = vadd.f32 %v1902_v57, %v1275_v59 }
 0xc78   :  { %v1272_v62 = vpop.f32.mrf.mxu0 }
 0xc79   :  { %v1284_v63 = vcombine.high %v1282_v61, %v1282_v61  ;;  %v1286_v5 = vadd.f32 %v1282_v61, %v2397_v3  ;;  %v2600_v3 = vsub.s32 %v1307_v18, %v2594_v17  ;;  %v1921_v18 = vpack.c.bf16 %v1621_v13, %v1620_v11 }
 0xc7a   :  { %v2117_v2 = vpop.f32.mrf.mxu0 }
 0xc7b   :  { %v1287_v6 = vadd.f32 %v1284_v63, %v2402_v4 }
 0xc7d   :  { %v1290_v7 = vcombine.low %v1286_v5, %v1287_v6 }
 0xc7f   :  { %v1292_v8 = vsel %vm130_vm1, %v1290_v7, 0.0 }
 0xc80   :  { %1293 = vadd.xlane.f32.xlu1 %v1292_v8 }
 0xd09   :  { %v1294_v4 = vpop.xlane.xlu1 %1293 }
 0xd0a   :  { %v1296_v20 = vmul.f32 0.03125, %v1294_v4  ;;  %v1638_v4 = vunpack.c.0.s8 %v1637_v16 }
 0xd0c   :  { %v1304_v22 = vrot.slane %v1296_v20, %v2597_v19  ;;  %v1311_v23 = vrot.slane %v1296_v20, %v2600_v3  ;;  %v1641_v20 = vsub.s32 %v1638_v4, %v2594_v17  ;;  %v2192_v4 = vld [vmem:[%s2749_s18 + $0x8] sm:$0xff]  }
 0xd0e   :  { %v1314_v24 = vsub.f32 %v1286_v5, %v1304_v22  ;;  %v1315_v25 = vsub.f32 %v1287_v6, %v1311_v23  ;;  %v1642_v22 = vrot.slane %v1921_v18, %v1641_v20  ;;  %v1909_v23 = vld [vmem:[%s2742_s11] ss:$0 sm:$0xff] }
 0xd0f   :  { %v2193_v20 = vld [vmem:[%s2749_s18] sm:$0xff]  }
 0xd10   :  { %v1316_v26 = vmul.f32 %v1314_v24, %v1314_v24  ;;  %v1317_v27 = vmul.f32 %v1315_v25, %v1315_v25 }
 0xd12   :  { %v1320_v28 = vcombine.low %v1316_v26, %v1317_v27 }
 0xd14   :  { %v1322_v29 = vsel %vm130_vm1, %v1320_v28, 0.0 }
 0xd15   :  { %1323 = vadd.xlane.f32.xlu0 %v1322_v29 }
 0xd9e   :  { %v1324_v32 = vpop.xlane.xlu0 %1323 }
 0xd9f   :  { %v1325_v33 = vmul.f32 0.03125, %v1324_v32 }
 0xda1   :  { %v1326_v0 = vadd.f32 1e-05, %v1325_v33 }
 0xda3   :  { %2226 = vrsqrt.f32 %v1326_v0 }
 0xdb0   :  { %v2227_v34 = vpop.eup %2226 }
 0xdb1   :  { %v1335_v36 = vrot.slane %v2227_v34, %v2597_v19  ;;  %v1342_v37 = vrot.slane %v2227_v34, %v2600_v3 }
 0xdb3   :  { %v1345_v12 = vmul.f32 %v1335_v36, %v1314_v24  ;;  %v1346_v39 = vmul.f32 %v1342_v37, %v1315_v25 }
 0xdb5   :  { %v1355_v41 = vmul.f32 %v1903_v21, %v1345_v12  ;;  %v1356_v42 = vmul.f32 %v1353_v38, %v1346_v39 }
 0xdb7   :  { %v2621_v43 = vadd.f32 %v1904_v35, %v1355_v41  ;;  %v2623_v44 = vadd.f32 %v1363_v40, %v1356_v42 }
 0xdb9   :  { %v1369_v45 = vcombine.low %v2621_v43, %v2623_v44 }
 0xdbb   :  { %v1371_v46 = vpack.c.bf16 %v1369_v45, %v1369_v45 }
 0xdbd   :  { %2123 = vmatmul.mubr.msk.bf16.vlgmr.msra.gmra.mxu1 %vm130_vm1, %v1371_v46 }
 0xdbe   :  { %2148 = vmatprep.mubr.msk.bf16.mxu1 %vm2257_vm0, %v2256_v1  ;;  %2147 = vmatpush3.bf16.msra.mxu1 %v2191_v10 }
 0xdbf   :  { %2152 = vmatprep.subr.bf16.mxu1 %v2256_v1 }
 0xdc5   :  { %2149 = vmatmul.mubr.msk.bf16.vlgmr.msra.gmra.mxu1 %vm1649_vm7, %v1642_v22 }
 0xdc6   :  { %2156 = vmatprep.mubr.msk.bf16.mxu1 %vm2257_vm0, %v2256_v1  ;;  %2153 = vmatpush3.bf16.msra.mxu1 %v2192_v4 }
 0xdc7   :  { %2154 = vmatprep.subr.bf16.mxu1 %v2256_v1 }
 0xdca   :  { %2155 = vmatpush3.bf16.msra.mxu1 %v2193_v20 }
 0xe7d   :  { %v1427_v55 = vpop.f32.mrf.mxu1 }
 0xe7e   :  { %v1428_v56 = vadd.f32 %v1905_v54, %v1427_v55  ;;  %v1616_v55 = vcombine.high %v1919_v49, %v1919_v49 }
 0xe7f   :  { %v2124_v57 = vpop.f32.mrf.mxu1 }
 0xe80   :  { %v1434_v58 = vmul.f32 %v1428_v56, %v1428_v56  ;;  %v1433_v6 = vmul.f32 0.5, %v1428_v56 }
 0xe81   :  { %v1430_v59 = vpop.f32.mrf.mxu1 }
 0xe82   :  { %v1435_v60 = vmul.f32 %v1434_v58, %v1428_v56 }
 0xe83   :  { %v2125_v61 = vpop.f32.mrf.mxu1 }
 0xe84   :  { %v1436_v62 = vmul.f32 0.044715, %v1435_v60 }
 0xe85   :  { %v1687_v40 = vpop.f32.mrf.mxu1 }
 0xe86   :  { %v1437_v63 = vadd.f32 %v1436_v62, %v1428_v56  ;;  %v1688_v52 = vadd.f32 %v1920_v47, %v1687_v40 }
 0xe87   :  { %v2150_v41 = vpop.f32.mrf.mxu1 }
 0xe88   :  { %v1438_v2 = vmul.f32 0.7978846, %v1437_v63  ;;  %v1694_v58 = vcombine.high %v1688_v52, %v1688_v52 }
 0xe89   :  { %v1690_v42 = vpop.f32.mrf.mxu1 }
 0xe8a   :  { %2228 = vtanh.f32 %v1438_v2 }
 0xe97   :  { %v2229_v5 = vpop.eup %2228 }
 0xe98   :  { %v1440_v7 = vadd.f32 1.0, %v2229_v5 }
 0xe9a   :  { %v1441_v8 = vmul.f32 %v1440_v7, %v1433_v6 }
 0xe9c   :  { %v1442_v9 = vpack.c.bf16 %v1441_v8, %v1441_v8 }
 0xe9e   :  { %2143 = vmatmul.mubr.bf16.vlgmr.msra.gmra.mxu0 %v1442_v9 }
 0xf5e   :  { %v1531_v24 = vpop.f32.mrf.mxu0 }
 0xf5f   :  { %v1532_v25 = vadd.f32 %v1909_v23, %v1531_v24 }
 0xf60   :  { %v2144_v26 = vpop.f32.mrf.mxu0 }
 0xf61   :  { %v1538_v27 = vcombine.high %v1532_v25, %v1532_v25  ;;  %v1540_v29 = vadd.f32 %v1532_v25, %v2621_v43  ;;  %v2151_v43 = vpop.f32.mrf.mxu1  ;;  %v1924_v25 = vld [vmem:[%s2747_s16] ss:$0 sm:$0xff]  ;;  %s2272_s16 = smov [#allocation2]  }
 0xf62   :  { %v1534_v28 = vpop.f32.mrf.mxu0 }
 0xf63   :  { %v1541_v30 = vadd.f32 %v1538_v27, %v2623_v44  ;;  %v1925_v27 = vld [vmem:[%s2748_s17] ss:$0 sm:$0xff]  ;;  %s1863_s17 = sshll.u32 %s2272_s16, 4  ;;  %s1864_s17 = int_to_ptr.vmem [resolvable:$true] %s1863_s17 }
 0xf64   :  { %v2145_v17 = vpop.f32.mrf.mxu0  ;;  %s2234_s18 = scalar_lea.vmem %s1864_s17, 128  ;;  %p2239_p1 = scmp.lt.s32.totalorder %s1864_s17, %s1864_s17 }
 0xf65   :  { %v1544_v31 = vcombine.low %v1540_v29, %v1541_v30  ;;  %p2235_p0 = scmp.ne.s32.totalorder %s1864_s17, %s2234_s18  ;;  %p2240_p2 = scmp.lt.s32.totalorder %s2234_s18, %s2234_s18 }
 0xf67   :  { %v1546_v32 = vsel %vm130_vm1, %v1544_v31, 0.0  ;;  %v1774_v31 = vcombine.high %v1925_v27, %v1925_v27  ;;  %p2241_p3 = por %p2240_p2, %p2239_p1 }
 0xf68   :  { %1547 = vadd.xlane.f32.xlu1 %v1546_v32 }
 0xf69   :  { %p2242_p4 = pnand %p2241_p3, %p2235_p0 }
 0xff1   :  { %v1548_v33 = vpop.xlane.xlu1 %1547 }
 0xff2   :  { %v1549_v0 = vmul.f32 0.03125, %v1548_v33 }
 0xff4   :  { %v1557_v21 = vrot.slane %v1549_v0, %v2597_v19  ;;  %v1564_v34 = vrot.slane %v1549_v0, %v2600_v3 }
 0xff6   :  { %v1567_v35 = vsub.f32 %v1540_v29, %v1557_v21  ;;  %v1568_v36 = vsub.f32 %v1541_v30, %v1564_v34  ;;  %v1764_v30 = vcombine.high %v1924_v25, %v1924_v25 }
 0xff8   :  { %v1569_v37 = vmul.f32 %v1567_v35, %v1567_v35  ;;  %v1570_v38 = vmul.f32 %v1568_v36, %v1568_v36 }
 0xffa   :  { %v1573_v12 = vcombine.low %v1569_v37, %v1570_v38 }
 0xffc   :  { %v1575_v39 = vsel %vm130_vm1, %v1573_v12, 0.0 }
 0xffd   :  { %1576 = vadd.xlane.f32.xlu0 %v1575_v39 }
0x1086   :  { %v1577_v44 = vpop.xlane.xlu0 %1576 }
0x1087   :  { %v1578_v45 = vmul.f32 0.03125, %v1577_v44 }
0x1089   :  { %v1579_v46 = vadd.f32 1e-05, %v1578_v45 }
0x108b   :  { %2230 = vrsqrt.f32 %v1579_v46 }
0x1098   :  { %v2231_v48 = vpop.eup %2230 }
0x1099   :  { %v1588_v50 = vrot.slane %v2231_v48, %v2597_v19  ;;  %v1595_v53 = vrot.slane %v2231_v48, %v2600_v3 }
0x109b   :  { %v1598_v54 = vmul.f32 %v1588_v50, %v1567_v35  ;;  %v1599_v56 = vmul.f32 %v1595_v53, %v1568_v36 }
0x109d   :  { %v1608_v57 = vmul.f32 %v1918_v15, %v1598_v54  ;;  %v1609_v59 = vmul.f32 %v1606_v51, %v1599_v56 }
0x109f   :  { %v1618_v60 = vadd.f32 %v1919_v49, %v1608_v57  ;;  %v1619_v61 = vadd.f32 %v1616_v55, %v1609_v59 }
0x10a1   :  { %v1696_v62 = vadd.f32 %v1688_v52, %v1618_v60  ;;  %v1697_v63 = vadd.f32 %v1694_v58, %v1619_v61 }
0x10a3   :  { %v1702_v2 = vcombine.low %v1696_v62, %v1697_v63 }
0x10a5   :  { %v1704_v5 = vsel %vm130_vm1, %v1702_v2, 0.0 }
0x10a6   :  { %1705 = vadd.xlane.f32.xlu1 %v1704_v5 }
0x112f   :  { %v1706_v6 = vpop.xlane.xlu1 %1705 }
0x1130   :  { %v1707_v7 = vmul.f32 0.03125, %v1706_v6 }
0x1132   :  { %v1715_v8 = vrot.slane %v1707_v7, %v2597_v19  ;;  %v1722_v9 = vrot.slane %v1707_v7, %v2600_v3 }
0x1134   :  { %v1725_v10 = vsub.f32 %v1696_v62, %v1715_v8  ;;  %v1726_v11 = vsub.f32 %v1697_v63, %v1722_v9 }
0x1136   :  { %v1727_v13 = vmul.f32 %v1725_v10, %v1725_v10  ;;  %v1728_v14 = vmul.f32 %v1726_v11, %v1726_v11 }
0x1138   :  { %v1731_v16 = vcombine.low %v1727_v13, %v1728_v14 }
0x113a   :  { %v1733_v18 = vsel %vm130_vm1, %v1731_v16, 0.0 }
0x113b   :  { %1734 = vadd.xlane.f32.xlu0 %v1733_v18 }
0x11c4   :  { %v1735_v22 = vpop.xlane.xlu0 %1734 }
0x11c5   :  { %v1736_v23 = vmul.f32 0.03125, %v1735_v22 }
0x11c7   :  { %v1737_v24 = vadd.f32 1e-05, %v1736_v23 }
0x11c9   :  { %2232 = vrsqrt.f32 %v1737_v24 }
0x11d6   :  { %v2233_v26 = vpop.eup %2232 }
0x11d7   :  { %v1746_v28 = vrot.slane %v2233_v26, %v2597_v19  ;;  %v1753_v29 = vrot.slane %v2233_v26, %v2600_v3 }
0x11d9   :  { %v1756_v1 = vmul.f32 %v1746_v28, %v1725_v10  ;;  %v1757_v17 = vmul.f32 %v1753_v29, %v1726_v11 }
0x11db   :  { %v1766_v32 = vmul.f32 %v1924_v25, %v1756_v1  ;;  %v1767_v33 = vmul.f32 %v1764_v30, %v1757_v17 }
0x11dd   :  { %v1776_v0 = vadd.f32 %v1925_v27, %v1766_v32  ;;  %v1777_v21 = vadd.f32 %v1774_v31, %v1767_v33 }
0x11df   :  { %v1783_v34 = vcombine.low %v1776_v0, %v1777_v21  ;;  %1779 = vst.msk [vmem:[#allocation2] sm:$0xf] %vm1778_vm8, %v1776_v0  ;;  %1780 = vst.msk [vmem:[#allocation2 + $0x4] sm:$0xf] %vm1778_vm8, %v1777_v21 }
0x11e1   :  { %v1785_v35 = vpack.c.bf16 %v1783_v34, %v1783_v34 }
0x11e3   :  { %2157 = vmatmul.mubr.msk.bf16.vlgmr.msra.gmra.mxu1 %vm130_vm1, %v1785_v35 }
0x11e4   :  { %2245 = shalt.err (!%p2242_p4)
}
0x11e5   :  { %s2273_s6 = smov 4   ;;  %v1926_v19 = vld [vmem:[%s2750_s19] ss:$0 sm:$0xff]  ;;  %vm1855_vm9 = vcmask 11264  }
0x11e6   :  { %1869 = dma.vmem_to_hbm [thread:$0]  %s1864_s17, 128, %s2751_s20, [#allocation3], %s2259_s24, %s2259_s24, %s2273_s6  }
0x12a3   :  { %v1846_v3 = vpop.f32.mrf.mxu1 }
0x12a4   :  { %v1847_v36 = vadd.f32 %v1926_v19, %v1846_v3 }
0x12a5   :  { %v2158_v37 = vpop.f32.mrf.mxu1 }
0x12a6   :  { %v1853_v38 = vcombine.high %v1847_v36, %v1847_v36  ;;  %1856 = vst.msk [vmem:[%s2752_s21] sm:$0xf] %vm1855_vm9, %v1847_v36 }
0x12a7   :  { %v1849_v12 = vpop.f32.mrf.mxu1 }
0x12a8   :  { %1857 = vst.msk [vmem:[%s2752_s21 + $0x4] sm:$0xf] %vm1855_vm9, %v1853_v38 }
0x12a9   :  { %v2159_v39 = vpop.f32.mrf.mxu1 }
0x12aa   :  { %2254 = dma.done.wait [#allocation3], 128  }
0x12ab   :  { %2255 = vsyncadd [#allocation3], 4294967168 }
0x12ac   :  { %1877 = vsyncpa [#allocation3], 1 }

// kernel: encoder_forward.2
= control target key start
LH: loop header
LB: loop body
LE: loop exit
PB: predicated region body
PF: predicated region fallthrough
CT: control target
= control target key end

     0   :  { %s6518_s25 = smov 0   ;;  %s7524_s0 = inlined_call_operand.vmem [shape: f32[8,8,32], index: 0, kind: input, shape index: {}]   ;;  %s7525_s1 = inlined_call_operand.vmem [shape: bf16[32,96], index: 1, kind: input, shape index: {}]   ;;  %s7526_s2 = inlined_call_operand.vmem [shape: f32[1,96], index: 2, kind: input, shape index: {}]   ;;  %s7527_s3 = inlined_call_operand.vmem [shape: bf16[32,32], index: 3, kind: input, shape index: {}]   ;;  %s7528_s4 = inlined_call_operand.vmem [shape: f32[1,32], index: 4, kind: input, shape index: {}, may-alias: {4,6,10,12}]   ;;  %s7529_s5 = inlined_call_operand.vmem [shape: f32[1,32], index: 5, kind: input, shape index: {}, may-alias: {5,11}]   ;;  %s7530_s6 = inlined_call_operand.vmem [shape: f32[1,32], index: 6, kind: input, shape index: {}, may-alias: {4,6,10,12}]   ;;  %s7531_s7 = inlined_call_operand.vmem [shape: bf16[32,128], index: 7, kind: input, shape index: {}]   ;;  %s7532_s8 = inlined_call_operand.vmem [shape: f32[1,128], index: 8, kind: input, shape index: {}]   ;;  %s7533_s9 = inlined_call_operand.vmem [shape: bf16[128,32], index: 9, kind: input, shape index: {}]   ;;  %s7534_s10 = inlined_call_operand.vmem [shape: f32[1,32], index: 10, kind: input, shape index: {}, may-alias: {4,6,10,12}]   ;;  %s7535_s11 = inlined_call_operand.vmem [shape: f32[1,32], index: 11, kind: input, shape index: {}, may-alias: {5,11}]   ;;  %s7536_s12 = inlined_call_operand.vmem [shape: f32[1,32], index: 12, kind: input, shape index: {}, may-alias: {4,6,10,12}]   ;;  %s7537_s13 = inlined_call_operand.vmem [shape: f32[8,8,32], index: 13, kind: output, shape index: {}]  }
   0x1 LB: > { %s5371_s26 = sadd.s32 4294967295, %s6433_s25   ;;  %p5375_p0 = scmp.ge.s32.totalorder %s6433_s25, 1  ;;  %s6433_s25 = sphi %s6518_s25, %s23_s25  }
   0x2   : > { %p388_p1 = scmp.lt.s32.totalorder %s6433_s25, 3 }
   0x4   : > { %p389_p2 = pnand %p5375_p0, %p388_p1 }
   0x5   : > { %s5376_s29 = sshll.u32 (!%p389_p2), %s5371_s26, 2  ;;  %s6437_s21 = smov (!%p389_p2), 96  }
   0x6   : > { %392 = sbr.rel (%p389_p2) target bundleno = 8675 (0x21e3), region = 72  ;;  %p433_p3 = scmp.lt.s32.totalorder (!%p389_p2), %s5376_s29, 7 }
   0x7   : > { %s6438_s22 = smov (!%p389_p2), 64   ;;  %s6439_s23 = smov (!%p389_p2), 88  }
   0x8   : > { %s6440_s24 = smov (!%p389_p2), 120   ;;  %s6441_s26 = smov (!%p389_p2), 56  }
   0x9   : > { %s6442_s27 = smov (!%p389_p2), 80   ;;  %s6443_s28 = smov (!%p389_p2), 112  }
   0xa   : > { %s7545_s19 = smov (!%p389_p2), 48   ;;  %s7543_s20 = smov (!%p389_p2), 72  }
   0xb   : > { %v6211_v0 = vld [vmem:[%s7525_s1 + $0x8] sm:$0xff]   ;;  %v6212_v1 = vld [vmem:[%s7525_s1] sm:$0xff]   ;;  %s7553_s29 = smov (!%p433_p3, %s5376_s29), 7  ;;  %vm505_vm0 = vcmask 261120   ;;  %v6435_v8 = vmov 0.0   ;;  %vm6436_vm1 = vmmov 0  }
   0xc   : > { %5678 = vmatprep.subr.bf16.mxu1 %v6211_v0  ;;  %s7538_s15 = sshll.u32 %s7553_s29, 3  ;;  %5704 = vmatprep.subr.bf16.mxu0 %v6435_v8  ;;  %v5380_v9 = vld [vmem:[%s7526_s2] ss:$0 sm:$0xff]  ;;  %vm568_vm2 = vcmask 64512   ;;  %vm819_vm3 = vcmask 1043456   ;;  %s7541_s30 = smov 104  }
   0xd   : > { %5679 = vmatpush3.bf16.msra.mxu1 %v6211_v0  ;;  %s6540_s18 = scalar_lea.vmem %s7524_s0, %s7538_s15  ;;  %5706 = vmatprep.mubr.msk.bf16.mxu0 %vm6436_vm1, %v6435_v8  ;;  %s7539_s17 = smov 40  }
   0xe   : > { %5680 = vmatprep.subr.bf16.mxu1 %v6212_v1  ;;  %v481_v2 = vld [vmem:[%s6540_s18] sm:$0xff]  ;;  %v482_v3 = vld [vmem:[%s6540_s18 + $0x8] sm:$0xff]  ;;  %v483_v4 = vld [vmem:[%s6540_s18 + $0x10] sm:$0xff] }
   0xf   : > { %v485_v5 = vpack.c.bf16 %v482_v3, %v481_v2  ;;  %v484_v6 = vld [vmem:[%s6540_s18 + $0x18] sm:$0xff] }
  0x10   : > { %v486_v7 = vpack.c.bf16 %v484_v6, %v483_v4 }
  0x11   : > { %5681 = vmatpush3.bf16.msra.mxu1 %v6212_v1  ;;  %5682 = vmatprep.mubr.msk.bf16.mxu1 %vm505_vm0, %v485_v5 }
  0x12   : > { %5686 = vmatprep.subr.bf16.mxu1 %v6435_v8 }
  0x14   : > { %5683 = vmatmul.mubr.msk.bf16.vlgmr.msra.gmra.mxu1 %vm505_vm0, %v486_v7 }
  0x15   : > { %5688 = vmatprep.mubr.msk.bf16.mxu1 %vm6436_vm1, %v6435_v8 }
  0xd4   : > { %v5684_v10 = vpop.f32.mrf.mxu1 }
  0xd5   : > { %v555_v11 = vadd.f32 %v5684_v10, %v5380_v9 }
  0xd6   : > { %v546_v12 = vpop.f32.mrf.mxu1 }
  0xd7   : > { %v6557_v13 = vpack.c.bf16 %v555_v11, %v555_v11  ;;  %v547_v14 = vadd.f32 %v5380_v9, %v546_v12 }
  0xd8   : > { %v5685_v15 = vpop.f32.mrf.mxu1 }
  0xd9   : > { %v6559_v16 = vpack.c.bf16 %v547_v14, %v547_v14  ;;  %v558_v17 = vadd.f32 %v5685_v15, %v5380_v9  ;;  %665 = vrot.lane.b32.xlu1 %v6557_v13, %s6437_s21 }
  0xda   : > { %v549_v18 = vpop.f32.mrf.mxu1 }
  0xdb   : > { %v6563_v19 = vpack.c.bf16 %v558_v17, %v558_v17  ;;  %v550_v20 = vadd.f32 %v5380_v9, %v549_v18  ;;  %566 = vrot.lane.b32.xlu0 %v6559_v16, %s6437_s21 }
  0xdd   : > { %v6567_v21 = vpack.c.bf16 %v550_v20, %v550_v20  ;;  %714 = vrot.lane.b32.xlu1 %v6563_v19, %s6437_s21 }
  0xdf   : > { %616 = vrot.lane.b32.xlu0 %v6567_v21, %s6437_s21 }
 0x14b   : > { %v666_v22 = vpop.permute.xlu1 %665 }
 0x14c   : > { %v671_v29 = vsel %vm568_vm2, %v666_v22, 0 }
 0x14d   : > { %v567_v23 = vpop.permute.xlu0 %566 }
 0x14e   : > { %v573_v24 = vsel %vm568_vm2, %v567_v23, 0 }
 0x14f   : > { %v715_v25 = vpop.permute.xlu1 %714  ;;  %5687 = vmatpush3.bf16.xpose.msra.mxu1 %v573_v24 }
 0x150   : > { %v720_v26 = vsel %vm568_vm2, %v715_v25, 0  ;;  %5692 = vmatprep.subr.bf16.mxu1 %v6435_v8 }
 0x151   : > { %5705 = vmatpush3.bf16.xpose.msra.mxu0 %v720_v26  ;;  %v617_v27 = vpop.permute.xlu0 %616 }
 0x152   : > { %5716 = vmatprep.subr.bf16.mxu0 %v6435_v8  ;;  %v622_v28 = vsel %vm568_vm2, %v617_v27, 0 }
 0x156   : > { %5689 = vmatmul.mubr.msk.bf16.vlgmr.msra.gmra.mxu1 %vm568_vm2, %v6559_v16 }
 0x157   : > { %5693 = vmatpush3.bf16.xpose.msra.mxu1 %v622_v28  ;;  %5694 = vmatprep.mubr.msk.bf16.mxu1 %vm6436_vm1, %v6435_v8 }
 0x158   : > { %5707 = vmatmul.mubr.msk.bf16.vlgmr.msra.gmra.mxu0 %vm568_vm2, %v6563_v19  ;;  %5698 = vmatprep.subr.bf16.mxu1 %v6435_v8 }
 0x159   : > { %5718 = vmatprep.mubr.msk.bf16.mxu0 %vm6436_vm1, %v6435_v8 }
 0x15e   : > { %5695 = vmatmul.mubr.msk.bf16.vlgmr.msra.gmra.mxu1 %vm568_vm2, %v6567_v21 }
 0x15f   : > { %5699 = vmatpush3.bf16.xpose.msra.mxu1 %v671_v29  ;;  %5700 = vmatprep.mubr.msk.bf16.mxu1 %vm6436_vm1, %v6435_v8 }
 0x160   : > { %5710 = vmatprep.subr.bf16.mxu1 %v6435_v8 }
 0x166   : > { %5701 = vmatmul.mubr.msk.bf16.vlgmr.msra.gmra.mxu1 %vm568_vm2, %v6557_v13 }
 0x167   : > { %5712 = vmatprep.mubr.msk.bf16.mxu1 %vm6436_vm1, %v6435_v8 }
 0x216   : > { %v609_v30 = vpop.f32.mrf.mxu1 }
 0x217   : > { %v762_v31 = vmul.f32 0.35355338, %v609_v30 }
 0x218   : > { %v5690_v32 = vpop.f32.mrf.mxu1  ;;  %v756_v33 = vpop.f32.mrf.mxu0 }
 0x219   : > { %v766_v34 = vsel %vm568_vm2, %v762_v31, -inf  ;;  %v765_v49 = vmul.f32 0.35355338, %v756_v33 }
 0x21a   : > { %v5708_v35 = vpop.f32.mrf.mxu0  ;;  %767 = vmax.xlane.f32.xlu0 %v766_v34  ;;  %v612_v36 = vpop.f32.mrf.mxu1 }
 0x21b   : > { %v775_v53 = vsel %vm568_vm2, %v765_v49, -inf }
 0x21c   : > { %v5691_v37 = vpop.f32.mrf.mxu1  ;;  %v759_v38 = vpop.f32.mrf.mxu0 }
 0x21e   : > { %v658_v39 = vpop.f32.mrf.mxu1  ;;  %v5709_v40 = vpop.f32.mrf.mxu0 }
 0x21f   : > { %v763_v41 = vmul.f32 0.35355338, %v658_v39 }
 0x220   : > { %v5696_v42 = vpop.f32.mrf.mxu1 }
 0x221   : > { %v769_v43 = vsel %vm568_vm2, %v763_v41, -inf }
 0x222   : > { %770 = vmax.xlane.f32.xlu1 %v769_v43  ;;  %v661_v44 = vpop.f32.mrf.mxu1 }
 0x224   : > { %v5697_v45 = vpop.f32.mrf.mxu1 }
 0x226   : > { %v707_v46 = vpop.f32.mrf.mxu1 }
 0x227   : > { %v764_v47 = vmul.f32 0.35355338, %v707_v46 }
 0x228   : > { %v5702_v48 = vpop.f32.mrf.mxu1 }
 0x229   : > { %v772_v50 = vsel %vm568_vm2, %v764_v47, -inf }
 0x22a   : > { %773 = vmax.xlane.f32.xlu0 %v772_v50  ;;  %v710_v51 = vpop.f32.mrf.mxu1 }
 0x22c   : > { %v5703_v52 = vpop.f32.mrf.mxu1 }
 0x22e   : > { %776 = vmax.xlane.f32.xlu0 %v775_v53 }
 0x233   : > { %814 = vrot.lane.b32.xlu1 %v6559_v16, %s6438_s22 }
 0x2a3   : > { %v768_v54 = vpop.xlane.xlu0 %767 }
 0x2a4   : > { %v778_v55 = vsub.f32 %v762_v31, %v768_v54 }
 0x2a6   : > { %v782_v56 = vmul.f32 1.442695, %v778_v55 }
 0x2a8   : > { %6223 = vpow2.f32 %v782_v56 }
 0x2ab   : > { %v771_v57 = vpop.xlane.xlu1 %770 }
 0x2ac   : > { %v779_v62 = vsub.f32 %v763_v41, %v771_v57 }
 0x2ae   : > { %v784_v2 = vmul.f32 1.442695, %v779_v62 }
 0x2af   : > { %v815_v58 = vpop.permute.xlu1 %814 }
 0x2b0   : > { %v821_v59 = vsel %vm819_vm3, %v815_v58, 0 }
 0x2b1   : > { %5711 = vmatpush3.bf16.msra.mxu1 %v821_v59 }
 0x2b2   : > { %5722 = vmatprep.subr.bf16.mxu1 %v6435_v8 }
 0x2b3   : > { %v774_v60 = vpop.xlane.xlu0 %773 }
 0x2b4   : > { %v780_v9 = vsub.f32 %v764_v47, %v774_v60 }
 0x2b5   : > { %v6224_v61 = vpop.eup %6223 }
 0x2b6   : > { %v790_v63 = vsel %vm568_vm2, %v6224_v61, 0.0  ;;  %v786_v10 = vmul.f32 1.442695, %v780_v9 }
 0x2b7   : > { %791 = vadd.xlane.f32.xlu1 %v790_v63  ;;  %v777_v0 = vpop.xlane.xlu0 %776 }
 0x2b8   : > { %v781_v1 = vsub.f32 %v765_v49, %v777_v0 }
 0x2ba   : > { %v788_v3 = vmul.f32 1.442695, %v781_v1 }
 0x2bc   : > { %6225 = vpow2.f32 %v788_v3 }
 0x2bd   : > { %6227 = vpow2.f32 %v784_v2 }
 0x2be   : > { %6229 = vpow2.f32 %v786_v10 }
 0x2c8   : > { %911 = vrot.lane.b32.xlu1 %v6557_v13, %s6438_s22 }
 0x2c9   : > { %v6226_v4 = vpop.eup %6225 }
 0x2ca   : > { %v799_v5 = vsel %vm568_vm2, %v6226_v4, 0.0  ;;  %v6228_v6 = vpop.eup %6227 }
 0x2cb   : > { %800 = vadd.xlane.f32.xlu0 %v799_v5  ;;  %v793_v7 = vsel %vm568_vm2, %v6228_v6, 0.0  ;;  %v6230_v11 = vpop.eup %6229 }
 0x2cc   : > { %959 = vrot.lane.b32.xlu1 %v6563_v19, %s6438_s22  ;;  %v796_v12 = vsel %vm568_vm2, %v6230_v11, 0.0 }
 0x2cf   : > { %794 = vadd.xlane.f32.xlu0 %v793_v7 }
 0x2d0   : > { %1061 = vrot.lane.b32.xlu1 %v6567_v21, %s6439_s23 }
 0x2e5   : > { %863 = vrot.lane.b32.xlu0 %v6567_v21, %s6438_s22 }
 0x2e9   : > { %1011 = vrot.lane.b32.xlu0 %v6559_v16, %s6439_s23 }
 0x2ed   : > { %1009 = vrot.lane.b32.xlu0 %v6559_v16, %s6440_s24 }
 0x2f1   : > { %1111 = vrot.lane.b32.xlu0 %v6557_v13, %s6439_s23 }
 0x2f4   : > { %797 = vadd.xlane.f32.xlu1 %v796_v12 }
 0x2f5   : > { %1109 = vrot.lane.b32.xlu0 %v6557_v13, %s6440_s24 }
 0x305   : > { %1059 = vrot.lane.b32.xlu1 %v6567_v21, %s6440_s24 }
 0x309   : > { %1161 = vrot.lane.b32.xlu1 %v6563_v19, %s6439_s23 }
 0x30d   : > { %1159 = vrot.lane.b32.xlu1 %v6563_v19, %s6440_s24 }
 0x340   : > { %v792_v14 = vpop.xlane.xlu1 %791 }
 0x341   : > { %6231 = vrcp.f32 %v792_v14 }
 0x344   : > { %v912_v18 = vpop.permute.xlu1 %911 }
 0x345   : > { %v917_v22 = vsel %vm819_vm3, %v912_v18, 0 }
 0x348   : > { %v960_v29 = vpop.permute.xlu1 %959 }
 0x349   : > { %v965_v32 = vsel %vm819_vm3, %v960_v29, 0 }
 0x34c   : > { %v1062_v34 = vpop.permute.xlu1 %1061 }
 0x34d   : > { %v1067_v36 = vsel %vm568_vm2, %v1062_v34, 0 }
 0x34e   : > { %v6232_v15 = vpop.eup %6231 }
 0x34f   : > { %v806_v17 = vmul.f32 %v6232_v15, %v6224_v61 }
 0x351   : > { %v810_v20 = vpack.c.bf16 %v806_v17, %v806_v17 }
 0x353   : > { %5713 = vmatmul.mubr.msk.bf16.vlgmr.msra.gmra.mxu1 %vm568_vm2, %v810_v20 }
 0x354   : > { %5723 = vmatpush3.bf16.msra.mxu1 %v917_v22  ;;  %v801_v23 = vpop.xlane.xlu0 %800  ;;  %5724 = vmatprep.mubr.msk.bf16.mxu1 %vm6436_vm1, %v6435_v8 }
 0x355   : > { %5734 = vmatprep.subr.bf16.mxu1 %v6435_v8 }
 0x358   : > { %v795_v24 = vpop.xlane.xlu0 %794 }
 0x359   : > { %6233 = vrcp.f32 %v795_v24 }
 0x35a   : > { %6235 = vrcp.f32 %v801_v23 }
 0x35c   : > { %v864_v25 = vpop.permute.xlu0 %863 }
 0x35d   : > { %v869_v26 = vsel %vm819_vm3, %v864_v25, 0 }
 0x35e   : > { %5717 = vmatpush3.bf16.msra.mxu0 %v869_v26 }
 0x35f   : > { %5728 = vmatprep.subr.bf16.mxu0 %v6435_v8 }
 0x360   : > { %v1012_v41 = vpop.permute.xlu0 %1011 }
 0x361   : > { %v1017_v47 = vsel %vm568_vm2, %v1012_v41, 0 }
 0x364   : > { %v1010_v46 = vpop.permute.xlu0 %1009 }
 0x366   : > { %v6234_v27 = vpop.eup %6233 }
 0x367   : > { %v807_v28 = vmul.f32 %v6234_v27, %v6228_v6  ;;  %v6236_v31 = vpop.eup %6235 }
 0x368   : > { %v809_v33 = vmul.f32 %v6236_v31, %v6226_v4  ;;  %v1112_v48 = vpop.permute.xlu0 %1111 }
 0x369   : > { %v811_v30 = vpack.c.bf16 %v807_v28, %v807_v28  ;;  %v1117_v49 = vsel %vm568_vm2, %v1112_v48, 0 }
 0x36a   : > { %v813_v35 = vpack.c.bf16 %v809_v33, %v809_v33 }
 0x36b   : > { %5719 = vmatmul.mubr.msk.bf16.vlgmr.msra.gmra.mxu0 %vm568_vm2, %v811_v30 }
 0x36c   : > { %5729 = vmatpush3.bf16.msra.mxu0 %v965_v32  ;;  %5730 = vmatprep.mubr.msk.bf16.mxu0 %vm6436_vm1, %v6435_v8  ;;  %v1110_v50 = vpop.permute.xlu0 %1109 }
 0x36d   : > { %5740 = vmatprep.subr.bf16.mxu0 %v6435_v8 }
 0x373   : > { %5731 = vmatmul.mubr.msk.bf16.vlgmr.msra.gmra.mxu0 %vm568_vm2, %v813_v35 }
 0x374   : > { %5741 = vmatpush3.bf16.xpose.msra.mxu0 %v1067_v36  ;;  %5742 = vmatprep.mubr.msk.bf16.mxu0 %vm6436_vm1, %v6435_v8 }
 0x375   : > { %5752 = vmatprep.subr.bf16.mxu0 %v6435_v8 }
 0x37d   : > { %v798_v37 = vpop.xlane.xlu1 %797 }
 0x37e   : > { %6237 = vrcp.f32 %v798_v37 }
 0x381   : > { %v1060_v38 = vpop.permute.xlu1 %1059 }
 0x382   : > { %5743 = vmatmul.mubr.msk.bf16.vlgmr.msra.gmra.mxu0 %vm568_vm2, %v1060_v38 }
 0x383   : > { %5754 = vmatprep.mubr.msk.bf16.mxu0 %vm6436_vm1, %v6435_v8 }
 0x385   : > { %v1162_v39 = vpop.permute.xlu1 %1161 }
 0x386   : > { %v1167_v40 = vsel %vm568_vm2, %v1162_v39, 0 }
 0x387   : > { %5753 = vmatpush3.bf16.xpose.msra.mxu0 %v1167_v40 }
 0x388   : > { %5764 = vmatprep.subr.bf16.mxu0 %v6435_v8 }
 0x389   : > { %v1160_v44 = vpop.permute.xlu1 %1159 }
 0x38b   : > { %v6238_v42 = vpop.eup %6237 }
 0x38c   : > { %v808_v43 = vmul.f32 %v6238_v42, %v6230_v11 }
 0x38e   : > { %5755 = vmatmul.mubr.msk.bf16.vlgmr.msra.gmra.mxu0 %vm568_vm2, %v1160_v44  ;;  %v812_v45 = vpack.c.bf16 %v808_v43, %v808_v43 }
 0x38f   : > { %5766 = vmatprep.mubr.msk.bf16.mxu0 %vm6436_vm1, %v6435_v8 }
 0x390   : > { %5725 = vmatmul.mubr.msk.bf16.vlgmr.msra.gmra.mxu1 %vm568_vm2, %v812_v45 }
 0x391   : > { %5735 = vmatpush3.bf16.xpose.msra.mxu1 %v1017_v47  ;;  %5736 = vmatprep.mubr.msk.bf16.mxu1 %vm6436_vm1, %v6435_v8 }
 0x392   : > { %5746 = vmatprep.subr.bf16.mxu1 %v6435_v8 }
 0x398   : > { %5737 = vmatmul.mubr.msk.bf16.vlgmr.msra.gmra.mxu1 %vm568_vm2, %v1010_v46 }
 0x399   : > { %5747 = vmatpush3.bf16.xpose.msra.mxu1 %v1117_v49  ;;  %5748 = vmatprep.mubr.msk.bf16.mxu1 %vm6436_vm1, %v6435_v8 }
 0x39a   : > { %5758 = vmatprep.subr.bf16.mxu1 %v6435_v8 }
 0x3a0   : > { %5749 = vmatmul.mubr.msk.bf16.vlgmr.msra.gmra.mxu1 %vm568_vm2, %v1110_v50 }
 0x3a1   : > { %5760 = vmatprep.mubr.msk.bf16.mxu1 %vm6436_vm1, %v6435_v8 }
 0x413   : > { %v6669_v51 = vpop.f32.mrf.mxu1 }
 0x415   : > { %v5714_v52 = vpop.f32.mrf.mxu1 }
 0x417   : > { %v860_v53 = vpop.f32.mrf.mxu1 }
 0x419   : > { %v5715_v54 = vpop.f32.mrf.mxu1 }
 0x42b   : > { %v6671_v55 = vpop.f32.mrf.mxu0 }
 0x42c   : > { %v1007_v56 = vpack.c.bf16 %v6671_v55, %v6669_v51 }
 0x42d   : > { %v5720_v57 = vpop.f32.mrf.mxu0 }
 0x42f   : > { %v908_v58 = vpop.f32.mrf.mxu0 }
 0x431   : > { %v5721_v59 = vpop.f32.mrf.mxu0 }
 0x433   : > { %v6675_v60 = vpop.f32.mrf.mxu0 }
 0x435   : > { %v5732_v61 = vpop.f32.mrf.mxu0 }
 0x437   : > { %v1004_v62 = vpop.f32.mrf.mxu0 }
 0x439   : > { %v5733_v63 = vpop.f32.mrf.mxu0 }
 0x442   : > { %v1103_v0 = vpop.f32.mrf.mxu0 }
 0x443   : > { %v1210_v1 = vmul.f32 0.35355338, %v1103_v0 }
 0x444   : > { %v5744_v2 = vpop.f32.mrf.mxu0 }
 0x445   : > { %v1216_v3 = vsel %vm568_vm2, %v1210_v1, -inf }
 0x446   : > { %1217 = vmax.xlane.f32.xlu1 %v1216_v3  ;;  %v1106_v4 = vpop.f32.mrf.mxu0 }
 0x448   : > { %v5745_v5 = vpop.f32.mrf.mxu0 }
 0x44e   : > { %v1203_v6 = vpop.f32.mrf.mxu0 }
 0x44f   : > { %v1212_v29 = vmul.f32 0.35355338, %v1203_v6 }
 0x450   : > { %v6678_v7 = vpop.f32.mrf.mxu1  ;;  %v5756_v9 = vpop.f32.mrf.mxu0 }
 0x451   : > { %v1008_v10 = vpack.c.bf16 %v6675_v60, %v6678_v7  ;;  %v1222_v33 = vsel %vm568_vm2, %v1212_v29, -inf  ;;  %v451_v60 = vld [vmem:[%s7527_s3 + $0x4] sm:$0xf] }
 0x452   : > { %v5726_v11 = vpop.f32.mrf.mxu1  ;;  %v1206_v12 = vpop.f32.mrf.mxu0  ;;  %v6761_v7 = vsel %vm819_vm3, %v451_v60, 0 }
 0x454   : > { %v956_v14 = vpop.f32.mrf.mxu1  ;;  %v5757_v15 = vpop.f32.mrf.mxu0 }
 0x455   : > { %v450_v15 = vld [vmem:[%s7527_s3] sm:$0xf] }
 0x456   : > { %v5727_v17 = vpop.f32.mrf.mxu1 }
 0x457   : > { %1261 = vrot.lane.b32.xlu1 %v6559_v16, %s6441_s26 }
 0x458   : > { %v1053_v18 = vpop.f32.mrf.mxu1 }
 0x459   : > { %v1209_v20 = vmul.f32 0.35355338, %v1053_v18 }
 0x45a   : > { %v5738_v22 = vpop.f32.mrf.mxu1 }
 0x45b   : > { %v1213_v23 = vsel %vm568_vm2, %v1209_v20, -inf }
 0x45c   : > { %1214 = vmax.xlane.f32.xlu0 %v1213_v23  ;;  %v1056_v24 = vpop.f32.mrf.mxu1 }
 0x45e   : > { %v5739_v25 = vpop.f32.mrf.mxu1 }
 0x460   : > { %v1153_v26 = vpop.f32.mrf.mxu1 }
 0x461   : > { %v1211_v27 = vmul.f32 0.35355338, %v1153_v26  ;;  %v6731_v26 = vsel %vm819_vm3, %v450_v15, 0 }
 0x462   : > { %v5750_v28 = vpop.f32.mrf.mxu1 }
 0x463   : > { %v1219_v30 = vsel %vm568_vm2, %v1211_v27, -inf }
 0x464   : > { %1220 = vmax.xlane.f32.xlu0 %v1219_v30  ;;  %v1156_v31 = vpop.f32.mrf.mxu1 }
 0x466   : > { %v5751_v32 = vpop.f32.mrf.mxu1 }
 0x468   : > { %1223 = vmax.xlane.f32.xlu0 %v1222_v33 }
 0x4cf   : > { %v1218_v34 = vpop.xlane.xlu1 %1217 }
 0x4d0   : > { %v1226_v35 = vsub.f32 %v1210_v1, %v1218_v34 }
 0x4d2   : > { %v1231_v36 = vmul.f32 1.442695, %v1226_v35 }
 0x4d3   : > { %v1262_v37 = vpop.permute.xlu1 %1261 }
 0x4d4   : > { %6239 = vpow2.f32 %v1231_v36  ;;  %v1267_v38 = vsel %vm819_vm3, %v1262_v37, 0 }
 0x4d5   : > { %5759 = vmatpush3.bf16.msra.mxu1 %v1267_v38 }
 0x4d6   : > { %5770 = vmatprep.subr.bf16.mxu1 %v6435_v8 }
 0x4e1   : > { %v6240_v39 = vpop.eup %6239 }
 0x4e2   : > { %v1240_v40 = vsel %vm568_vm2, %v6240_v39, 0.0 }
 0x4e3   : > { %1241 = vadd.xlane.f32.xlu0 %v1240_v40 }
 0x4e5   : > { %v1215_v41 = vpop.xlane.xlu0 %1214 }
 0x4e6   : > { %v1225_v42 = vsub.f32 %v1209_v20, %v1215_v41 }
 0x4e8   : > { %v1229_v43 = vmul.f32 1.442695, %v1225_v42 }
 0x4ea   : > { %6241 = vpow2.f32 %v1229_v43 }
 0x4ed   : > { %v1221_v44 = vpop.xlane.xlu0 %1220 }
 0x4ee   : > { %v1227_v45 = vsub.f32 %v1211_v27, %v1221_v44 }
 0x4f0   : > { %v1233_v46 = vmul.f32 1.442695, %v1227_v45 }
 0x4f1   : > { %v1224_v47 = vpop.xlane.xlu0 %1223 }
 0x4f2   : > { %6243 = vpow2.f32 %v1233_v46  ;;  %v1228_v48 = vsub.f32 %v1212_v29, %v1224_v47 }
 0x4f4   : > { %v1235_v49 = vmul.f32 1.442695, %v1228_v48 }
 0x4f6   : > { %6245 = vpow2.f32 %v1235_v49 }
 0x4f7   : > { %v6242_v50 = vpop.eup %6241 }
 0x4f8   : > { %v1237_v52 = vsel %vm568_vm2, %v6242_v50, 0.0 }
 0x4f9   : > { %1238 = vadd.xlane.f32.xlu1 %v1237_v52 }
 0x4ff   : > { %v6244_v53 = vpop.eup %6243 }
 0x500   : > { %v1243_v54 = vsel %vm568_vm2, %v6244_v53, 0.0 }
 0x501   : > { %1244 = vadd.xlane.f32.xlu1 %v1243_v54 }
 0x503   : > { %v6246_v57 = vpop.eup %6245 }
 0x504   : > { %v1246_v58 = vsel %vm568_vm2, %v6246_v57, 0.0 }
 0x505   : > { %1247 = vadd.xlane.f32.xlu0 %v1246_v58 }
 0x512   : > { %1357 = vrot.lane.b32.xlu1 %v6557_v13, %s6441_s26 }
 0x516   : > { %1405 = vrot.lane.b32.xlu1 %v6563_v19, %s6441_s26 }
 0x51a   : > { %1623 = vrot.lane.b32.xlu1 %v6567_v21, %s6442_s27 }
 0x51b   : > { %1309 = vrot.lane.b32.xlu0 %v6567_v21, %s6441_s26 }
 0x51e   : > { %1621 = vrot.lane.b32.xlu1 %v6567_v21, %s6443_s28 }
 0x51f   : > { %1573 = vrot.lane.b32.xlu0 %v6559_v16, %s6442_s27 }
 0x522   : > { %1723 = vrot.lane.b32.xlu1 %v6563_v19, %s6442_s27 }
 0x523   : > { %1571 = vrot.lane.b32.xlu0 %v6559_v16, %s6443_s28 }
 0x526   : > { %1721 = vrot.lane.b32.xlu1 %v6563_v19, %s6443_s28 }
 0x527   : > { %1673 = vrot.lane.b32.xlu0 %v6557_v13, %s6442_s27 }
 0x52b   : > { %1671 = vrot.lane.b32.xlu0 %v6557_v13, %s6443_s28 }
 0x56c   : > { %v1242_v59 = vpop.xlane.xlu0 %1241 }
 0x56d   : > { %6247 = vrcp.f32 %v1242_v59 }
 0x57a   : > { %v6248_v63 = vpop.eup %6247 }
 0x57b   : > { %v1254_v4 = vmul.f32 %v6248_v63, %v6240_v39 }
 0x57d   : > { %v1258_v14 = vpack.c.bf16 %v1254_v4, %v1254_v4 }
 0x582   : > { %v1239_v61 = vpop.xlane.xlu1 %1238 }
 0x583   : > { %6249 = vrcp.f32 %v1239_v61 }
 0x58a   : > { %v1245_v62 = vpop.xlane.xlu1 %1244 }
 0x58b   : > { %6251 = vrcp.f32 %v1245_v62 }
 0x58e   : > { %v1358_v0 = vpop.permute.xlu1 %1357  ;;  %v1248_v1 = vpop.xlane.xlu0 %1247 }
 0x58f   : > { %6253 = vrcp.f32 %v1248_v1  ;;  %v1363_v12 = vsel %vm819_vm3, %v1358_v0, 0 }
 0x590   : > { %v6250_v2 = vpop.eup %6249 }
 0x591   : > { %v1253_v3 = vmul.f32 %v6250_v2, %v6242_v50 }
 0x592   : > { %v1310_v5 = vpop.permute.xlu0 %1309  ;;  %v1406_v11 = vpop.permute.xlu1 %1405 }
 0x593   : > { %v1315_v6 = vsel %vm819_vm3, %v1310_v5, 0  ;;  %v1257_v9 = vpack.c.bf16 %v1253_v3, %v1253_v3  ;;  %v1411_v17 = vsel %vm819_vm3, %v1406_v11, 0 }
 0x594   : > { %5765 = vmatpush3.bf16.msra.mxu0 %v1315_v6 }
 0x595   : > { %5761 = vmatmul.mubr.msk.bf16.vlgmr.msra.gmra.mxu1 %vm568_vm2, %v1257_v9  ;;  %5776 = vmatprep.subr.bf16.mxu0 %v6435_v8 }
 0x596   : > { %5771 = vmatpush3.bf16.msra.mxu1 %v1363_v12  ;;  %5772 = vmatprep.mubr.msk.bf16.mxu1 %vm6436_vm1, %v6435_v8  ;;  %v1624_v27 = vpop.permute.xlu1 %1623  ;;  %v1574_v37 = vpop.permute.xlu0 %1573 }
 0x597   : > { %5767 = vmatmul.mubr.msk.bf16.vlgmr.msra.gmra.mxu0 %vm568_vm2, %v1258_v14  ;;  %v1629_v29 = vsel %vm568_vm2, %v1624_v27, 0  ;;  %6182 = vmatprep.subr.msk.bf16.mxu1 %vm819_vm3, %v451_v60  ;;  %v1579_v47 = vsel %vm568_vm2, %v1574_v37, 0 }
 0x598   : > { %v6252_v18 = vpop.eup %6251  ;;  %5777 = vmatpush3.bf16.msra.mxu0 %v1411_v17  ;;  %5778 = vmatprep.mubr.msk.bf16.mxu0 %vm6436_vm1, %v6435_v8 }
 0x599   : > { %v1255_v20 = vmul.f32 %v6252_v18, %v6244_v53  ;;  %6183 = vmatprep.subr.msk.bf16.mxu0 %vm819_vm3, %v450_v15 }
 0x59a   : > { %v1622_v28 = vpop.permute.xlu1 %1621  ;;  %v1572_v43 = vpop.permute.xlu0 %1571 }
 0x59b   : > { %v1259_v22 = vpack.c.bf16 %v1255_v20, %v1255_v20 }
 0x59c   : > { %v6254_v23 = vpop.eup %6253 }
 0x59d   : > { %5773 = vmatmul.mubr.msk.bf16.vlgmr.msra.gmra.mxu1 %vm568_vm2, %v1259_v22  ;;  %v1256_v24 = vmul.f32 %v6254_v23, %v6246_v57 }
 0x59e   : > { %v1724_v51 = vpop.permute.xlu1 %1723  ;;  %5783 = vmatpush3.bf16.msra.mxu1 %v6761_v7  ;;  %v1674_v50 = vpop.permute.xlu0 %1673 }
 0x59f   : > { %v1260_v25 = vpack.c.bf16 %v1256_v24, %v1256_v24  ;;  %v1729_v55 = vsel %vm568_vm2, %v1724_v51, 0  ;;  %5794 = vmatprep.subr.bf16.mxu1 %v6435_v8  ;;  %v1679_v54 = vsel %vm568_vm2, %v1674_v50, 0 }
 0x5a1   : > { %5779 = vmatmul.mubr.msk.bf16.vlgmr.msra.gmra.mxu0 %vm568_vm2, %v1260_v25 }
 0x5a2   : > { %5790 = vmatprep.mubr.msk.bf16.mxu0 %vm568_vm2, %v1007_v56  ;;  %5789 = vmatpush3.bf16.msra.mxu0 %v6731_v26  ;;  %v1722_v56 = vpop.permute.xlu1 %1721  ;;  %v1672_v62 = vpop.permute.xlu0 %1671 }
 0x5a3   : > { %5800 = vmatprep.subr.bf16.mxu0 %v6435_v8 }
 0x5a9   : > { %5791 = vmatmul.mubr.msk.bf16.vlgmr.msra.gmra.mxu0 %vm568_vm2, %v1008_v10 }
 0x5aa   : > { %5801 = vmatpush3.bf16.xpose.msra.mxu0 %v1629_v29  ;;  %5802 = vmatprep.mubr.msk.bf16.mxu0 %vm6436_vm1, %v6435_v8 }
 0x5ab   : > { %5812 = vmatprep.subr.bf16.mxu0 %v6435_v8 }
 0x5b1   : > { %5803 = vmatmul.mubr.msk.bf16.vlgmr.msra.gmra.mxu0 %vm568_vm2, %v1622_v28 }
 0x5b2   : > { %5813 = vmatpush3.bf16.xpose.msra.mxu0 %v1729_v55  ;;  %5814 = vmatprep.mubr.msk.bf16.mxu0 %vm6436_vm1, %v6435_v8 }
 0x5b3   : > { %5824 = vmatprep.subr.bf16.mxu0 %v6435_v8 }
 0x5b9   : > { %5815 = vmatmul.mubr.msk.bf16.vlgmr.msra.gmra.mxu0 %vm568_vm2, %v1722_v56 }
 0x5ba   : > { %5826 = vmatprep.mubr.msk.bf16.mxu0 %vm6436_vm1, %v6435_v8 }
 0x655   : > { %v1303_v10 = vpop.f32.mrf.mxu1 }
 0x657   : > { %v5762_v30 = vpop.f32.mrf.mxu1  ;;  %v1351_v31 = vpop.f32.mrf.mxu0 }
 0x658   : > { %v1453_v32 = vpack.c.bf16 %v1351_v31, %v1303_v10 }
 0x659   : > { %v1306_v33 = vpop.f32.mrf.mxu1  ;;  %v5768_v34 = vpop.f32.mrf.mxu0 }
 0x65a   : > { %5784 = vmatprep.mubr.msk.bf16.mxu1 %vm568_vm2, %v1453_v32 }
 0x65b   : > { %v5763_v35 = vpop.f32.mrf.mxu1  ;;  %v1354_v36 = vpop.f32.mrf.mxu0 }
 0x65d   : > { %v5769_v38 = vpop.f32.mrf.mxu0  ;;  %v1399_v39 = vpop.f32.mrf.mxu1 }
 0x65f   : > { %v5774_v40 = vpop.f32.mrf.mxu1 }
 0x661   : > { %v1402_v41 = vpop.f32.mrf.mxu1  ;;  %v1447_v42 = vpop.f32.mrf.mxu0 }
 0x662   : > { %v1454_v44 = vpack.c.bf16 %v1447_v42, %v1399_v39 }
 0x663   : > { %v5775_v45 = vpop.f32.mrf.mxu1  ;;  %v5780_v46 = vpop.f32.mrf.mxu0 }
 0x664   : > { %5785 = vmatmul.mubr.msk.bf16.vlgmr.msra.gmra.mxu1 %vm568_vm2, %v1454_v44 }
 0x665   : > { %5795 = vmatpush3.bf16.xpose.msra.mxu1 %v1579_v47  ;;  %v1450_v48 = vpop.f32.mrf.mxu0  ;;  %5796 = vmatprep.mubr.msk.bf16.mxu1 %vm6436_vm1, %v6435_v8 }
 0x666   : > { %5806 = vmatprep.subr.bf16.mxu1 %v6435_v8 }
 0x667   : > { %v5781_v49 = vpop.f32.mrf.mxu0 }
 0x669   : > { %v6771_v52 = vpop.f32.mrf.mxu0 }
 0x66b   : > { %v6773_v53 = vpop.f32.mrf.mxu0 }
 0x66c   : > { %5797 = vmatmul.mubr.msk.bf16.vlgmr.msra.gmra.mxu1 %vm568_vm2, %v1572_v43 }
 0x66d   : > { %5807 = vmatpush3.bf16.xpose.msra.mxu1 %v1679_v54  ;;  %v6777_v57 = vpop.f32.mrf.mxu0  ;;  %5808 = vmatprep.mubr.msk.bf16.mxu1 %vm6436_vm1, %v6435_v8 }
 0x66e   : > { %5818 = vmatprep.subr.bf16.mxu1 %v6435_v8 }
 0x66f   : > { %v6782_v58 = vpop.f32.mrf.mxu0 }
 0x671   : > { %v1665_v59 = vpop.f32.mrf.mxu0 }
 0x672   : > { %v1772_v61 = vmul.f32 0.35355338, %v1665_v59 }
 0x673   : > { %v5804_v63 = vpop.f32.mrf.mxu0 }
 0x674   : > { %5809 = vmatmul.mubr.msk.bf16.vlgmr.msra.gmra.mxu1 %vm568_vm2, %v1672_v62  ;;  %v1778_v0 = vsel %vm568_vm2, %v1772_v61, -inf }
 0x675   : > { %1779 = vmax.xlane.f32.xlu1 %v1778_v0  ;;  %v1668_v1 = vpop.f32.mrf.mxu0  ;;  %5820 = vmatprep.mubr.msk.bf16.mxu1 %vm6436_vm1, %v6435_v8 }
 0x677   : > { %v5805_v2 = vpop.f32.mrf.mxu0 }
 0x679   : > { %v1765_v3 = vpop.f32.mrf.mxu0 }
 0x67a   : > { %v1774_v60 = vmul.f32 0.35355338, %v1765_v3 }
 0x67b   : > { %v5816_v4 = vpop.f32.mrf.mxu0 }
 0x67c   : > { %v1784_v32 = vsel %vm568_vm2, %v1774_v60, -inf }
 0x67d   : > { %v1768_v5 = vpop.f32.mrf.mxu0 }
 0x67f   : > { %v5817_v6 = vpop.f32.mrf.mxu0 }
 0x686   : > { %1823 = vrot.lane.b32.xlu1 %v6559_v16, %s7545_s19 }
 0x68a   : > { %1919 = vrot.lane.b32.xlu1 %v6557_v13, %s7545_s19 }
 0x6fe   : > { %v1780_v9 = vpop.xlane.xlu1 %1779 }
 0x6ff   : > { %v1788_v17 = vsub.f32 %v1772_v61, %v1780_v9 }
 0x701   : > { %v1793_v22 = vmul.f32 1.442695, %v1788_v17 }
 0x702   : > { %v1824_v11 = vpop.permute.xlu1 %1823 }
 0x703   : > { %v1829_v12 = vsel %vm819_vm3, %v1824_v11, 0  ;;  %6255 = vpow2.f32 %v1793_v22 }
 0x704   : > { %5819 = vmatpush3.bf16.msra.mxu1 %v1829_v12 }
 0x705   : > { %5830 = vmatprep.subr.bf16.mxu1 %v6435_v8 }
 0x706   : > { %v1920_v50 = vpop.permute.xlu1 %1919 }
 0x707   : > { %v1925_v9 = vsel %vm819_vm3, %v1920_v50, 0 }
 0x710   : > { %v6256_v33 = vpop.eup %6255 }
 0x711   : > { %v1802_v34 = vsel %vm568_vm2, %v6256_v33, 0.0 }
 0x724   : > { %v6794_v14 = vpop.f32.mrf.mxu1 }
 0x726   : > { %v6796_v15 = vpop.f32.mrf.mxu1 }
 0x728   : > { %v6798_v18 = vpop.f32.mrf.mxu1 }
 0x72a   : > { %v6800_v20 = vpop.f32.mrf.mxu1 }
 0x72c   : > { %v1615_v23 = vpop.f32.mrf.mxu1 }
 0x72d   : > { %v1771_v24 = vmul.f32 0.35355338, %v1615_v23 }
 0x72e   : > { %v5798_v25 = vpop.f32.mrf.mxu1 }
 0x72f   : > { %v1775_v27 = vsel %vm568_vm2, %v1771_v24, -inf }
 0x730   : > { %1776 = vmax.xlane.f32.xlu0 %v1775_v27  ;;  %v1618_v28 = vpop.f32.mrf.mxu1 }
 0x732   : > { %v5799_v29 = vpop.f32.mrf.mxu1 }
 0x734   : > { %v1715_v51 = vpop.f32.mrf.mxu1 }
 0x735   : > { %v1773_v55 = vmul.f32 0.35355338, %v1715_v51 }
 0x736   : > { %v5810_v56 = vpop.f32.mrf.mxu1 }
 0x737   : > { %v1781_v10 = vsel %vm568_vm2, %v1773_v55, -inf }
 0x738   : > { %1782 = vmax.xlane.f32.xlu0 %v1781_v10  ;;  %v1718_v30 = vpop.f32.mrf.mxu1  ;;  %v452_v10 = vld [vmem:[%s7527_s3 + $0x8] sm:$0xf] }
 0x739   : > { %v6859_v30 = vsel %vm819_vm3, %v452_v10, 0 }
 0x73a   : > { %v5811_v31 = vpop.f32.mrf.mxu1 }
 0x73c   : > { %1785 = vmax.xlane.f32.xlu0 %v1784_v32 }
 0x740   : > { %1803 = vadd.xlane.f32.xlu0 %v1802_v34 }
 0x7b9   : > { %v1777_v35 = vpop.xlane.xlu0 %1776 }
 0x7ba   : > { %v1787_v36 = vsub.f32 %v1771_v24, %v1777_v35 }
 0x7bc   : > { %v1791_v37 = vmul.f32 1.442695, %v1787_v36 }
 0x7be   : > { %6257 = vpow2.f32 %v1791_v37 }
 0x7c1   : > { %v1783_v38 = vpop.xlane.xlu0 %1782 }
 0x7c2   : > { %v1789_v39 = vsub.f32 %v1773_v55, %v1783_v38 }
 0x7c4   : > { %v1795_v40 = vmul.f32 1.442695, %v1789_v39 }
 0x7c5   : > { %v1786_v41 = vpop.xlane.xlu0 %1785 }
 0x7c6   : > { %6259 = vpow2.f32 %v1795_v40  ;;  %v1790_v42 = vsub.f32 %v1774_v60, %v1786_v41 }
 0x7c8   : > { %v1797_v43 = vmul.f32 1.442695, %v1790_v42 }
 0x7c9   : > { %v1804_v54 = vpop.xlane.xlu0 %1803 }
 0x7ca   : > { %6261 = vpow2.f32 %v1797_v43 }
 0x7cb   : > { %v6258_v44 = vpop.eup %6257  ;;  %6263 = vrcp.f32 %v1804_v54 }
 0x7cc   : > { %v1799_v45 = vsel %vm568_vm2, %v6258_v44, 0.0 }
 0x7cd   : > { %1800 = vadd.xlane.f32.xlu1 %v1799_v45 }
 0x7d3   : > { %v6260_v46 = vpop.eup %6259 }
 0x7d4   : > { %v1805_v47 = vsel %vm568_vm2, %v6260_v46, 0.0 }
 0x7d5   : > { %1806 = vadd.xlane.f32.xlu1 %v1805_v47 }
 0x7d7   : > { %v6262_v48 = vpop.eup %6261 }
 0x7d8   : > { %v1808_v49 = vsel %vm568_vm2, %v6262_v48, 0.0  ;;  %v6264_v62 = vpop.eup %6263 }
 0x7d9   : > { %1809 = vadd.xlane.f32.xlu0 %v1808_v49  ;;  %v1816_v2 = vmul.f32 %v6264_v62, %v6256_v33 }
 0x7db   : > { %v1820_v11 = vpack.c.bf16 %v1816_v2, %v1816_v2 }
 0x7e6   : > { %1967 = vrot.lane.b32.xlu1 %v6563_v19, %s7545_s19 }
 0x7ea   : > { %2131 = vrot.lane.b32.xlu1 %v6567_v21, %s7543_s20 }
 0x7ee   : > { %2129 = vrot.lane.b32.xlu1 %v6567_v21, %s7541_s30 }
 0x7ef   : > { %1871 = vrot.lane.b32.xlu0 %v6567_v21, %s7545_s19  ;;  %s7550_s19 = smov 40  }
 0x7f2   : > { %2231 = vrot.lane.b32.xlu1 %v6563_v19, %s7543_s20 }
 0x7f3   : > { %2081 = vrot.lane.b32.xlu0 %v6559_v16, %s7543_s20 }
 0x7f6   : > { %2229 = vrot.lane.b32.xlu1 %v6563_v19, %s7541_s30 }
 0x7f7   : > { %2079 = vrot.lane.b32.xlu0 %v6559_v16, %s7541_s30 }
 0x7fb   : > { %2181 = vrot.lane.b32.xlu0 %v6557_v13, %s7543_s20 }
 0x7ff   : > { %2179 = vrot.lane.b32.xlu0 %v6557_v13, %s7541_s30  ;;  %s7551_s30 = sshll.u32 %s7553_s29, 3 }
 0x856   : > { %v1801_v59 = vpop.xlane.xlu1 %1800 }
 0x857   : > { %6265 = vrcp.f32 %v1801_v59 }
 0x85e   : > { %v1807_v61 = vpop.xlane.xlu1 %1806 }
 0x85f   : > { %6267 = vrcp.f32 %v1807_v61 }
 0x862   : > { %v1810_v63 = vpop.xlane.xlu0 %1809  ;;  %v1968_v6 = vpop.permute.xlu1 %1967 }
 0x863   : > { %6269 = vrcp.f32 %v1810_v63  ;;  %v1973_v12 = vsel %vm819_vm3, %v1968_v6, 0 }
 0x864   : > { %v6266_v0 = vpop.eup %6265 }
 0x865   : > { %v1815_v1 = vmul.f32 %v6266_v0, %v6258_v44 }
 0x866   : > { %v1872_v3 = vpop.permute.xlu0 %1871  ;;  %v2132_v39 = vpop.permute.xlu1 %2131 }
 0x867   : > { %v1877_v4 = vsel %vm819_vm3, %v1872_v3, 0  ;;  %v1819_v5 = vpack.c.bf16 %v1815_v1, %v1815_v1  ;;  %v2137_v49 = vsel %vm568_vm2, %v2132_v39, 0 }
 0x868   : > { %5825 = vmatpush3.bf16.msra.mxu0 %v1877_v4 }
 0x869   : > { %5821 = vmatmul.mubr.msk.bf16.vlgmr.msra.gmra.mxu1 %vm568_vm2, %v1819_v5  ;;  %5836 = vmatprep.subr.bf16.mxu0 %v6435_v8 }
 0x86a   : > { %5831 = vmatpush3.bf16.msra.mxu1 %v1925_v9  ;;  %5832 = vmatprep.mubr.msk.bf16.mxu1 %vm6436_vm1, %v6435_v8  ;;  %v2082_v23 = vpop.permute.xlu0 %2081  ;;  %v2130_v45 = vpop.permute.xlu1 %2129 }
 0x86b   : > { %5827 = vmatmul.mubr.msk.bf16.vlgmr.msra.gmra.mxu0 %vm568_vm2, %v1820_v11  ;;  %v2087_v51 = vsel %vm568_vm2, %v2082_v23, 0  ;;  %6184 = vmatprep.subr.msk.bf16.mxu1 %vm819_vm3, %v452_v10  ;;  %v1568_v10 = vadd.f32 %v6777_v57, %v6798_v18 }
 0x86c   : > { %v6268_v17 = vpop.eup %6267  ;;  %5837 = vmatpush3.bf16.msra.mxu0 %v1973_v12  ;;  %5838 = vmatprep.mubr.msk.bf16.mxu0 %vm6436_vm1, %v6435_v8 }
 0x86d   : > { %v1817_v22 = vmul.f32 %v6268_v17, %v6260_v46  ;;  %5848 = vmatprep.subr.bf16.mxu0 %v6435_v8 }
 0x86e   : > { %v2080_v29 = vpop.permute.xlu0 %2079  ;;  %v2232_v59 = vpop.permute.xlu1 %2231 }
 0x86f   : > { %v1821_v24 = vpack.c.bf16 %v1817_v22, %v1817_v22  ;;  %v2237_v0 = vsel %vm568_vm2, %v2232_v59, 0 }
 0x870   : > { %v6270_v25 = vpop.eup %6269 }
 0x871   : > { %5833 = vmatmul.mubr.msk.bf16.vlgmr.msra.gmra.mxu1 %vm568_vm2, %v1821_v24  ;;  %v1818_v27 = vmul.f32 %v6270_v25, %v6262_v48 }
 0x872   : > { %v2182_v55 = vpop.permute.xlu0 %2181  ;;  %5843 = vmatpush3.bf16.msra.mxu1 %v6859_v30  ;;  %v2230_v6 = vpop.permute.xlu1 %2229 }
 0x873   : > { %v1822_v28 = vpack.c.bf16 %v1818_v27, %v1818_v27  ;;  %v2187_v56 = vsel %vm568_vm2, %v2182_v55, 0  ;;  %5854 = vmatprep.subr.bf16.mxu1 %v6435_v8  ;;  %v1557_v55 = vadd.f32 %v6773_v53, %v6796_v15 }
 0x875   : > { %5839 = vmatmul.mubr.msk.bf16.vlgmr.msra.gmra.mxu0 %vm568_vm2, %v1822_v28  ;;  %v1565_v28 = vadd.f32 %v6771_v52, %v6794_v14 }
 0x876   : > { %5849 = vmatpush3.bf16.xpose.msra.mxu0 %v2087_v51  ;;  %5850 = vmatprep.mubr.msk.bf16.mxu0 %vm6436_vm1, %v6435_v8  ;;  %v2180_v60 = vpop.permute.xlu0 %2179 }
 0x877   : > { %5860 = vmatprep.subr.bf16.mxu0 %v6435_v8 }
 0x87d   : > { %5851 = vmatmul.mubr.msk.bf16.vlgmr.msra.gmra.mxu0 %vm568_vm2, %v2080_v29 }
 0x87e   : > { %5861 = vmatpush3.bf16.xpose.msra.mxu0 %v2187_v56  ;;  %5862 = vmatprep.mubr.msk.bf16.mxu0 %vm6436_vm1, %v6435_v8 }
 0x87f   : > { %5872 = vmatprep.subr.bf16.mxu0 %v6435_v8 }
 0x885   : > { %5863 = vmatmul.mubr.msk.bf16.vlgmr.msra.gmra.mxu0 %vm568_vm2, %v2180_v60 }
 0x886   : > { %5874 = vmatprep.mubr.msk.bf16.mxu0 %vm6436_vm1, %v6435_v8 }
 0x929   : > { %v1865_v31 = vpop.f32.mrf.mxu1 }
 0x92b   : > { %v5822_v32 = vpop.f32.mrf.mxu1  ;;  %v1913_v33 = vpop.f32.mrf.mxu0 }
 0x92c   : > { %v2015_v34 = vpack.c.bf16 %v1913_v33, %v1865_v31 }
 0x92d   : > { %v1868_v35 = vpop.f32.mrf.mxu1  ;;  %v5828_v36 = vpop.f32.mrf.mxu0 }
 0x92e   : > { %5844 = vmatprep.mubr.msk.bf16.mxu1 %vm568_vm2, %v2015_v34 }
 0x92f   : > { %v5823_v37 = vpop.f32.mrf.mxu1  ;;  %v1916_v38 = vpop.f32.mrf.mxu0 }
 0x931   : > { %v5829_v40 = vpop.f32.mrf.mxu0  ;;  %v1961_v41 = vpop.f32.mrf.mxu1 }
 0x933   : > { %v5834_v42 = vpop.f32.mrf.mxu1 }
 0x935   : > { %v1964_v43 = vpop.f32.mrf.mxu1  ;;  %v2009_v44 = vpop.f32.mrf.mxu0 }
 0x936   : > { %v2016_v46 = vpack.c.bf16 %v2009_v44, %v1961_v41 }
 0x937   : > { %v5835_v47 = vpop.f32.mrf.mxu1  ;;  %v5840_v48 = vpop.f32.mrf.mxu0 }
 0x938   : > { %5845 = vmatmul.mubr.msk.bf16.vlgmr.msra.gmra.mxu1 %vm568_vm2, %v2016_v46 }
 0x939   : > { %5855 = vmatpush3.bf16.xpose.msra.mxu1 %v2137_v49  ;;  %v2012_v50 = vpop.f32.mrf.mxu0  ;;  %5856 = vmatprep.mubr.msk.bf16.mxu1 %vm6436_vm1, %v6435_v8 }
 0x93a   : > { %5866 = vmatprep.subr.bf16.mxu1 %v6435_v8 }
 0x93b   : > { %v5841_v54 = vpop.f32.mrf.mxu0 }
 0x93d   : > { %v2123_v61 = vpop.f32.mrf.mxu0 }
 0x93e   : > { %v2279_v62 = vmul.f32 0.35355338, %v2123_v61 }
 0x93f   : > { %v5852_v63 = vpop.f32.mrf.mxu0 }
 0x940   : > { %5857 = vmatmul.mubr.msk.bf16.vlgmr.msra.gmra.mxu1 %vm568_vm2, %v2130_v45  ;;  %v2283_v1 = vsel %vm568_vm2, %v2279_v62, -inf }
 0x941   : > { %5867 = vmatpush3.bf16.xpose.msra.mxu1 %v2237_v0  ;;  %2284 = vmax.xlane.f32.xlu0 %v2283_v1  ;;  %v2126_v2 = vpop.f32.mrf.mxu0 }
 0x942   : > { %5868 = vmatprep.mubr.msk.bf16.mxu1 %vm6436_vm1, %v6435_v8  ;;  %5878 = vmatprep.subr.bf16.mxu1 %v6435_v8 }
 0x943   : > { %v5853_v3 = vpop.f32.mrf.mxu0 }
 0x945   : > { %v2223_v4 = vpop.f32.mrf.mxu0 }
 0x946   : > { %v2281_v5 = vmul.f32 0.35355338, %v2223_v4 }
 0x947   : > { %v5864_v9 = vpop.f32.mrf.mxu0 }
 0x948   : > { %5869 = vmatmul.mubr.msk.bf16.vlgmr.msra.gmra.mxu1 %vm568_vm2, %v2230_v6  ;;  %v2289_v11 = vsel %vm568_vm2, %v2281_v5, -inf }
 0x949   : > { %2290 = vmax.xlane.f32.xlu0 %v2289_v11  ;;  %v2226_v12 = vpop.f32.mrf.mxu0  ;;  %5880 = vmatprep.mubr.msk.bf16.mxu1 %vm6436_vm1, %v6435_v8 }
 0x94b   : > { %v5865_v17 = vpop.f32.mrf.mxu0 }
 0x9ca   : > { %v2285_v22 = vpop.xlane.xlu0 %2284 }
 0x9cb   : > { %v2295_v23 = vsub.f32 %v2279_v62, %v2285_v22 }
 0x9cd   : > { %v2299_v25 = vmul.f32 1.442695, %v2295_v23 }
 0x9cf   : > { %6271 = vpow2.f32 %v2299_v25 }
 0x9d2   : > { %v2291_v24 = vpop.xlane.xlu0 %2290 }
 0x9d3   : > { %v2297_v27 = vsub.f32 %v2281_v5, %v2291_v24 }
 0x9d5   : > { %v2303_v29 = vmul.f32 1.442695, %v2297_v27 }
 0x9d7   : > { %6273 = vpow2.f32 %v2303_v29 }
 0x9dc   : > { %v6272_v53 = vpop.eup %6271 }
 0x9dd   : > { %v2307_v38 = vsel %vm568_vm2, %v6272_v53, 0.0 }
 0x9e4   : > { %v6274_v57 = vpop.eup %6273 }
 0x9e5   : > { %v2313_v42 = vsel %vm568_vm2, %v6274_v57, 0.0 }
 0x9f8   : > { %v5846_v51 = vpop.f32.mrf.mxu1 }
 0x9f9   : > { %v6883_v56 = vadd.f32 %v5846_v51, %v1565_v28 }
 0x9fa   : > { %v2060_v60 = vpop.f32.mrf.mxu1 }
 0x9fb   : > { %v6887_v31 = vadd.f32 %v2060_v60, %v1557_v55 }
 0x9fc   : > { %v5847_v32 = vpop.f32.mrf.mxu1 }
 0x9fd   : > { %v6889_v33 = vadd.f32 %v5847_v32, %v1568_v10 }
 0x9fe   : > { %v6891_v34 = vpop.f32.mrf.mxu1 }
 0xa00   : > { %v2173_v52 = vpop.f32.mrf.mxu1 }
 0xa01   : > { %v2280_v14 = vmul.f32 0.35355338, %v2173_v52 }
 0xa02   : > { %v5858_v35 = vpop.f32.mrf.mxu1 }
 0xa03   : > { %v2286_v36 = vsel %vm568_vm2, %v2280_v14, -inf }
 0xa04   : > { %2287 = vmax.xlane.f32.xlu1 %v2286_v36  ;;  %v2176_v15 = vpop.f32.mrf.mxu1 }
 0xa06   : > { %v5859_v37 = vpop.f32.mrf.mxu1 }
 0xa08   : > { %v2273_v18 = vpop.f32.mrf.mxu1  ;;  %2308 = vadd.xlane.f32.xlu1 %v2307_v38 }
 0xa09   : > { %v2282_v39 = vmul.f32 0.35355338, %v2273_v18 }
 0xa0a   : > { %v5870_v40 = vpop.f32.mrf.mxu1 }
 0xa0b   : > { %v2292_v41 = vsel %vm568_vm2, %v2282_v39, -inf }
 0xa0c   : > { %v2276_v43 = vpop.f32.mrf.mxu1  ;;  %2293 = vmax.xlane.f32.xlu0 %v2292_v41  ;;  %2314 = vadd.xlane.f32.xlu1 %v2313_v42 }
 0xa0e   : > { %v5871_v44 = vpop.f32.mrf.mxu1 }
 0xa1d   : > { %2331 = vrot.lane.b32.xlu1 %v6559_v16, %s7539_s17 }
 0xa21   : > { %2427 = vrot.lane.b32.xlu1 %v6557_v13, %s7539_s17 }
 0xa25   : > { %2475 = vrot.lane.b32.xlu1 %v6563_v19, %s7539_s17 }
 0xa8d   : > { %v2288_v45 = vpop.xlane.xlu1 %2287 }
 0xa8e   : > { %v2296_v46 = vsub.f32 %v2280_v14, %v2288_v45 }
 0xa90   : > { %v2301_v47 = vmul.f32 1.442695, %v2296_v46 }
 0xa91   : > { %v2309_v48 = vpop.xlane.xlu1 %2308 }
 0xa92   : > { %6275 = vpow2.f32 %v2301_v47  ;;  %v5425_v47 = vld [vmem:[%s7528_s4] ss:$0 sm:$0xff] }
 0xa93   : > { %6277 = vrcp.f32 %v2309_v48 }
 0xa95   : > { %v2315_v49 = vpop.xlane.xlu1 %2314  ;;  %v2294_v50 = vpop.xlane.xlu0 %2293 }
 0xa96   : > { %v2298_v54 = vsub.f32 %v2282_v39, %v2294_v50  ;;  %6279 = vrcp.f32 %v2315_v49  ;;  %v1560_v49 = vadd.f32 %v6782_v58, %v6800_v20  ;;  %v6400_v58 = vld [vmem:[%s6540_s18 + $0x10] sm:$0xff] }
 0xa98   : > { %v2305_v59 = vmul.f32 1.442695, %v2298_v54 }
 0xa99   : > { %v2332_v61 = vpop.permute.xlu1 %2331 }
 0xa9a   : > { %6281 = vpow2.f32 %v2305_v59  ;;  %v2337_v16 = vsel %vm819_vm3, %v2332_v61, 0  ;;  %v2076_v59 = vadd.f32 %v6891_v34, %v1560_v49 }
 0xa9b   : > { %5873 = vmatpush3.bf16.msra.mxu0 %v2337_v16 }
 0xa9c   : > { %5884 = vmatprep.subr.bf16.mxu0 %v6435_v8 }
 0xa9d   : > { %v2428_v0 = vpop.permute.xlu1 %2427 }
 0xa9e   : > { %v2433_v3 = vsel %vm819_vm3, %v2428_v0, 0 }
 0xa9f   : > { %v6276_v13 = vpop.eup %6275 }
 0xaa0   : > { %v6278_v19 = vpop.eup %6277  ;;  %v2310_v62 = vsel %vm568_vm2, %v6276_v13, 0.0 }
 0xaa1   : > { %2311 = vadd.xlane.f32.xlu0 %v2310_v62  ;;  %v2323_v63 = vmul.f32 %v6278_v19, %v6272_v53  ;;  %v2476_v25 = vpop.permute.xlu1 %2475  ;;  %v453_v53 = vld [vmem:[%s7527_s3 + $0xc] sm:$0xf]  ;;  %v6399_v62 = vld [vmem:[%s6540_s18] sm:$0xff] }
 0xaa2   : > { %v2481_v28 = vsel %vm819_vm3, %v2476_v25, 0  ;;  %v6926_v15 = vsel %vm819_vm3, %v453_v53, 0 }
 0xaa3   : > { %v2327_v1 = vpack.c.bf16 %v2323_v63, %v2323_v63  ;;  %v6280_v2 = vpop.eup %6279 }
 0xaa4   : > { %v2325_v5 = vmul.f32 %v6280_v2, %v6274_v57 }
 0xaa5   : > { %5875 = vmatmul.mubr.msk.bf16.vlgmr.msra.gmra.mxu0 %vm568_vm2, %v2327_v1 }
 0xaa6   : > { %5885 = vmatpush3.bf16.msra.mxu0 %v2433_v3  ;;  %5886 = vmatprep.mubr.msk.bf16.mxu0 %vm6436_vm1, %v6435_v8  ;;  %v2329_v9 = vpack.c.bf16 %v2325_v5, %v2325_v5  ;;  %v6402_v5 = vld [vmem:[%s6540_s18 + $0x18] sm:$0xff] }
 0xaa7   : > { %v6282_v4 = vpop.eup %6281  ;;  %6185 = vmatprep.subr.msk.bf16.mxu0 %vm819_vm3, %v453_v53  ;;  %v6214_v53 = vld [vmem:[%s7531_s7] sm:$0xff]  }
 0xaa8   : > { %v2316_v6 = vsel %vm568_vm2, %v6282_v4, 0.0 }
 0xaa9   : > { %2317 = vadd.xlane.f32.xlu0 %v2316_v6 }
 0xaad   : > { %5887 = vmatmul.mubr.msk.bf16.vlgmr.msra.gmra.mxu0 %vm568_vm2, %v2329_v9 }
 0xaae   : > { %5897 = vmatpush3.bf16.msra.mxu0 %v6926_v15 }
 0xabf   : > { %2379 = vrot.lane.b32.xlu0 %v6567_v21, %s7539_s17 }
 0xb2a   : > { %v2312_v11 = vpop.xlane.xlu0 %2311 }
 0xb2b   : > { %6283 = vrcp.f32 %v2312_v11 }
 0xb32   : > { %v2318_v12 = vpop.xlane.xlu0 %2317 }
 0xb33   : > { %6285 = vrcp.f32 %v2318_v12 }
 0xb36   : > { %v2380_v17 = vpop.permute.xlu0 %2379 }
 0xb37   : > { %v2385_v22 = vsel %vm819_vm3, %v2380_v17, 0 }
 0xb38   : > { %v6284_v23 = vpop.eup %6283  ;;  %5879 = vmatpush3.bf16.msra.mxu1 %v2385_v22 }
 0xb39   : > { %5890 = vmatprep.subr.bf16.mxu1 %v6435_v8  ;;  %v2324_v24 = vmul.f32 %v6284_v23, %v6276_v13 }
 0xb3b   : > { %v2328_v27 = vpack.c.bf16 %v2324_v24, %v2324_v24 }
 0xb3d   : > { %5881 = vmatmul.mubr.msk.bf16.vlgmr.msra.gmra.mxu1 %vm568_vm2, %v2328_v27 }
 0xb3e   : > { %5891 = vmatpush3.bf16.msra.mxu1 %v2481_v28  ;;  %5892 = vmatprep.mubr.msk.bf16.mxu1 %vm6436_vm1, %v6435_v8 }
 0xb40   : > { %v6286_v21 = vpop.eup %6285 }
 0xb41   : > { %v2326_v29 = vmul.f32 %v6286_v21, %v6282_v4 }
 0xb43   : > { %v2330_v51 = vpack.c.bf16 %v2326_v29, %v2326_v29 }
 0xb45   : > { %5893 = vmatmul.mubr.msk.bf16.vlgmr.msra.gmra.mxu1 %vm568_vm2, %v2330_v51 }
 0xb65   : > { %v2373_v55 = vpop.f32.mrf.mxu0 }
 0xb67   : > { %v5876_v60 = vpop.f32.mrf.mxu0 }
 0xb69   : > { %v2376_v10 = vpop.f32.mrf.mxu0 }
 0xb6b   : > { %v5877_v32 = vpop.f32.mrf.mxu0 }
 0xb6d   : > { %v2469_v52 = vpop.f32.mrf.mxu0 }
 0xb6f   : > { %v5888_v14 = vpop.f32.mrf.mxu0 }
 0xb71   : > { %v2472_v35 = vpop.f32.mrf.mxu0 }
 0xb73   : > { %v5889_v36 = vpop.f32.mrf.mxu0 }
 0xb74   : > { %v6213_v36 = vld [vmem:[%s7531_s7 + $0x8] sm:$0xff]  }
 0xb75   : > { %5902 = vmatprep.subr.bf16.mxu1 %v6213_v36 }
 0xb76   : > { %5903 = vmatpush3.bf16.msra.mxu1 %v6213_v36 }
 0xb77   : > { %5904 = vmatprep.subr.bf16.mxu1 %v6214_v53 }
 0xb7a   : > { %5905 = vmatpush3.bf16.msra.mxu1 %v6214_v53 }
 0xbfd   : > { %v2421_v37 = vpop.f32.mrf.mxu1 }
 0xbfe   : > { %v2523_v38 = vpack.c.bf16 %v2421_v37, %v2373_v55  ;;  %v6403_v37 = vld [vmem:[%s7525_s1 + $0x8] sm:$0xff]  }
 0xbff   : > { %v5882_v57 = vpop.f32.mrf.mxu1  ;;  %5930 = vmatprep.subr.bf16.mxu1 %v6403_v37 }
 0xc00   : > { %5898 = vmatprep.mubr.msk.bf16.mxu0 %vm568_vm2, %v2523_v38 }
 0xc01   : > { %v2424_v18 = vpop.f32.mrf.mxu1 }
 0xc03   : > { %v5883_v39 = vpop.f32.mrf.mxu1 }
 0xc05   : > { %v2517_v40 = vpop.f32.mrf.mxu1 }
 0xc06   : > { %v2524_v41 = vpack.c.bf16 %v2517_v40, %v2469_v52 }
 0xc07   : > { %v5894_v42 = vpop.f32.mrf.mxu1 }
 0xc08   : > { %5899 = vmatmul.mubr.msk.bf16.vlgmr.msra.gmra.mxu0 %vm568_vm2, %v2524_v41 }
 0xc09   : > { %v2520_v43 = vpop.f32.mrf.mxu1 }
 0xc0b   : > { %v5895_v44 = vpop.f32.mrf.mxu1 }
 0xcc8   : > { %v5900_v45 = vpop.f32.mrf.mxu0 }
 0xcc9   : > { %v2585_v46 = vadd.f32 %v5900_v45, %v6883_v56 }
 0xcca   : > { %v2568_v48 = vpop.f32.mrf.mxu0 }
 0xccb   : > { %v2583_v50 = vadd.f32 %v2568_v48, %v6887_v31  ;;  %v2595_v61 = vadd.f32 %v5425_v47, %v2585_v46  ;;  %v6401_v31 = vld [vmem:[%s6540_s18 + $0x8] sm:$0xff] }
 0xccc   : > { %v5901_v54 = vpop.f32.mrf.mxu0 }
 0xccd   : > { %v2593_v16 = vadd.f32 %v5425_v47, %v2583_v50  ;;  %v2586_v56 = vadd.f32 %v5901_v54, %v6889_v33  ;;  %v2599_v20 = vadd.f32 %v6400_v58, %v2595_v61  ;;  %v5426_v50 = vld [vmem:[%s7529_s5] ss:$0 sm:$0xff] }
 0xcce   : > { %v2571_v13 = vpop.f32.mrf.mxu0 }
 0xccf   : > { %v2584_v19 = vadd.f32 %v2571_v13, %v2076_v59  ;;  %v2597_v63 = vadd.f32 %v6399_v62, %v2593_v16  ;;  %v2596_v0 = vadd.f32 %v5425_v47, %v2586_v56  ;;  %v2607_v34 = vsel %vm505_vm0, %v2599_v20, 0.0  ;;  %v5427_v13 = vld [vmem:[%s7530_s6] ss:$0 sm:$0xff] }
 0xcd1   : > { %v2594_v1 = vadd.f32 %v5425_v47, %v2584_v19  ;;  %v2601_v2 = vsel %vm505_vm0, %v2597_v63, 0.0  ;;  %v2600_v6 = vadd.f32 %v6402_v5, %v2596_v0  ;;  %v6215_v5 = vld [vmem:[%s7533_s9 + $0x38] sm:$0xff]  }
 0xcd2   : > { %2602 = vadd.xlane.f32.xlu0 %v2601_v2  ;;  %5910 = vmatprep.subr.bf16.mxu0 %v6215_v5 }
 0xcd3   : > { %v2598_v3 = vadd.f32 %v6401_v31, %v2594_v1  ;;  %v2610_v33 = vsel %vm505_vm0, %v2600_v6, 0.0  ;;  %5911 = vmatpush3.bf16.msra.mxu0 %v6215_v5 }
 0xcd5   : > { %v2604_v4 = vsel %vm505_vm0, %v2598_v3, 0.0 }
 0xcd6   : > { %2608 = vadd.xlane.f32.xlu0 %v2607_v34  ;;  %2605 = vadd.xlane.f32.xlu1 %v2604_v4  ;;  %v6404_v4 = vld [vmem:[%s7525_s1] sm:$0xff]  }
 0xcda   : > { %2611 = vadd.xlane.f32.xlu0 %v2610_v33  ;;  %v6217_v33 = vld [vmem:[%s7533_s9 + $0x28] sm:$0xff]  }
 0xd5b   : > { %v2603_v9 = vpop.xlane.xlu0 %2602 }
 0xd5c   : > { %v2614_v11 = vmul.f32 0.03125, %v2603_v9  ;;  %v6218_v9 = vld [vmem:[%s7533_s9 + $0x20] sm:$0xff]  }
 0xd5e   : > { %v2618_v12 = vsub.f32 %v2597_v63, %v2614_v11  ;;  %v6219_v11 = vld [vmem:[%s7533_s9 + $0x18] sm:$0xff]  }
 0xd5f   : > { %v2609_v17 = vpop.xlane.xlu0 %2608  ;;  %v2606_v22 = vpop.xlane.xlu1 %2605 }
 0xd60   : > { %v2616_v23 = vmul.f32 0.03125, %v2609_v17  ;;  %v2615_v24 = vmul.f32 0.03125, %v2606_v22  ;;  %v2622_v25 = vmul.f32 %v2618_v12, %v2618_v12  ;;  %v6221_v17 = vld [vmem:[%s7533_s9 + $0x8] sm:$0xff]   ;;  %v6222_v22 = vld [vmem:[%s7533_s9] sm:$0xff]  }
 0xd62   : > { %v2620_v27 = vsub.f32 %v2599_v20, %v2616_v23  ;;  %v2619_v28 = vsub.f32 %v2598_v3, %v2615_v24  ;;  %v2626_v21 = vsel %vm505_vm0, %v2622_v25, 0.0  ;;  %v5428_v23 = vld [vmem:[%s7532_s8] ss:$0 sm:$0xff] }
 0xd63   : > { %v2612_v29 = vpop.xlane.xlu0 %2611  ;;  %2627 = vadd.xlane.f32.xlu1 %v2626_v21 }
 0xd64   : > { %v2617_v51 = vmul.f32 0.03125, %v2612_v29  ;;  %v2624_v55 = vmul.f32 %v2620_v27, %v2620_v27  ;;  %v2623_v60 = vmul.f32 %v2619_v28, %v2619_v28 }
 0xd66   : > { %v2621_v10 = vsub.f32 %v2600_v6, %v2617_v51  ;;  %v2632_v32 = vsel %vm505_vm0, %v2624_v55, 0.0  ;;  %v2629_v52 = vsel %vm505_vm0, %v2623_v60, 0.0  ;;  %v6216_v6 = vld [vmem:[%s7533_s9 + $0x30] sm:$0xff]  }
 0xd67   : > { %2633 = vadd.xlane.f32.xlu1 %v2632_v32  ;;  %2630 = vadd.xlane.f32.xlu0 %v2629_v52 }
 0xd68   : > { %v2625_v14 = vmul.f32 %v2621_v10, %v2621_v10  ;;  %5912 = vmatprep.subr.bf16.mxu0 %v6216_v6 }
 0xd69   : > { %5913 = vmatpush3.bf16.msra.mxu0 %v6216_v6  ;;  %v5433_v6 = vld [vmem:[%s7534_s10] ss:$0 sm:$0xff] }
 0xd6a   : > { %v2635_v35 = vsel %vm505_vm0, %v2625_v14, 0.0  ;;  %5914 = vmatprep.subr.bf16.mxu0 %v6217_v33 }
 0xd6b   : > { %2636 = vadd.xlane.f32.xlu0 %v2635_v35 }
 0xd6d   : > { %5915 = vmatpush3.bf16.msra.mxu0 %v6217_v33 }
 0xd6e   : > { %5916 = vmatprep.subr.bf16.mxu0 %v6218_v9 }
 0xd71   : > { %5917 = vmatpush3.bf16.msra.mxu0 %v6218_v9 }
 0xd72   : > { %5918 = vmatprep.subr.bf16.mxu0 %v6219_v11 }
 0xd75   : > { %5919 = vmatpush3.bf16.msra.mxu0 %v6219_v11 }
 0xdec   : > { %v2628_v38 = vpop.xlane.xlu1 %2627 }
 0xded   : > { %v2638_v57 = vmul.f32 0.03125, %v2628_v38 }
 0xdef   : > { %v2642_v18 = vadd.f32 1e-05, %v2638_v57 }
 0xdf0   : > { %v2631_v39 = vpop.xlane.xlu0 %2630  ;;  %v2634_v40 = vpop.xlane.xlu1 %2633 }
 0xdf1   : > { %6287 = vrsqrt.f32 %v2642_v18  ;;  %v2639_v41 = vmul.f32 0.03125, %v2631_v39  ;;  %v2640_v42 = vmul.f32 0.03125, %v2634_v40 }
 0xdf3   : > { %v2643_v43 = vadd.f32 1e-05, %v2639_v41  ;;  %v2644_v44 = vadd.f32 1e-05, %v2640_v42 }
 0xdf4   : > { %v2637_v45 = vpop.xlane.xlu0 %2636 }
 0xdf5   : > { %6289 = vrsqrt.f32 %v2643_v43  ;;  %v2641_v46 = vmul.f32 0.03125, %v2637_v45 }
 0xdf6   : > { %6291 = vrsqrt.f32 %v2644_v44 }
 0xdf7   : > { %v2645_v47 = vadd.f32 1e-05, %v2641_v46 }
 0xdf9   : > { %6293 = vrsqrt.f32 %v2645_v47 }
 0xdfe   : > { %v6288_v48 = vpop.eup %6287 }
 0xdff   : > { %v2650_v49 = vmul.f32 %v6288_v48, %v2618_v12  ;;  %v6220_v12 = vld [vmem:[%s7533_s9 + $0x10] sm:$0xff]  }
 0xe00   : > { %5920 = vmatprep.subr.bf16.mxu0 %v6220_v12 }
 0xe01   : > { %v2660_v16 = vmul.f32 %v5426_v50, %v2650_v49  ;;  %5921 = vmatpush3.bf16.msra.mxu0 %v6220_v12 }
 0xe02   : > { %v6290_v54 = vpop.eup %6289  ;;  %5922 = vmatprep.subr.bf16.mxu0 %v6221_v17 }
 0xe03   : > { %v6292_v59 = vpop.eup %6291  ;;  %v2651_v61 = vmul.f32 %v6290_v54, %v2619_v28  ;;  %v6967_v0 = vadd.f32 %v5427_v13, %v2660_v16 }
 0xe04   : > { %v2652_v56 = vmul.f32 %v6292_v59, %v2620_v27 }
 0xe05   : > { %v2661_v19 = vmul.f32 %v5426_v50, %v2651_v61  ;;  %5923 = vmatpush3.bf16.msra.mxu0 %v6221_v17 }
 0xe06   : > { %v6294_v62 = vpop.eup %6293  ;;  %v2662_v2 = vmul.f32 %v5426_v50, %v2652_v56  ;;  %5924 = vmatprep.subr.bf16.mxu0 %v6222_v22 }
 0xe07   : > { %v2653_v63 = vmul.f32 %v6294_v62, %v2621_v10  ;;  %v6969_v1 = vadd.f32 %v5427_v13, %v2661_v19 }
 0xe08   : > { %v6974_v31 = vadd.f32 %v5427_v13, %v2662_v2 }
 0xe09   : > { %v2674_v58 = vpack.c.bf16 %v6969_v1, %v6967_v0  ;;  %v2663_v20 = vmul.f32 %v5426_v50, %v2653_v63  ;;  %5925 = vmatpush3.bf16.msra.mxu0 %v6222_v22 }
 0xe0a   : > { %5956 = vmatprep.subr.bf16.mxu0 %v6435_v8 }
 0xe0b   : > { %5906 = vmatprep.mubr.msk.bf16.mxu1 %vm505_vm0, %v2674_v58  ;;  %v6976_v3 = vadd.f32 %v5427_v13, %v2663_v20 }
 0xe0d   : > { %v2675_v34 = vpack.c.bf16 %v6976_v3, %v6974_v31 }
 0xe0f   : > { %5907 = vmatmul.mubr.msk.bf16.vlgmr.msra.gmra.mxu1 %vm505_vm0, %v2675_v34 }
 0xe10   : > { %5931 = vmatpush3.bf16.msra.mxu1 %v6403_v37 }
 0xe11   : > { %5932 = vmatprep.subr.bf16.mxu1 %v6404_v4 }
 0xe14   : > { %5933 = vmatpush3.bf16.msra.mxu1 %v6404_v4 }
 0xe15   : > { %5938 = vmatprep.subr.bf16.mxu1 %v6435_v8 }
 0xecf   : > { %v5908_v24 = vpop.f32.mrf.mxu1 }
 0xed0   : > { %v2743_v25 = vadd.f32 %v5908_v24, %v5428_v23 }
 0xed1   : > { %v2734_v27 = vpop.f32.mrf.mxu1 }
 0xed2   : > { %v2755_v28 = vmul.f32 %v2743_v25, %v2743_v25  ;;  %v2735_v21 = vadd.f32 %v5428_v23, %v2734_v27  ;;  %v2751_v62 = vmul.f32 0.5, %v2743_v25 }
 0xed3   : > { %v5909_v29 = vpop.f32.mrf.mxu1 }
 0xed4   : > { %v2759_v51 = vmul.f32 %v2755_v28, %v2743_v25  ;;  %v2753_v55 = vmul.f32 %v2735_v21, %v2735_v21  ;;  %v2746_v60 = vadd.f32 %v5909_v29, %v5428_v23  ;;  %v2749_v56 = vmul.f32 0.5, %v2735_v21 }
 0xed5   : > { %v2737_v10 = vpop.f32.mrf.mxu1 }
 0xed6   : > { %v2763_v32 = vmul.f32 0.044715, %v2759_v51  ;;  %v2757_v52 = vmul.f32 %v2753_v55, %v2735_v21  ;;  %v2756_v14 = vmul.f32 %v2746_v60, %v2746_v60  ;;  %v2738_v35 = vadd.f32 %v5428_v23, %v2737_v10 }
 0xed7   : > { %v2752_v61 = vmul.f32 0.5, %v2746_v60 }
 0xed8   : > { %v2767_v36 = vadd.f32 %v2763_v32, %v2743_v25  ;;  %v2761_v53 = vmul.f32 0.044715, %v2757_v52  ;;  %v2760_v37 = vmul.f32 %v2756_v14, %v2746_v60  ;;  %v2754_v38 = vmul.f32 %v2738_v35, %v2738_v35 }
 0xed9   : > { %v2750_v13 = vmul.f32 0.5, %v2738_v35 }
 0xeda   : > { %v2771_v57 = vmul.f32 0.7978846, %v2767_v36  ;;  %v2765_v18 = vadd.f32 %v2761_v53, %v2735_v21  ;;  %v2764_v39 = vmul.f32 0.044715, %v2760_v37  ;;  %v2758_v40 = vmul.f32 %v2754_v38, %v2738_v35 }
 0xedc   : > { %v2769_v41 = vmul.f32 0.7978846, %v2765_v18  ;;  %v2768_v42 = vadd.f32 %v2764_v39, %v2746_v60  ;;  %v2762_v43 = vmul.f32 0.044715, %v2758_v40  ;;  %6295 = vtanh.f32 %v2771_v57 }
 0xede   : > { %v2772_v44 = vmul.f32 0.7978846, %v2768_v42  ;;  %6297 = vtanh.f32 %v2769_v41  ;;  %v2766_v45 = vadd.f32 %v2762_v43, %v2738_v35 }
 0xee0   : > { %6299 = vtanh.f32 %v2772_v44  ;;  %v2770_v46 = vmul.f32 0.7978846, %v2766_v45 }
 0xee2   : > { %6301 = vtanh.f32 %v2770_v46 }
 0xee9   : > { %v6296_v47 = vpop.eup %6295 }
 0xeea   : > { %v2779_v16 = vadd.f32 1.0, %v6296_v47 }
 0xeeb   : > { %v6298_v48 = vpop.eup %6297 }
 0xeec   : > { %v2777_v54 = vadd.f32 1.0, %v6298_v48  ;;  %v2783_v20 = vmul.f32 %v2779_v16, %v2751_v62 }
 0xeed   : > { %v6300_v49 = vpop.eup %6299 }
 0xeee   : > { %v2780_v50 = vadd.f32 1.0, %v6300_v49  ;;  %v2781_v2 = vmul.f32 %v2777_v54, %v2749_v56 }
 0xeef   : > { %v6302_v59 = vpop.eup %6301 }
 0xef0   : > { %v2778_v19 = vadd.f32 1.0, %v6302_v59  ;;  %v2784_v63 = vmul.f32 %v2780_v50, %v2752_v61 }
 0xef2   : > { %v2782_v58 = vmul.f32 %v2778_v19, %v2750_v13  ;;  %v2786_v4 = vpack.c.bf16 %v2784_v63, %v2783_v20  ;;  %v5442_v19 = vld [vmem:[%s7535_s11] ss:$0 sm:$0xff] }
 0xef4   : > { %v2785_v34 = vpack.c.bf16 %v2782_v58, %v2781_v2 }
 0xef6   : > { %5926 = vmatprep.mubr.bf16.mxu0 %v2785_v34  ;;  %v5443_v34 = vld [vmem:[%s7536_s12] ss:$0 sm:$0xff] }
 0xef7   : > { %5927 = vmatmul.mubr.bf16.vlgmr.msra.gmra.mxu0 %v2786_v4 }
 0xef8   : > { %5958 = vmatprep.mubr.msk.bf16.mxu0 %vm6436_vm1, %v6435_v8 }
 0xfb7   : > { %v5928_v5 = vpop.f32.mrf.mxu0 }
 0xfb8   : > { %v2884_v9 = vadd.f32 %v5928_v5, %v5433_v6 }
 0xfb9   : > { %v2875_v33 = vpop.f32.mrf.mxu0 }
 0xfba   : > { %v2876_v11 = vadd.f32 %v5433_v6, %v2875_v33  ;;  %v2892_v27 = vadd.f32 %v2884_v9, %v6974_v31 }
 0xfbb   : > { %v5929_v12 = vpop.f32.mrf.mxu0 }
 0xfbc   : > { %v2890_v17 = vadd.f32 %v2876_v11, %v6967_v0  ;;  %v2887_v23 = vadd.f32 %v5929_v12, %v5433_v6  ;;  %v2900_v29 = vsel %vm505_vm0, %v2892_v27, 0.0 }
 0xfbd   : > { %v2878_v22 = vpop.f32.mrf.mxu0 }
 0xfbe   : > { %v2879_v24 = vadd.f32 %v5433_v6, %v2878_v22  ;;  %v2894_v25 = vsel %vm505_vm0, %v2890_v17, 0.0  ;;  %v2893_v51 = vadd.f32 %v2887_v23, %v6976_v3 }
 0xfbf   : > { %2895 = vadd.xlane.f32.xlu1 %v2894_v25 }
 0xfc0   : > { %v2891_v28 = vadd.f32 %v2879_v24, %v6969_v1  ;;  %v2903_v0 = vsel %vm505_vm0, %v2893_v51, 0.0 }
 0xfc2   : > { %v2897_v21 = vsel %vm505_vm0, %v2891_v28, 0.0 }
 0xfc3   : > { %2898 = vadd.xlane.f32.xlu0 %v2897_v21  ;;  %2901 = vadd.xlane.f32.xlu1 %v2900_v29 }
 0xfc7   : > { %2904 = vadd.xlane.f32.xlu0 %v2903_v0 }
0x1048   : > { %v2896_v55 = vpop.xlane.xlu1 %2895 }
0x1049   : > { %v2906_v60 = vmul.f32 0.03125, %v2896_v55 }
0x104b   : > { %v2910_v10 = vsub.f32 %v2890_v17, %v2906_v60 }
0x104c   : > { %v2899_v32 = vpop.xlane.xlu0 %2898  ;;  %v2902_v52 = vpop.xlane.xlu1 %2901 }
0x104d   : > { %v2907_v31 = vmul.f32 0.03125, %v2899_v32  ;;  %v2908_v14 = vmul.f32 0.03125, %v2902_v52  ;;  %v2914_v35 = vmul.f32 %v2910_v10, %v2910_v10 }
0x104f   : > { %v2911_v1 = vsub.f32 %v2891_v28, %v2907_v31  ;;  %v2912_v36 = vsub.f32 %v2892_v27, %v2908_v14  ;;  %v2918_v53 = vsel %vm505_vm0, %v2914_v35, 0.0  ;;  %v6405_v28 = vld [vmem:[%s7526_s2] ss:$0 sm:$0xff] }
0x1050   : > { %v2905_v37 = vpop.xlane.xlu0 %2904  ;;  %2919 = vadd.xlane.f32.xlu1 %v2918_v53 }
0x1051   : > { %v2909_v3 = vmul.f32 0.03125, %v2905_v37  ;;  %v2915_v38 = vmul.f32 %v2911_v1, %v2911_v1  ;;  %v2916_v57 = vmul.f32 %v2912_v36, %v2912_v36 }
0x1053   : > { %v2913_v18 = vsub.f32 %v2893_v51, %v2909_v3  ;;  %v2921_v39 = vsel %vm505_vm0, %v2915_v38, 0.0  ;;  %v2924_v40 = vsel %vm505_vm0, %v2916_v57, 0.0 }
0x1054   : > { %2922 = vadd.xlane.f32.xlu0 %v2921_v39  ;;  %2925 = vadd.xlane.f32.xlu1 %v2924_v40 }
0x1055   : > { %v2917_v41 = vmul.f32 %v2913_v18, %v2913_v18 }
0x1057   : > { %v2927_v42 = vsel %vm505_vm0, %v2917_v41, 0.0 }
0x1058   : > { %2928 = vadd.xlane.f32.xlu0 %v2927_v42 }
0x10d9   : > { %v2920_v43 = vpop.xlane.xlu1 %2919 }
0x10da   : > { %v2930_v44 = vmul.f32 0.03125, %v2920_v43 }
0x10dc   : > { %v2934_v45 = vadd.f32 1e-05, %v2930_v44 }
0x10dd   : > { %v2923_v46 = vpop.xlane.xlu0 %2922  ;;  %v2926_v47 = vpop.xlane.xlu1 %2925 }
0x10de   : > { %6303 = vrsqrt.f32 %v2934_v45  ;;  %v2931_v48 = vmul.f32 0.03125, %v2923_v46  ;;  %v2932_v49 = vmul.f32 0.03125, %v2926_v47 }
0x10e0   : > { %v2935_v50 = vadd.f32 1e-05, %v2931_v48  ;;  %v2936_v54 = vadd.f32 1e-05, %v2932_v49 }
0x10e1   : > { %v2929_v59 = vpop.xlane.xlu0 %2928 }
0x10e2   : > { %6305 = vrsqrt.f32 %v2935_v50  ;;  %v2933_v61 = vmul.f32 0.03125, %v2929_v59 }
0x10e3   : > { %6307 = vrsqrt.f32 %v2936_v54 }
0x10e4   : > { %v2937_v16 = vadd.f32 1e-05, %v2933_v61 }
0x10e6   : > { %6309 = vrsqrt.f32 %v2937_v16 }
0x10eb   : > { %v6304_v56 = vpop.eup %6303 }
0x10ec   : > { %v2942_v13 = vmul.f32 %v6304_v56, %v2910_v10 }
0x10ee   : > { %v2952_v58 = vmul.f32 %v5442_v19, %v2942_v13 }
0x10ef   : > { %v6306_v62 = vpop.eup %6305 }
0x10f0   : > { %v6308_v63 = vpop.eup %6307  ;;  %v2943_v2 = vmul.f32 %v6306_v62, %v2911_v1  ;;  %v7036_v33 = vadd.f32 %v5443_v34, %v2952_v58 }
0x10f1   : > { %v2944_v20 = vmul.f32 %v6308_v63, %v2912_v36 }
0x10f2   : > { %v2953_v4 = vmul.f32 %v5442_v19, %v2943_v2 }
0x10f3   : > { %v6310_v5 = vpop.eup %6309  ;;  %v2954_v11 = vmul.f32 %v5442_v19, %v2944_v20 }
0x10f4   : > { %v2945_v6 = vmul.f32 %v6310_v5, %v2913_v18  ;;  %v7038_v9 = vadd.f32 %v5443_v34, %v2953_v4 }
0x10f5   : > { %v7043_v22 = vadd.f32 %v5443_v34, %v2954_v11 }
0x10f6   : > { %v2966_v12 = vpack.c.bf16 %v7038_v9, %v7036_v33  ;;  %v2955_v17 = vmul.f32 %v5442_v19, %v2945_v6 }
0x10f8   : > { %5934 = vmatprep.mubr.msk.bf16.mxu1 %vm505_vm0, %v2966_v12  ;;  %v7045_v23 = vadd.f32 %v5443_v34, %v2955_v17 }
0x10fa   : > { %v2967_v24 = vpack.c.bf16 %v7045_v23, %v7043_v22 }
0x10fc   : > { %5935 = vmatmul.mubr.msk.bf16.vlgmr.msra.gmra.mxu1 %vm505_vm0, %v2967_v24 }
0x10fd   : > { %5940 = vmatprep.mubr.msk.bf16.mxu1 %vm6436_vm1, %v6435_v8 }
0x11bc   : > { %v5936_v25 = vpop.f32.mrf.mxu1 }
0x11bd   : > { %v3017_v51 = vadd.f32 %v6405_v28, %v5936_v25 }
0x11be   : > { %v3008_v27 = vpop.f32.mrf.mxu1 }
0x11bf   : > { %v3009_v21 = vadd.f32 %v6405_v28, %v3008_v27  ;;  %v7059_v10 = vpack.c.bf16 %v3017_v51, %v3017_v51 }
0x11c0   : > { %v5937_v29 = vpop.f32.mrf.mxu1 }
0x11c1   : > { %v7055_v0 = vpack.c.bf16 %v3009_v21, %v3009_v21  ;;  %v3020_v32 = vadd.f32 %v6405_v28, %v5937_v29 }
0x11c2   : > { %v3011_v55 = vpop.f32.mrf.mxu1 }
0x11c3   : > { %v3012_v60 = vadd.f32 %v6405_v28, %v3011_v55  ;;  %3028 = vrot.lane.b32.xlu1 %v7055_v0, %s6437_s21  ;;  %v7067_v31 = vpack.c.bf16 %v3020_v32, %v3020_v32 }
0x11c5   : > { %v7061_v52 = vpack.c.bf16 %v3012_v60, %v3012_v60 }
0x11c7   : > { %3077 = vrot.lane.b32.xlu0 %v7061_v52, %s6437_s21  ;;  %3126 = vrot.lane.b32.xlu1 %v7059_v10, %s6437_s21 }
0x11cb   : > { %3175 = vrot.lane.b32.xlu1 %v7067_v31, %s6437_s21 }
0x1235   : > { %v3029_v14 = vpop.permute.xlu1 %3028 }
0x1236   : > { %v3034_v35 = vsel %vm568_vm2, %v3029_v14, 0 }
0x1237   : > { %5939 = vmatpush3.bf16.xpose.msra.mxu1 %v3034_v35 }
0x1238   : > { %5944 = vmatprep.subr.bf16.mxu1 %v6435_v8 }
0x1239   : > { %v3127_v1 = vpop.permute.xlu1 %3126  ;;  %v3078_v36 = vpop.permute.xlu0 %3077 }
0x123a   : > { %v3083_v37 = vsel %vm568_vm2, %v3078_v36, 0  ;;  %v3132_v38 = vsel %vm568_vm2, %v3127_v1, 0 }
0x123d   : > { %v3176_v53 = vpop.permute.xlu1 %3175 }
0x123e   : > { %v3181_v3 = vsel %vm568_vm2, %v3176_v53, 0  ;;  %5941 = vmatmul.mubr.msk.bf16.vlgmr.msra.gmra.mxu1 %vm568_vm2, %v7055_v0 }
0x123f   : > { %5945 = vmatpush3.bf16.xpose.msra.mxu1 %v3083_v37  ;;  %5957 = vmatpush3.bf16.xpose.msra.mxu0 %v3181_v3 }
0x1240   : > { %5946 = vmatprep.mubr.msk.bf16.mxu1 %vm6436_vm1, %v6435_v8  ;;  %5950 = vmatprep.subr.bf16.mxu1 %v6435_v8 }
0x1241   : > { %5968 = vmatprep.subr.bf16.mxu0 %v6435_v8 }
0x1246   : > { %5947 = vmatmul.mubr.msk.bf16.vlgmr.msra.gmra.mxu1 %vm568_vm2, %v7061_v52  ;;  %5959 = vmatmul.mubr.msk.bf16.vlgmr.msra.gmra.mxu0 %vm568_vm2, %v7067_v31 }
0x1247   : > { %5951 = vmatpush3.bf16.xpose.msra.mxu1 %v3132_v38  ;;  %5952 = vmatprep.mubr.msk.bf16.mxu1 %vm6436_vm1, %v6435_v8 }
0x1248   : > { %5962 = vmatprep.subr.bf16.mxu1 %v6435_v8  ;;  %5970 = vmatprep.mubr.msk.bf16.mxu0 %vm6436_vm1, %v6435_v8 }
0x124e   : > { %5953 = vmatmul.mubr.msk.bf16.vlgmr.msra.gmra.mxu1 %vm568_vm2, %v7059_v10 }
0x124f   : > { %5964 = vmatprep.mubr.msk.bf16.mxu1 %vm6436_vm1, %v6435_v8 }
0x12fe   : > { %v3070_v57 = vpop.f32.mrf.mxu1 }
0x12ff   : > { %v3223_v18 = vmul.f32 0.35355338, %v3070_v57 }
0x1300   : > { %v5942_v39 = vpop.f32.mrf.mxu1 }
0x1301   : > { %v3227_v40 = vsel %vm568_vm2, %v3223_v18, -inf }
0x1302   : > { %3228 = vmax.xlane.f32.xlu0 %v3227_v40  ;;  %v3073_v41 = vpop.f32.mrf.mxu1 }
0x1304   : > { %v5943_v42 = vpop.f32.mrf.mxu1 }
0x1306   : > { %v3119_v43 = vpop.f32.mrf.mxu1  ;;  %v3217_v44 = vpop.f32.mrf.mxu0 }
0x1307   : > { %v3224_v45 = vmul.f32 0.35355338, %v3119_v43  ;;  %v3226_v13 = vmul.f32 0.35355338, %v3217_v44 }
0x1308   : > { %v5948_v46 = vpop.f32.mrf.mxu1  ;;  %v5960_v47 = vpop.f32.mrf.mxu0 }
0x1309   : > { %v3230_v48 = vsel %vm568_vm2, %v3224_v45, -inf  ;;  %v3236_v2 = vsel %vm568_vm2, %v3226_v13, -inf }
0x130a   : > { %3231 = vmax.xlane.f32.xlu1 %v3230_v48  ;;  %v3122_v49 = vpop.f32.mrf.mxu1  ;;  %v3220_v50 = vpop.f32.mrf.mxu0 }
0x130c   : > { %v5949_v54 = vpop.f32.mrf.mxu1  ;;  %v5961_v59 = vpop.f32.mrf.mxu0 }
0x130e   : > { %v3168_v61 = vpop.f32.mrf.mxu1 }
0x130f   : > { %v3225_v16 = vmul.f32 0.35355338, %v3168_v61 }
0x1310   : > { %v5954_v56 = vpop.f32.mrf.mxu1 }
0x1311   : > { %v3233_v19 = vsel %vm568_vm2, %v3225_v16, -inf }
0x1312   : > { %3234 = vmax.xlane.f32.xlu0 %v3233_v19  ;;  %v3171_v62 = vpop.f32.mrf.mxu1 }
0x1314   : > { %v5955_v63 = vpop.f32.mrf.mxu1 }
0x1316   : > { %3237 = vmax.xlane.f32.xlu0 %v3236_v2 }
0x131b   : > { %3275 = vrot.lane.b32.xlu1 %v7055_v0, %s6438_s22 }
0x138b   : > { %v3229_v58 = vpop.xlane.xlu0 %3228 }
0x138c   : > { %v3239_v20 = vsub.f32 %v3223_v18, %v3229_v58 }
0x138e   : > { %v3243_v34 = vmul.f32 1.442695, %v3239_v20 }
0x1390   : > { %6311 = vpow2.f32 %v3243_v34 }
0x1393   : > { %v3232_v4 = vpop.xlane.xlu1 %3231 }
0x1394   : > { %v3240_v17 = vsub.f32 %v3224_v45, %v3232_v4 }
0x1396   : > { %v3245_v28 = vmul.f32 1.442695, %v3240_v17 }
0x1397   : > { %v3276_v5 = vpop.permute.xlu1 %3275 }
0x1398   : > { %v3281_v6 = vsel %vm819_vm3, %v3276_v5, 0 }
0x1399   : > { %5963 = vmatpush3.bf16.msra.mxu1 %v3281_v6 }
0x139a   : > { %5974 = vmatprep.subr.bf16.mxu1 %v6435_v8 }
0x139b   : > { %v3235_v11 = vpop.xlane.xlu0 %3234 }
0x139c   : > { %v3241_v32 = vsub.f32 %v3225_v16, %v3235_v11 }
0x139d   : > { %v6312_v12 = vpop.eup %6311 }
0x139e   : > { %v3251_v24 = vsel %vm568_vm2, %v6312_v12, 0.0  ;;  %v3247_v14 = vmul.f32 1.442695, %v3241_v32 }
0x139f   : > { %3252 = vadd.xlane.f32.xlu1 %v3251_v24  ;;  %v3238_v25 = vpop.xlane.xlu0 %3237 }
0x13a0   : > { %v3242_v27 = vsub.f32 %v3226_v13, %v3238_v25 }
0x13a2   : > { %v3249_v21 = vmul.f32 1.442695, %v3242_v27 }
0x13a4   : > { %6313 = vpow2.f32 %v3249_v21 }
0x13a5   : > { %6315 = vpow2.f32 %v3245_v28 }
0x13a6   : > { %6317 = vpow2.f32 %v3247_v14 }
0x13b0   : > { %3371 = vrot.lane.b32.xlu1 %v7059_v10, %s6438_s22 }
0x13b1   : > { %v6314_v29 = vpop.eup %6313 }
0x13b2   : > { %v3260_v51 = vsel %vm568_vm2, %v6314_v29, 0.0  ;;  %v6316_v55 = vpop.eup %6315 }
0x13b3   : > { %3261 = vadd.xlane.f32.xlu0 %v3260_v51  ;;  %v3254_v60 = vsel %vm568_vm2, %v6316_v55, 0.0  ;;  %v6318_v35 = vpop.eup %6317 }
0x13b4   : > { %3419 = vrot.lane.b32.xlu1 %v7067_v31, %s6438_s22  ;;  %v3257_v1 = vsel %vm568_vm2, %v6318_v35, 0.0 }
0x13b7   : > { %3255 = vadd.xlane.f32.xlu0 %v3254_v60 }
0x13b8   : > { %3521 = vrot.lane.b32.xlu1 %v7061_v52, %s6439_s23 }
0x13cd   : > { %3323 = vrot.lane.b32.xlu0 %v7061_v52, %s6438_s22 }
0x13d1   : > { %3471 = vrot.lane.b32.xlu0 %v7055_v0, %s6439_s23 }
0x13d5   : > { %3469 = vrot.lane.b32.xlu0 %v7055_v0, %s6440_s24 }
0x13d9   : > { %3571 = vrot.lane.b32.xlu0 %v7059_v10, %s6439_s23 }
0x13dc   : > { %3258 = vadd.xlane.f32.xlu1 %v3257_v1 }
0x13dd   : > { %3569 = vrot.lane.b32.xlu0 %v7059_v10, %s6440_s24 }
0x13ed   : > { %3519 = vrot.lane.b32.xlu1 %v7061_v52, %s6440_s24 }
0x13f1   : > { %3621 = vrot.lane.b32.xlu1 %v7067_v31, %s6439_s23  ;;  %s442_s23 = scalar_lea.vmem %s7537_s13, %s7551_s30 }
0x13f5   : > { %3619 = vrot.lane.b32.xlu1 %v7067_v31, %s6440_s24 }
0x1428   : > { %v3253_v36 = vpop.xlane.xlu1 %3252 }
0x1429   : > { %6319 = vrcp.f32 %v3253_v36 }
0x142c   : > { %v3372_v3 = vpop.permute.xlu1 %3371 }
0x142d   : > { %v3377_v57 = vsel %vm819_vm3, %v3372_v3, 0 }
0x1430   : > { %v3420_v44 = vpop.permute.xlu1 %3419 }
0x1431   : > { %v3425_v47 = vsel %vm819_vm3, %v3420_v44, 0 }
0x1434   : > { %v3522_v49 = vpop.permute.xlu1 %3521 }
0x1435   : > { %v3527_v54 = vsel %vm568_vm2, %v3522_v49, 0 }
0x1436   : > { %v6320_v53 = vpop.eup %6319 }
0x1437   : > { %v3267_v37 = vmul.f32 %v6320_v53, %v6312_v12 }
0x1439   : > { %v3271_v38 = vpack.c.bf16 %v3267_v37, %v3267_v37 }
0x143b   : > { %5965 = vmatmul.mubr.msk.bf16.vlgmr.msra.gmra.mxu1 %vm568_vm2, %v3271_v38 }
0x143c   : > { %5975 = vmatpush3.bf16.msra.mxu1 %v3377_v57  ;;  %v3262_v18 = vpop.xlane.xlu0 %3261  ;;  %5976 = vmatprep.mubr.msk.bf16.mxu1 %vm6436_vm1, %v6435_v8 }
0x143d   : > { %5986 = vmatprep.subr.bf16.mxu1 %v6435_v8 }
0x1440   : > { %v3256_v39 = vpop.xlane.xlu0 %3255 }
0x1441   : > { %6321 = vrcp.f32 %v3256_v39 }
0x1442   : > { %6323 = vrcp.f32 %v3262_v18 }
0x1444   : > { %v3324_v40 = vpop.permute.xlu0 %3323 }
0x1445   : > { %v3329_v41 = vsel %vm819_vm3, %v3324_v40, 0 }
0x1446   : > { %5969 = vmatpush3.bf16.msra.mxu0 %v3329_v41 }
0x1447   : > { %5980 = vmatprep.subr.bf16.mxu0 %v6435_v8 }
0x1448   : > { %v3472_v13 = vpop.permute.xlu0 %3471 }
0x1449   : > { %v3477_v20 = vsel %vm568_vm2, %v3472_v13, 0 }
0x144c   : > { %v3470_v58 = vpop.permute.xlu0 %3469 }
0x144e   : > { %v6322_v42 = vpop.eup %6321 }
0x144f   : > { %v3268_v43 = vmul.f32 %v6322_v42, %v6316_v55  ;;  %v6324_v46 = vpop.eup %6323 }
0x1450   : > { %v3270_v48 = vmul.f32 %v6324_v46, %v6314_v29  ;;  %v3572_v34 = vpop.permute.xlu0 %3571 }
0x1451   : > { %v3272_v45 = vpack.c.bf16 %v3268_v43, %v3268_v43  ;;  %v3577_v4 = vsel %vm568_vm2, %v3572_v34, 0 }
0x1452   : > { %v3274_v50 = vpack.c.bf16 %v3270_v48, %v3270_v48 }
0x1453   : > { %5971 = vmatmul.mubr.msk.bf16.vlgmr.msra.gmra.mxu0 %vm568_vm2, %v3272_v45 }
0x1454   : > { %5981 = vmatpush3.bf16.msra.mxu0 %v3425_v47  ;;  %5982 = vmatprep.mubr.msk.bf16.mxu0 %vm6436_vm1, %v6435_v8  ;;  %v3570_v5 = vpop.permute.xlu0 %3569 }
0x1455   : > { %5992 = vmatprep.subr.bf16.mxu0 %v6435_v8 }
0x145b   : > { %5983 = vmatmul.mubr.msk.bf16.vlgmr.msra.gmra.mxu0 %vm568_vm2, %v3274_v50 }
0x145c   : > { %5993 = vmatpush3.bf16.xpose.msra.mxu0 %v3527_v54  ;;  %5994 = vmatprep.mubr.msk.bf16.mxu0 %vm6436_vm1, %v6435_v8 }
0x145d   : > { %6004 = vmatprep.subr.bf16.mxu0 %v6435_v8 }
0x1465   : > { %v3259_v59 = vpop.xlane.xlu1 %3258 }
0x1466   : > { %6325 = vrcp.f32 %v3259_v59 }
0x1469   : > { %v3520_v61 = vpop.permute.xlu1 %3519 }
0x146a   : > { %5995 = vmatmul.mubr.msk.bf16.vlgmr.msra.gmra.mxu0 %vm568_vm2, %v3520_v61 }
0x146b   : > { %6006 = vmatprep.mubr.msk.bf16.mxu0 %vm6436_vm1, %v6435_v8 }
0x146d   : > { %v3622_v16 = vpop.permute.xlu1 %3621 }
0x146e   : > { %v3627_v56 = vsel %vm568_vm2, %v3622_v16, 0 }
0x146f   : > { %6005 = vmatpush3.bf16.xpose.msra.mxu0 %v3627_v56 }
0x1470   : > { %6016 = vmatprep.subr.bf16.mxu0 %v6435_v8 }
0x1471   : > { %v3620_v63 = vpop.permute.xlu1 %3619 }
0x1473   : > { %v6326_v19 = vpop.eup %6325 }
0x1474   : > { %v3269_v62 = vmul.f32 %v6326_v19, %v6318_v35 }
0x1476   : > { %6007 = vmatmul.mubr.msk.bf16.vlgmr.msra.gmra.mxu0 %vm568_vm2, %v3620_v63  ;;  %v3273_v2 = vpack.c.bf16 %v3269_v62, %v3269_v62 }
0x1477   : > { %6018 = vmatprep.mubr.msk.bf16.mxu0 %vm6436_vm1, %v6435_v8 }
0x1478   : > { %5977 = vmatmul.mubr.msk.bf16.vlgmr.msra.gmra.mxu1 %vm568_vm2, %v3273_v2 }
0x1479   : > { %5987 = vmatpush3.bf16.xpose.msra.mxu1 %v3477_v20  ;;  %5988 = vmatprep.mubr.msk.bf16.mxu1 %vm6436_vm1, %v6435_v8 }
0x147a   : > { %5998 = vmatprep.subr.bf16.mxu1 %v6435_v8 }
0x1480   : > { %5989 = vmatmul.mubr.msk.bf16.vlgmr.msra.gmra.mxu1 %vm568_vm2, %v3470_v58 }
0x1481   : > { %5999 = vmatpush3.bf16.xpose.msra.mxu1 %v3577_v4  ;;  %6000 = vmatprep.mubr.msk.bf16.mxu1 %vm6436_vm1, %v6435_v8 }
0x1482   : > { %6010 = vmatprep.subr.bf16.mxu1 %v6435_v8 }
0x1488   : > { %6001 = vmatmul.mubr.msk.bf16.vlgmr.msra.gmra.mxu1 %vm568_vm2, %v3570_v5 }
0x1489   : > { %6012 = vmatprep.mubr.msk.bf16.mxu1 %vm6436_vm1, %v6435_v8 }
0x14fb   : > { %v7167_v6 = vpop.f32.mrf.mxu1 }
0x14fd   : > { %v5966_v11 = vpop.f32.mrf.mxu1 }
0x14ff   : > { %v3320_v12 = vpop.f32.mrf.mxu1 }
0x1501   : > { %v5967_v17 = vpop.f32.mrf.mxu1 }
0x1513   : > { %v7169_v24 = vpop.f32.mrf.mxu0 }
0x1514   : > { %v3467_v25 = vpack.c.bf16 %v7169_v24, %v7167_v6 }
0x1515   : > { %v5972_v27 = vpop.f32.mrf.mxu0 }
0x1517   : > { %v3368_v28 = vpop.f32.mrf.mxu0 }
0x1519   : > { %v5973_v21 = vpop.f32.mrf.mxu0 }
0x151b   : > { %v7173_v29 = vpop.f32.mrf.mxu0 }
0x151d   : > { %v5984_v51 = vpop.f32.mrf.mxu0 }
0x151f   : > { %v3464_v55 = vpop.f32.mrf.mxu0 }
0x1521   : > { %v5985_v60 = vpop.f32.mrf.mxu0 }
0x152a   : > { %v3563_v32 = vpop.f32.mrf.mxu0 }
0x152b   : > { %v3670_v14 = vmul.f32 0.35355338, %v3563_v32 }
0x152c   : > { %v5996_v35 = vpop.f32.mrf.mxu0 }
0x152d   : > { %v3676_v1 = vsel %vm568_vm2, %v3670_v14, -inf }
0x152e   : > { %3677 = vmax.xlane.f32.xlu1 %v3676_v1  ;;  %v3566_v36 = vpop.f32.mrf.mxu0 }
0x1530   : > { %v5997_v53 = vpop.f32.mrf.mxu0 }
0x1536   : > { %v3663_v37 = vpop.f32.mrf.mxu0 }
0x1537   : > { %v3672_v59 = vmul.f32 0.35355338, %v3663_v37 }
0x1538   : > { %v7176_v3 = vpop.f32.mrf.mxu1  ;;  %v6008_v38 = vpop.f32.mrf.mxu0 }
0x1539   : > { %v3468_v57 = vpack.c.bf16 %v7173_v29, %v7176_v3  ;;  %v3682_v13 = vsel %vm568_vm2, %v3672_v59, -inf }
0x153a   : > { %v5978_v18 = vpop.f32.mrf.mxu1  ;;  %v3666_v39 = vpop.f32.mrf.mxu0 }
0x153c   : > { %v3416_v40 = vpop.f32.mrf.mxu1  ;;  %v6009_v41 = vpop.f32.mrf.mxu0 }
0x153e   : > { %v5979_v42 = vpop.f32.mrf.mxu1 }
0x153f   : > { %3721 = vrot.lane.b32.xlu1 %v7055_v0, %s6441_s26 }
0x1540   : > { %v3513_v43 = vpop.f32.mrf.mxu1 }
0x1541   : > { %v3669_v44 = vmul.f32 0.35355338, %v3513_v43 }
0x1542   : > { %v5990_v45 = vpop.f32.mrf.mxu1 }
0x1543   : > { %v3673_v46 = vsel %vm568_vm2, %v3669_v44, -inf }
0x1544   : > { %3674 = vmax.xlane.f32.xlu0 %v3673_v46  ;;  %v3516_v47 = vpop.f32.mrf.mxu1 }
0x1546   : > { %v5991_v48 = vpop.f32.mrf.mxu1 }
0x1548   : > { %v3613_v49 = vpop.f32.mrf.mxu1 }
0x1549   : > { %v3671_v50 = vmul.f32 0.35355338, %v3613_v49 }
0x154a   : > { %v6002_v54 = vpop.f32.mrf.mxu1 }
0x154b   : > { %v3679_v61 = vsel %vm568_vm2, %v3671_v50, -inf }
0x154c   : > { %3680 = vmax.xlane.f32.xlu0 %v3679_v61  ;;  %v3616_v16 = vpop.f32.mrf.mxu1  ;;  %v6407_v61 = vld [vmem:[%s7527_s3] sm:$0xf] }
0x154e   : > { %v6003_v56 = vpop.f32.mrf.mxu1 }
0x1550   : > { %3683 = vmax.xlane.f32.xlu0 %v3682_v13 }
0x15b7   : > { %v3678_v19 = vpop.xlane.xlu1 %3677 }
0x15b8   : > { %v3686_v62 = vsub.f32 %v3670_v14, %v3678_v19 }
0x15ba   : > { %v3691_v63 = vmul.f32 1.442695, %v3686_v62 }
0x15bb   : > { %v3722_v2 = vpop.permute.xlu1 %3721 }
0x15bc   : > { %6327 = vpow2.f32 %v3691_v63  ;;  %v3727_v58 = vsel %vm819_vm3, %v3722_v2, 0 }
0x15bd   : > { %6011 = vmatpush3.bf16.msra.mxu1 %v3727_v58 }
0x15be   : > { %6022 = vmatprep.subr.bf16.mxu1 %v6435_v8 }
0x15c9   : > { %v6328_v20 = vpop.eup %6327 }
0x15ca   : > { %v3700_v34 = vsel %vm568_vm2, %v6328_v20, 0.0 }
0x15cb   : > { %3701 = vadd.xlane.f32.xlu0 %v3700_v34 }
0x15cd   : > { %v3675_v4 = vpop.xlane.xlu0 %3674 }
0x15ce   : > { %v3685_v5 = vsub.f32 %v3669_v44, %v3675_v4 }
0x15d0   : > { %v3689_v11 = vmul.f32 1.442695, %v3685_v5 }
0x15d2   : > { %6329 = vpow2.f32 %v3689_v11 }
0x15d5   : > { %v3681_v12 = vpop.xlane.xlu0 %3680 }
0x15d6   : > { %v3687_v17 = vsub.f32 %v3671_v50, %v3681_v12  ;;  %v6406_v50 = vld [vmem:[%s7527_s3 + $0x4] sm:$0xf] }
0x15d8   : > { %v3693_v27 = vmul.f32 1.442695, %v3687_v17 }
0x15d9   : > { %v3684_v28 = vpop.xlane.xlu0 %3683 }
0x15da   : > { %6331 = vpow2.f32 %v3693_v27  ;;  %v3688_v21 = vsub.f32 %v3672_v59, %v3684_v28 }
0x15dc   : > { %v3695_v51 = vmul.f32 1.442695, %v3688_v21 }
0x15de   : > { %6333 = vpow2.f32 %v3695_v51 }
0x15df   : > { %v6330_v55 = vpop.eup %6329 }
0x15e0   : > { %v3697_v60 = vsel %vm568_vm2, %v6330_v55, 0.0 }
0x15e1   : > { %3698 = vadd.xlane.f32.xlu1 %v3697_v60 }
0x15e7   : > { %v6332_v32 = vpop.eup %6331 }
0x15e8   : > { %v3703_v14 = vsel %vm568_vm2, %v6332_v32, 0.0 }
0x15e9   : > { %3704 = vadd.xlane.f32.xlu1 %v3703_v14 }
0x15eb   : > { %v6334_v35 = vpop.eup %6333 }
0x15ec   : > { %v3706_v1 = vsel %vm568_vm2, %v6334_v35, 0.0 }
0x15ed   : > { %3707 = vadd.xlane.f32.xlu0 %v3706_v1 }
0x15fa   : > { %3817 = vrot.lane.b32.xlu1 %v7059_v10, %s6441_s26 }
0x15fe   : > { %3865 = vrot.lane.b32.xlu1 %v7067_v31, %s6441_s26 }
0x1602   : > { %4077 = vrot.lane.b32.xlu1 %v7061_v52, %s6442_s27 }
0x1603   : > { %3769 = vrot.lane.b32.xlu0 %v7061_v52, %s6441_s26  ;;  %s7547_s26 = smov 48  }
0x1606   : > { %4075 = vrot.lane.b32.xlu1 %v7061_v52, %s6443_s28 }
0x1607   : > { %4027 = vrot.lane.b32.xlu0 %v7055_v0, %s6442_s27 }
0x160a   : > { %4177 = vrot.lane.b32.xlu1 %v7067_v31, %s6442_s27 }
0x160b   : > { %4025 = vrot.lane.b32.xlu0 %v7055_v0, %s6443_s28 }
0x160e   : > { %4175 = vrot.lane.b32.xlu1 %v7067_v31, %s6443_s28 }
0x160f   : > { %4127 = vrot.lane.b32.xlu0 %v7059_v10, %s6442_s27  ;;  %s7548_s27 = smov 72  }
0x1613   : > { %4125 = vrot.lane.b32.xlu0 %v7059_v10, %s6443_s28  ;;  %s7549_s28 = smov 104  }
0x1654   : > { %v3702_v36 = vpop.xlane.xlu0 %3701 }
0x1655   : > { %6335 = vrcp.f32 %v3702_v36 }
0x1662   : > { %v6336_v38 = vpop.eup %6335 }
0x1663   : > { %v3714_v42 = vmul.f32 %v6336_v38, %v6328_v20 }
0x1665   : > { %v3718_v48 = vpack.c.bf16 %v3714_v42, %v3714_v42 }
0x166a   : > { %v3699_v53 = vpop.xlane.xlu1 %3698 }
0x166b   : > { %6337 = vrcp.f32 %v3699_v53 }
0x1672   : > { %v3705_v37 = vpop.xlane.xlu1 %3704 }
0x1673   : > { %6339 = vrcp.f32 %v3705_v37 }
0x1676   : > { %v3708_v18 = vpop.xlane.xlu0 %3707  ;;  %v3818_v39 = vpop.permute.xlu1 %3817 }
0x1677   : > { %6341 = vrcp.f32 %v3708_v18  ;;  %v3823_v47 = vsel %vm819_vm3, %v3818_v39, 0 }
0x1678   : > { %v6338_v40 = vpop.eup %6337 }
0x1679   : > { %v3713_v41 = vmul.f32 %v6338_v40, %v6330_v55 }
0x167a   : > { %v3770_v43 = vpop.permute.xlu0 %3769  ;;  %v3866_v46 = vpop.permute.xlu1 %3865 }
0x167b   : > { %v3717_v44 = vpack.c.bf16 %v3713_v41, %v3713_v41  ;;  %v3775_v45 = vsel %vm819_vm3, %v3770_v43, 0  ;;  %v3871_v49 = vsel %vm819_vm3, %v3866_v46, 0 }
0x167c   : > { %6017 = vmatpush3.bf16.msra.mxu0 %v3775_v45 }
0x167d   : > { %6013 = vmatmul.mubr.msk.bf16.vlgmr.msra.gmra.mxu1 %vm568_vm2, %v3717_v44  ;;  %6028 = vmatprep.subr.bf16.mxu0 %v6435_v8 }
0x167e   : > { %6023 = vmatpush3.bf16.msra.mxu1 %v3823_v47  ;;  %6024 = vmatprep.mubr.msk.bf16.mxu1 %vm6436_vm1, %v6435_v8  ;;  %v4078_v62 = vpop.permute.xlu1 %4077  ;;  %v4028_v4 = vpop.permute.xlu0 %4027 }
0x167f   : > { %6019 = vmatmul.mubr.msk.bf16.vlgmr.msra.gmra.mxu0 %vm568_vm2, %v3718_v48  ;;  %6186 = vmatprep.subr.msk.bf16.mxu1 %vm819_vm3, %v6406_v50  ;;  %v4083_v2 = vsel %vm568_vm2, %v4078_v62, 0  ;;  %v4033_v60 = vsel %vm568_vm2, %v4028_v4, 0 }
0x1680   : > { %v6340_v54 = vpop.eup %6339  ;;  %6029 = vmatpush3.bf16.msra.mxu0 %v3871_v49  ;;  %6030 = vmatprep.mubr.msk.bf16.mxu0 %vm6436_vm1, %v6435_v8 }
0x1681   : > { %v3715_v59 = vmul.f32 %v6340_v54, %v6332_v32  ;;  %6187 = vmatprep.subr.msk.bf16.mxu0 %vm819_vm3, %v6407_v61 }
0x1682   : > { %v4076_v63 = vpop.permute.xlu1 %4075  ;;  %v4026_v28 = vpop.permute.xlu0 %4025 }
0x1683   : > { %v3719_v16 = vpack.c.bf16 %v3715_v59, %v3715_v59 }
0x1684   : > { %v6342_v56 = vpop.eup %6341 }
0x1685   : > { %6025 = vmatmul.mubr.msk.bf16.vlgmr.msra.gmra.mxu1 %vm568_vm2, %v3719_v16  ;;  %v3716_v13 = vmul.f32 %v6342_v56, %v6334_v35 }
0x1686   : > { %6035 = vmatpush3.bf16.msra.mxu1 %v6761_v7  ;;  %v4178_v7 = vpop.permute.xlu1 %4177  ;;  %v4128_v35 = vpop.permute.xlu0 %4127 }
0x1687   : > { %v3720_v19 = vpack.c.bf16 %v3716_v13, %v3716_v13  ;;  %6046 = vmatprep.subr.bf16.mxu1 %v6435_v8  ;;  %v4183_v6 = vsel %vm568_vm2, %v4178_v7, 0  ;;  %v4133_v53 = vsel %vm568_vm2, %v4128_v35, 0 }
0x1689   : > { %6031 = vmatmul.mubr.msk.bf16.vlgmr.msra.gmra.mxu0 %vm568_vm2, %v3720_v19 }
0x168a   : > { %6042 = vmatprep.mubr.msk.bf16.mxu0 %vm568_vm2, %v3467_v25  ;;  %6041 = vmatpush3.bf16.msra.mxu0 %v6731_v26  ;;  %v4176_v26 = vpop.permute.xlu1 %4175  ;;  %v4126_v40 = vpop.permute.xlu0 %4125 }
0x168b   : > { %6052 = vmatprep.subr.bf16.mxu0 %v6435_v8 }
0x1691   : > { %6043 = vmatmul.mubr.msk.bf16.vlgmr.msra.gmra.mxu0 %vm568_vm2, %v3468_v57 }
0x1692   : > { %6053 = vmatpush3.bf16.xpose.msra.mxu0 %v4083_v2  ;;  %6054 = vmatprep.mubr.msk.bf16.mxu0 %vm6436_vm1, %v6435_v8 }
0x1693   : > { %6064 = vmatprep.subr.bf16.mxu0 %v6435_v8 }
0x1699   : > { %6055 = vmatmul.mubr.msk.bf16.vlgmr.msra.gmra.mxu0 %vm568_vm2, %v4076_v63 }
0x169a   : > { %6065 = vmatpush3.bf16.xpose.msra.mxu0 %v4183_v6  ;;  %6066 = vmatprep.mubr.msk.bf16.mxu0 %vm6436_vm1, %v6435_v8 }
0x169b   : > { %6076 = vmatprep.subr.bf16.mxu0 %v6435_v8 }
0x16a1   : > { %6067 = vmatmul.mubr.msk.bf16.vlgmr.msra.gmra.mxu0 %vm568_vm2, %v4176_v26 }
0x16a2   : > { %6078 = vmatprep.mubr.msk.bf16.mxu0 %vm6436_vm1, %v6435_v8 }
0x173d   : > { %v3763_v24 = vpop.f32.mrf.mxu1 }
0x173f   : > { %v6014_v25 = vpop.f32.mrf.mxu1  ;;  %v3811_v29 = vpop.f32.mrf.mxu0 }
0x1740   : > { %v3913_v3 = vpack.c.bf16 %v3811_v29, %v3763_v24 }
0x1741   : > { %v3766_v57 = vpop.f32.mrf.mxu1  ;;  %v6020_v58 = vpop.f32.mrf.mxu0 }
0x1742   : > { %6036 = vmatprep.mubr.msk.bf16.mxu1 %vm568_vm2, %v3913_v3 }
0x1743   : > { %v6015_v20 = vpop.f32.mrf.mxu1  ;;  %v3814_v34 = vpop.f32.mrf.mxu0 }
0x1745   : > { %v6021_v5 = vpop.f32.mrf.mxu0  ;;  %v3859_v11 = vpop.f32.mrf.mxu1 }
0x1747   : > { %v6026_v12 = vpop.f32.mrf.mxu1 }
0x1749   : > { %v3862_v17 = vpop.f32.mrf.mxu1  ;;  %v3907_v27 = vpop.f32.mrf.mxu0 }
0x174a   : > { %v3914_v21 = vpack.c.bf16 %v3907_v27, %v3859_v11 }
0x174b   : > { %v6027_v51 = vpop.f32.mrf.mxu1  ;;  %v6032_v55 = vpop.f32.mrf.mxu0 }
0x174c   : > { %6037 = vmatmul.mubr.msk.bf16.vlgmr.msra.gmra.mxu1 %vm568_vm2, %v3914_v21 }
0x174d   : > { %6047 = vmatpush3.bf16.xpose.msra.mxu1 %v4033_v60  ;;  %v3910_v32 = vpop.f32.mrf.mxu0  ;;  %6048 = vmatprep.mubr.msk.bf16.mxu1 %vm6436_vm1, %v6435_v8 }
0x174e   : > { %6058 = vmatprep.subr.bf16.mxu1 %v6435_v8 }
0x174f   : > { %v6033_v14 = vpop.f32.mrf.mxu0 }
0x1751   : > { %v7263_v1 = vpop.f32.mrf.mxu0 }
0x1753   : > { %v7265_v36 = vpop.f32.mrf.mxu0 }
0x1754   : > { %6049 = vmatmul.mubr.msk.bf16.vlgmr.msra.gmra.mxu1 %vm568_vm2, %v4026_v28 }
0x1755   : > { %6059 = vmatpush3.bf16.xpose.msra.mxu1 %v4133_v53  ;;  %v7269_v37 = vpop.f32.mrf.mxu0  ;;  %6060 = vmatprep.mubr.msk.bf16.mxu1 %vm6436_vm1, %v6435_v8 }
0x1756   : > { %6070 = vmatprep.subr.bf16.mxu1 %v6435_v8 }
0x1757   : > { %v7274_v38 = vpop.f32.mrf.mxu0 }
0x1759   : > { %v4119_v18 = vpop.f32.mrf.mxu0 }
0x175a   : > { %v4226_v39 = vmul.f32 0.35355338, %v4119_v18 }
0x175b   : > { %v6056_v41 = vpop.f32.mrf.mxu0 }
0x175c   : > { %6061 = vmatmul.mubr.msk.bf16.vlgmr.msra.gmra.mxu1 %vm568_vm2, %v4126_v40  ;;  %v4232_v42 = vsel %vm568_vm2, %v4226_v39, -inf }
0x175d   : > { %4233 = vmax.xlane.f32.xlu1 %v4232_v42  ;;  %v4122_v43 = vpop.f32.mrf.mxu0  ;;  %6072 = vmatprep.mubr.msk.bf16.mxu1 %vm6436_vm1, %v6435_v8 }
0x175f   : > { %v6057_v44 = vpop.f32.mrf.mxu0 }
0x1761   : > { %v4219_v45 = vpop.f32.mrf.mxu0 }
0x1762   : > { %v4228_v3 = vmul.f32 0.35355338, %v4219_v45 }
0x1763   : > { %v6068_v46 = vpop.f32.mrf.mxu0 }
0x1764   : > { %v4238_v34 = vsel %vm568_vm2, %v4228_v3, -inf }
0x1765   : > { %v4222_v47 = vpop.f32.mrf.mxu0 }
0x1767   : > { %v6069_v48 = vpop.f32.mrf.mxu0 }
0x176e   : > { %4277 = vrot.lane.b32.xlu1 %v7055_v0, %s7547_s26 }
0x1772   : > { %4373 = vrot.lane.b32.xlu1 %v7059_v10, %s7547_s26 }
0x17e6   : > { %v4234_v49 = vpop.xlane.xlu1 %4233 }
0x17e7   : > { %v4242_v16 = vsub.f32 %v4226_v39, %v4234_v49 }
0x17e9   : > { %v4247_v19 = vmul.f32 1.442695, %v4242_v16 }
0x17ea   : > { %v4278_v50 = vpop.permute.xlu1 %4277 }
0x17eb   : > { %v4283_v54 = vsel %vm819_vm3, %v4278_v50, 0  ;;  %6343 = vpow2.f32 %v4247_v19 }
0x17ec   : > { %6071 = vmatpush3.bf16.msra.mxu1 %v4283_v54 }
0x17ed   : > { %6082 = vmatprep.subr.bf16.mxu1 %v6435_v8 }
0x17ee   : > { %v4374_v40 = vpop.permute.xlu1 %4373 }
0x17ef   : > { %v4379_v19 = vsel %vm819_vm3, %v4374_v40, 0 }
0x17f8   : > { %v6344_v4 = vpop.eup %6343 }
0x17f9   : > { %v4256_v5 = vsel %vm568_vm2, %v6344_v4, 0.0 }
0x180c   : > { %v7286_v59 = vpop.f32.mrf.mxu1 }
0x180e   : > { %v7288_v61 = vpop.f32.mrf.mxu1 }
0x1810   : > { %v7290_v56 = vpop.f32.mrf.mxu1 }
0x1812   : > { %v7292_v13 = vpop.f32.mrf.mxu1 }
0x1814   : > { %v4069_v62 = vpop.f32.mrf.mxu1 }
0x1815   : > { %v4225_v63 = vmul.f32 0.35355338, %v4069_v62 }
0x1816   : > { %v6050_v2 = vpop.f32.mrf.mxu1 }
0x1817   : > { %v4229_v7 = vsel %vm568_vm2, %v4225_v63, -inf  ;;  %v6408_v2 = vld [vmem:[%s7527_s3 + $0x8] sm:$0xf] }
0x1818   : > { %4230 = vmax.xlane.f32.xlu0 %v4229_v7  ;;  %v4072_v6 = vpop.f32.mrf.mxu1 }
0x181a   : > { %v6051_v26 = vpop.f32.mrf.mxu1 }
0x181c   : > { %v4169_v24 = vpop.f32.mrf.mxu1 }
0x181d   : > { %v4227_v25 = vmul.f32 0.35355338, %v4169_v24 }
0x181e   : > { %v6062_v29 = vpop.f32.mrf.mxu1 }
0x181f   : > { %v4235_v57 = vsel %vm568_vm2, %v4227_v25, -inf }
0x1820   : > { %4236 = vmax.xlane.f32.xlu0 %v4235_v57  ;;  %v4172_v58 = vpop.f32.mrf.mxu1 }
0x1822   : > { %v6063_v20 = vpop.f32.mrf.mxu1 }
0x1824   : > { %4239 = vmax.xlane.f32.xlu0 %v4238_v34 }
0x1828   : > { %4257 = vadd.xlane.f32.xlu0 %v4256_v5 }
0x18a1   : > { %v4231_v11 = vpop.xlane.xlu0 %4230 }
0x18a2   : > { %v4241_v12 = vsub.f32 %v4225_v63, %v4231_v11 }
0x18a4   : > { %v4245_v17 = vmul.f32 1.442695, %v4241_v12 }
0x18a6   : > { %6345 = vpow2.f32 %v4245_v17 }
0x18a9   : > { %v4237_v27 = vpop.xlane.xlu0 %4236 }
0x18aa   : > { %v4243_v28 = vsub.f32 %v4227_v25, %v4237_v27 }
0x18ac   : > { %v4249_v21 = vmul.f32 1.442695, %v4243_v28 }
0x18ad   : > { %v4240_v51 = vpop.xlane.xlu0 %4239 }
0x18ae   : > { %6347 = vpow2.f32 %v4249_v21  ;;  %v4244_v55 = vsub.f32 %v4228_v3, %v4240_v51 }
0x18b0   : > { %v4251_v60 = vmul.f32 1.442695, %v4244_v55 }
0x18b1   : > { %v4258_v41 = vpop.xlane.xlu0 %4257 }
0x18b2   : > { %6349 = vpow2.f32 %v4251_v60 }
0x18b3   : > { %v6346_v32 = vpop.eup %6345  ;;  %6351 = vrcp.f32 %v4258_v41 }
0x18b4   : > { %v4253_v14 = vsel %vm568_vm2, %v6346_v32, 0.0 }
0x18b5   : > { %4254 = vadd.xlane.f32.xlu1 %v4253_v14 }
0x18bb   : > { %v6348_v35 = vpop.eup %6347 }
0x18bc   : > { %v4259_v53 = vsel %vm568_vm2, %v6348_v35, 0.0 }
0x18bd   : > { %4260 = vadd.xlane.f32.xlu1 %v4259_v53 }
0x18bf   : > { %v6350_v18 = vpop.eup %6349 }
0x18c0   : > { %v4262_v39 = vsel %vm568_vm2, %v6350_v18, 0.0  ;;  %v6352_v44 = vpop.eup %6351 }
0x18c1   : > { %4263 = vadd.xlane.f32.xlu0 %v4262_v39  ;;  %v4270_v47 = vmul.f32 %v6352_v44, %v6344_v4 }
0x18c3   : > { %v4274_v62 = vpack.c.bf16 %v4270_v47, %v4270_v47 }
0x18ce   : > { %4421 = vrot.lane.b32.xlu1 %v7067_v31, %s7547_s26 }
0x18d2   : > { %4582 = vrot.lane.b32.xlu1 %v7061_v52, %s7548_s27 }
0x18d6   : > { %4580 = vrot.lane.b32.xlu1 %v7061_v52, %s7549_s28 }
0x18d7   : > { %4325 = vrot.lane.b32.xlu0 %v7061_v52, %s7547_s26 }
0x18da   : > { %4682 = vrot.lane.b32.xlu1 %v7067_v31, %s7548_s27 }
0x18db   : > { %4532 = vrot.lane.b32.xlu0 %v7055_v0, %s7548_s27 }
0x18de   : > { %4680 = vrot.lane.b32.xlu1 %v7067_v31, %s7549_s28 }
0x18df   : > { %4530 = vrot.lane.b32.xlu0 %v7055_v0, %s7549_s28 }
0x18e3   : > { %4632 = vrot.lane.b32.xlu0 %v7059_v10, %s7548_s27 }
0x18e7   : > { %4630 = vrot.lane.b32.xlu0 %v7059_v10, %s7549_s28 }
0x193e   : > { %v4255_v42 = vpop.xlane.xlu1 %4254 }
0x193f   : > { %6353 = vrcp.f32 %v4255_v42 }
0x1946   : > { %v4261_v43 = vpop.xlane.xlu1 %4260 }
0x1947   : > { %6355 = vrcp.f32 %v4261_v43 }
0x194a   : > { %v4264_v45 = vpop.xlane.xlu0 %4263  ;;  %v4422_v16 = vpop.permute.xlu1 %4421 }
0x194b   : > { %6357 = vrcp.f32 %v4264_v45  ;;  %v4427_v63 = vsel %vm819_vm3, %v4422_v16, 0 }
0x194c   : > { %v6354_v46 = vpop.eup %6353 }
0x194d   : > { %v4269_v48 = vmul.f32 %v6354_v46, %v6346_v32 }
0x194e   : > { %v4326_v49 = vpop.permute.xlu0 %4325  ;;  %v4583_v51 = vpop.permute.xlu1 %4582 }
0x194f   : > { %v4273_v50 = vpack.c.bf16 %v4269_v48, %v4269_v48  ;;  %v4331_v54 = vsel %vm819_vm3, %v4326_v49, 0  ;;  %v4588_v41 = vsel %vm568_vm2, %v4583_v51, 0 }
0x1950   : > { %6077 = vmatpush3.bf16.msra.mxu0 %v4331_v54 }
0x1951   : > { %6073 = vmatmul.mubr.msk.bf16.vlgmr.msra.gmra.mxu1 %vm568_vm2, %v4273_v50  ;;  %6088 = vmatprep.subr.bf16.mxu0 %v6435_v8 }
0x1952   : > { %6083 = vmatpush3.bf16.msra.mxu1 %v4379_v19  ;;  %6084 = vmatprep.mubr.msk.bf16.mxu1 %vm6436_vm1, %v6435_v8  ;;  %v4533_v26 = vpop.permute.xlu0 %4532  ;;  %v4581_v53 = vpop.permute.xlu1 %4580 }
0x1953   : > { %6079 = vmatmul.mubr.msk.bf16.vlgmr.msra.gmra.mxu0 %vm568_vm2, %v4274_v62  ;;  %6188 = vmatprep.subr.msk.bf16.mxu1 %vm819_vm3, %v6408_v2  ;;  %v4538_v58 = vsel %vm568_vm2, %v4533_v26, 0 }
0x1954   : > { %v6356_v7 = vpop.eup %6355  ;;  %6089 = vmatpush3.bf16.msra.mxu0 %v4427_v63  ;;  %6090 = vmatprep.mubr.msk.bf16.mxu0 %vm6436_vm1, %v6435_v8 }
0x1955   : > { %v4271_v6 = vmul.f32 %v6356_v7, %v6348_v35  ;;  %6100 = vmatprep.subr.bf16.mxu0 %v6435_v8 }
0x1956   : > { %v4531_v57 = vpop.permute.xlu0 %4530  ;;  %v4683_v44 = vpop.permute.xlu1 %4682 }
0x1957   : > { %v4275_v24 = vpack.c.bf16 %v4271_v6, %v4271_v6  ;;  %v4688_v48 = vsel %vm568_vm2, %v4683_v44, 0 }
0x1958   : > { %v6358_v25 = vpop.eup %6357 }
0x1959   : > { %v4272_v29 = vmul.f32 %v6358_v25, %v6350_v18  ;;  %6085 = vmatmul.mubr.msk.bf16.vlgmr.msra.gmra.mxu1 %vm568_vm2, %v4275_v24 }
0x195a   : > { %6095 = vmatpush3.bf16.msra.mxu1 %v6859_v30  ;;  %v4633_v20 = vpop.permute.xlu0 %4632  ;;  %v4681_v62 = vpop.permute.xlu1 %4680 }
0x195b   : > { %v4276_v3 = vpack.c.bf16 %v4272_v29, %v4272_v29  ;;  %6106 = vmatprep.subr.bf16.mxu1 %v6435_v8  ;;  %v4638_v34 = vsel %vm568_vm2, %v4633_v20, 0 }
0x195d   : > { %6091 = vmatmul.mubr.msk.bf16.vlgmr.msra.gmra.mxu0 %vm568_vm2, %v4276_v3 }
0x195e   : > { %6101 = vmatpush3.bf16.xpose.msra.mxu0 %v4538_v58  ;;  %6102 = vmatprep.mubr.msk.bf16.mxu0 %vm6436_vm1, %v6435_v8  ;;  %v4631_v30 = vpop.permute.xlu0 %4630 }
0x195f   : > { %6112 = vmatprep.subr.bf16.mxu0 %v6435_v8 }
0x1965   : > { %6103 = vmatmul.mubr.msk.bf16.vlgmr.msra.gmra.mxu0 %vm568_vm2, %v4531_v57  ;;  %v4019_v57 = vadd.f32 %v7263_v1, %v7286_v59 }
0x1966   : > { %6113 = vmatpush3.bf16.xpose.msra.mxu0 %v4638_v34  ;;  %6114 = vmatprep.mubr.msk.bf16.mxu0 %vm6436_vm1, %v6435_v8  ;;  %v4011_v34 = vadd.f32 %v7265_v36, %v7288_v61 }
0x1967   : > { %6124 = vmatprep.subr.bf16.mxu0 %v6435_v8 }
0x196d   : > { %6115 = vmatmul.mubr.msk.bf16.vlgmr.msra.gmra.mxu0 %vm568_vm2, %v4631_v30 }
0x196e   : > { %6126 = vmatprep.mubr.msk.bf16.mxu0 %vm6436_vm1, %v6435_v8 }
0x1a11   : > { %v4319_v4 = vpop.f32.mrf.mxu1 }
0x1a13   : > { %v6074_v5 = vpop.f32.mrf.mxu1  ;;  %v4367_v11 = vpop.f32.mrf.mxu0 }
0x1a14   : > { %v4469_v12 = vpack.c.bf16 %v4367_v11, %v4319_v4  ;;  %v4022_v5 = vadd.f32 %v7269_v37, %v7290_v56 }
0x1a15   : > { %v4322_v17 = vpop.f32.mrf.mxu1  ;;  %v6080_v27 = vpop.f32.mrf.mxu0 }
0x1a16   : > { %6096 = vmatprep.mubr.msk.bf16.mxu1 %vm568_vm2, %v4469_v12  ;;  %v4014_v17 = vadd.f32 %v7274_v38, %v7292_v13 }
0x1a17   : > { %v6075_v28 = vpop.f32.mrf.mxu1  ;;  %v4370_v21 = vpop.f32.mrf.mxu0 }
0x1a19   : > { %v6081_v55 = vpop.f32.mrf.mxu0  ;;  %v4415_v60 = vpop.f32.mrf.mxu1 }
0x1a1b   : > { %v6086_v32 = vpop.f32.mrf.mxu1 }
0x1a1d   : > { %v4418_v14 = vpop.f32.mrf.mxu1  ;;  %v4463_v35 = vpop.f32.mrf.mxu0 }
0x1a1e   : > { %v4470_v18 = vpack.c.bf16 %v4463_v35, %v4415_v60 }
0x1a1f   : > { %v6087_v39 = vpop.f32.mrf.mxu1  ;;  %v6092_v40 = vpop.f32.mrf.mxu0 }
0x1a20   : > { %6097 = vmatmul.mubr.msk.bf16.vlgmr.msra.gmra.mxu1 %vm568_vm2, %v4470_v18 }
0x1a21   : > { %6107 = vmatpush3.bf16.xpose.msra.mxu1 %v4588_v41  ;;  %v4466_v42 = vpop.f32.mrf.mxu0  ;;  %6108 = vmatprep.mubr.msk.bf16.mxu1 %vm6436_vm1, %v6435_v8 }
0x1a22   : > { %6118 = vmatprep.subr.bf16.mxu1 %v6435_v8 }
0x1a23   : > { %v6093_v43 = vpop.f32.mrf.mxu0 }
0x1a25   : > { %v4574_v45 = vpop.f32.mrf.mxu0 }
0x1a26   : > { %v4730_v46 = vmul.f32 0.35355338, %v4574_v45 }
0x1a27   : > { %v6104_v47 = vpop.f32.mrf.mxu0 }
0x1a28   : > { %6109 = vmatmul.mubr.msk.bf16.vlgmr.msra.gmra.mxu1 %vm568_vm2, %v4581_v53  ;;  %v4734_v49 = vsel %vm568_vm2, %v4730_v46, -inf }
0x1a29   : > { %6119 = vmatpush3.bf16.xpose.msra.mxu1 %v4688_v48  ;;  %4735 = vmax.xlane.f32.xlu0 %v4734_v49  ;;  %v4577_v50 = vpop.f32.mrf.mxu0 }
0x1a2a   : > { %6120 = vmatprep.mubr.msk.bf16.mxu1 %vm6436_vm1, %v6435_v8  ;;  %6130 = vmatprep.subr.bf16.mxu1 %v6435_v8 }
0x1a2b   : > { %v6105_v54 = vpop.f32.mrf.mxu0 }
0x1a2d   : > { %v4674_v16 = vpop.f32.mrf.mxu0 }
0x1a2e   : > { %v4732_v19 = vmul.f32 0.35355338, %v4674_v16 }
0x1a2f   : > { %v6116_v63 = vpop.f32.mrf.mxu0 }
0x1a30   : > { %6121 = vmatmul.mubr.msk.bf16.vlgmr.msra.gmra.mxu1 %vm568_vm2, %v4681_v62  ;;  %v4740_v2 = vsel %vm568_vm2, %v4732_v19, -inf }
0x1a31   : > { %4741 = vmax.xlane.f32.xlu0 %v4740_v2  ;;  %v4677_v7 = vpop.f32.mrf.mxu0  ;;  %6132 = vmatprep.mubr.msk.bf16.mxu1 %vm6436_vm1, %v6435_v8  ;;  %v6409_v2 = vld [vmem:[%s7527_s3 + $0xc] sm:$0xf] }
0x1a33   : > { %v6117_v6 = vpop.f32.mrf.mxu0 }
0x1ab2   : > { %v4736_v26 = vpop.xlane.xlu0 %4735 }
0x1ab3   : > { %v4746_v24 = vsub.f32 %v4730_v46, %v4736_v26  ;;  %v6410_v26 = vld [vmem:[%s7533_s9 + $0x38] sm:$0xff]  }
0x1ab5   : > { %v4750_v29 = vmul.f32 1.442695, %v4746_v24 }
0x1ab7   : > { %6359 = vpow2.f32 %v4750_v29 }
0x1aba   : > { %v4742_v25 = vpop.xlane.xlu0 %4741 }
0x1abb   : > { %v4748_v3 = vsub.f32 %v4732_v19, %v4742_v25 }
0x1abd   : > { %v4754_v58 = vmul.f32 1.442695, %v4748_v3 }
0x1abf   : > { %6361 = vpow2.f32 %v4754_v58 }
0x1ac4   : > { %v6360_v51 = vpop.eup %6359 }
0x1ac5   : > { %v4758_v55 = vsel %vm568_vm2, %v6360_v51, 0.0 }
0x1acc   : > { %v6362_v60 = vpop.eup %6361 }
0x1acd   : > { %v4764_v14 = vsel %vm568_vm2, %v6362_v60, 0.0 }
0x1ae0   : > { %v6098_v20 = vpop.f32.mrf.mxu1 }
0x1ae1   : > { %v7372_v30 = vadd.f32 %v6098_v20, %v4019_v57 }
0x1ae2   : > { %v4511_v4 = vpop.f32.mrf.mxu1 }
0x1ae3   : > { %v7376_v11 = vadd.f32 %v4511_v4, %v4011_v34 }
0x1ae4   : > { %v6099_v12 = vpop.f32.mrf.mxu1 }
0x1ae5   : > { %v7380_v1 = vadd.f32 %v6099_v12, %v4022_v5 }
0x1ae6   : > { %v4514_v59 = vpop.f32.mrf.mxu1 }
0x1ae7   : > { %v7382_v27 = vadd.f32 %v4514_v59, %v4014_v17  ;;  %v6412_v17 = vld [vmem:[%s7531_s7] sm:$0xff]  }
0x1ae8   : > { %v4624_v28 = vpop.f32.mrf.mxu1 }
0x1ae9   : > { %v4731_v36 = vmul.f32 0.35355338, %v4624_v28 }
0x1aea   : > { %v6110_v61 = vpop.f32.mrf.mxu1 }
0x1aeb   : > { %v4737_v21 = vsel %vm568_vm2, %v4731_v36, -inf }
0x1aec   : > { %4738 = vmax.xlane.f32.xlu1 %v4737_v21  ;;  %v4627_v37 = vpop.f32.mrf.mxu1 }
0x1aee   : > { %v6111_v56 = vpop.f32.mrf.mxu1 }
0x1af0   : > { %4759 = vadd.xlane.f32.xlu1 %v4758_v55  ;;  %v4724_v32 = vpop.f32.mrf.mxu1 }
0x1af1   : > { %v4733_v38 = vmul.f32 0.35355338, %v4724_v32 }
0x1af2   : > { %v6122_v13 = vpop.f32.mrf.mxu1 }
0x1af3   : > { %v4743_v35 = vsel %vm568_vm2, %v4733_v38, -inf }
0x1af4   : > { %4765 = vadd.xlane.f32.xlu1 %v4764_v14  ;;  %4744 = vmax.xlane.f32.xlu0 %v4743_v35  ;;  %v4727_v53 = vpop.f32.mrf.mxu1 }
0x1af6   : > { %v6123_v18 = vpop.f32.mrf.mxu1 }
0x1af7   : > { %v6413_v18 = vld [vmem:[%s7533_s9 + $0x30] sm:$0xff]  }
0x1b05   : > { %4782 = vrot.lane.b32.xlu1 %v7055_v0, %s7550_s19 }
0x1b09   : > { %4878 = vrot.lane.b32.xlu1 %v7059_v10, %s7550_s19 }
0x1b0d   : > { %4926 = vrot.lane.b32.xlu1 %v7067_v31, %s7550_s19 }
0x1b75   : > { %v4739_v39 = vpop.xlane.xlu1 %4738 }
0x1b76   : > { %v4747_v40 = vsub.f32 %v4731_v36, %v4739_v39 }
0x1b78   : > { %v4752_v41 = vmul.f32 1.442695, %v4747_v40  ;;  %v6414_v40 = vld [vmem:[%s7533_s9 + $0x28] sm:$0xff]  }
0x1b79   : > { %v4760_v42 = vpop.xlane.xlu1 %4759 }
0x1b7a   : > { %6363 = vpow2.f32 %v4752_v41  ;;  %v6415_v41 = vld [vmem:[%s7533_s9 + $0x20] sm:$0xff]  }
0x1b7b   : > { %6365 = vrcp.f32 %v4760_v42  ;;  %v6416_v42 = vld [vmem:[%s7533_s9 + $0x18] sm:$0xff]  }
0x1b7d   : > { %v4745_v43 = vpop.xlane.xlu0 %4744  ;;  %v4766_v44 = vpop.xlane.xlu1 %4765 }
0x1b7e   : > { %v4749_v45 = vsub.f32 %v4733_v38, %v4745_v43  ;;  %6367 = vrcp.f32 %v4766_v44  ;;  %v6417_v43 = vld [vmem:[%s7533_s9 + $0x10] sm:$0xff]   ;;  %v6418_v44 = vld [vmem:[%s7533_s9 + $0x8] sm:$0xff]  }
0x1b80   : > { %v4756_v46 = vmul.f32 1.442695, %v4749_v45  ;;  %v6419_v45 = vld [vmem:[%s7533_s9] sm:$0xff]  }
0x1b81   : > { %v4783_v47 = vpop.permute.xlu1 %4782 }
0x1b82   : > { %6369 = vpow2.f32 %v4756_v46  ;;  %v4788_v0 = vsel %vm819_vm3, %v4783_v47, 0 }
0x1b83   : > { %6125 = vmatpush3.bf16.msra.mxu0 %v4788_v0 }
0x1b84   : > { %6136 = vmatprep.subr.bf16.mxu0 %v6435_v8 }
0x1b85   : > { %v4879_v50 = vpop.permute.xlu1 %4878 }
0x1b86   : > { %v4884_v19 = vsel %vm819_vm3, %v4879_v50, 0 }
0x1b87   : > { %v6364_v10 = vpop.eup %6363 }
0x1b88   : > { %v6366_v31 = vpop.eup %6365  ;;  %v4761_v48 = vsel %vm568_vm2, %v6364_v10, 0.0 }
0x1b89   : > { %v4774_v49 = vmul.f32 %v6366_v31, %v6360_v51  ;;  %4762 = vadd.xlane.f32.xlu0 %v4761_v48  ;;  %v6420_v48 = vld [vmem:[%s7528_s4] ss:$0 sm:$0xff] }
0x1b8b   : > { %v4778_v54 = vpack.c.bf16 %v4774_v49, %v4774_v49  ;;  %v6368_v16 = vpop.eup %6367 }
0x1b8c   : > { %v4776_v63 = vmul.f32 %v6368_v16, %v6362_v60 }
0x1b8d   : > { %6127 = vmatmul.mubr.msk.bf16.vlgmr.msra.gmra.mxu0 %vm568_vm2, %v4778_v54 }
0x1b8e   : > { %6137 = vmatpush3.bf16.msra.mxu0 %v4884_v19  ;;  %6138 = vmatprep.mubr.msk.bf16.mxu0 %vm6436_vm1, %v6435_v8  ;;  %v4780_v6 = vpack.c.bf16 %v4776_v63, %v4776_v63 }
0x1b8f   : > { %v6370_v62 = vpop.eup %6369  ;;  %6189 = vmatprep.subr.msk.bf16.mxu0 %vm819_vm3, %v6409_v2 }
0x1b90   : > { %v4767_v7 = vsel %vm568_vm2, %v6370_v62, 0.0 }
0x1b91   : > { %4768 = vadd.xlane.f32.xlu0 %v4767_v7 }
0x1b95   : > { %6139 = vmatmul.mubr.msk.bf16.vlgmr.msra.gmra.mxu0 %vm568_vm2, %v4780_v6 }
0x1b96   : > { %6149 = vmatpush3.bf16.msra.mxu0 %v6926_v15  ;;  %v4927_v15 = vpop.permute.xlu1 %4926 }
0x1b97   : > { %6162 = vmatprep.subr.bf16.mxu0 %v6410_v26  ;;  %v4932_v34 = vsel %vm819_vm3, %v4927_v15, 0 }
0x1ba7   : > { %4830 = vrot.lane.b32.xlu0 %v7061_v52, %s7550_s19  ;;  %v6411_v52 = vld [vmem:[%s7531_s7 + $0x8] sm:$0xff]  }
0x1c12   : > { %v4763_v24 = vpop.xlane.xlu0 %4762 }
0x1c13   : > { %6371 = vrcp.f32 %v4763_v24 }
0x1c1a   : > { %v4769_v25 = vpop.xlane.xlu0 %4768 }
0x1c1b   : > { %6373 = vrcp.f32 %v4769_v25 }
0x1c1e   : > { %v4831_v29 = vpop.permute.xlu0 %4830 }
0x1c1f   : > { %v4836_v3 = vsel %vm819_vm3, %v4831_v29, 0 }
0x1c20   : > { %v6372_v57 = vpop.eup %6371  ;;  %6131 = vmatpush3.bf16.msra.mxu1 %v4836_v3 }
0x1c21   : > { %v4775_v58 = vmul.f32 %v6372_v57, %v6364_v10  ;;  %6142 = vmatprep.subr.bf16.mxu1 %v6435_v8 }
0x1c23   : > { %v4779_v20 = vpack.c.bf16 %v4775_v58, %v4775_v58 }
0x1c25   : > { %6133 = vmatmul.mubr.msk.bf16.vlgmr.msra.gmra.mxu1 %vm568_vm2, %v4779_v20 }
0x1c26   : > { %6143 = vmatpush3.bf16.msra.mxu1 %v4932_v34  ;;  %6144 = vmatprep.mubr.msk.bf16.mxu1 %vm6436_vm1, %v6435_v8 }
0x1c27   : > { %6154 = vmatprep.subr.bf16.mxu1 %v6411_v52 }
0x1c28   : > { %v6374_v4 = vpop.eup %6373 }
0x1c29   : > { %v4777_v5 = vmul.f32 %v6374_v4, %v6370_v62 }
0x1c2b   : > { %v4781_v12 = vpack.c.bf16 %v4777_v5, %v4777_v5 }
0x1c2d   : > { %6145 = vmatmul.mubr.msk.bf16.vlgmr.msra.gmra.mxu1 %vm568_vm2, %v4781_v12 }
0x1c2e   : > { %6155 = vmatpush3.bf16.msra.mxu1 %v6411_v52 }
0x1c2f   : > { %6156 = vmatprep.subr.bf16.mxu1 %v6412_v17 }
0x1c32   : > { %6157 = vmatpush3.bf16.msra.mxu1 %v6412_v17 }
0x1c4d   : > { %v4824_v59 = vpop.f32.mrf.mxu0 }
0x1c4f   : > { %v6128_v28 = vpop.f32.mrf.mxu0 }
0x1c51   : > { %v4827_v8 = vpop.f32.mrf.mxu0 }
0x1c53   : > { %v6129_v36 = vpop.f32.mrf.mxu0 }
0x1c55   : > { %v4920_v61 = vpop.f32.mrf.mxu0 }
0x1c57   : > { %v6140_v21 = vpop.f32.mrf.mxu0 }
0x1c59   : > { %v4923_v51 = vpop.f32.mrf.mxu0 }
0x1c5b   : > { %v6141_v37 = vpop.f32.mrf.mxu0 }
0x1ce5   : > { %v4872_v56 = vpop.f32.mrf.mxu1 }
0x1ce6   : > { %v4974_v55 = vpack.c.bf16 %v4872_v56, %v4824_v59 }
0x1ce7   : > { %v6134_v60 = vpop.f32.mrf.mxu1 }
0x1ce8   : > { %6150 = vmatprep.mubr.msk.bf16.mxu0 %vm568_vm2, %v4974_v55 }
0x1ce9   : > { %v4875_v32 = vpop.f32.mrf.mxu1 }
0x1ceb   : > { %v6135_v38 = vpop.f32.mrf.mxu1 }
0x1ced   : > { %v4968_v13 = vpop.f32.mrf.mxu1 }
0x1cee   : > { %v4975_v14 = vpack.c.bf16 %v4968_v13, %v4920_v61 }
0x1cef   : > { %v6146_v35 = vpop.f32.mrf.mxu1 }
0x1cf0   : > { %6151 = vmatmul.mubr.msk.bf16.vlgmr.msra.gmra.mxu0 %vm568_vm2, %v4975_v14 }
0x1cf1   : > { %v4971_v53 = vpop.f32.mrf.mxu1  ;;  %6163 = vmatpush3.bf16.msra.mxu0 %v6410_v26 }
0x1cf2   : > { %6164 = vmatprep.subr.bf16.mxu0 %v6413_v18 }
0x1cf3   : > { %v6147_v39 = vpop.f32.mrf.mxu1 }
0x1cf5   : > { %6165 = vmatpush3.bf16.msra.mxu0 %v6413_v18 }
0x1cf6   : > { %6166 = vmatprep.subr.bf16.mxu0 %v6414_v40 }
0x1cf9   : > { %6167 = vmatpush3.bf16.msra.mxu0 %v6414_v40  ;;  %v6421_v40 = vld [vmem:[%s7529_s5] ss:$0 sm:$0xff] }
0x1cfa   : > { %6168 = vmatprep.subr.bf16.mxu0 %v6415_v41 }
0x1cfd   : > { %6169 = vmatpush3.bf16.msra.mxu0 %v6415_v41 }
0x1cfe   : > { %6170 = vmatprep.subr.bf16.mxu0 %v6416_v42 }
0x1d01   : > { %6171 = vmatpush3.bf16.msra.mxu0 %v6416_v42 }
0x1d02   : > { %6172 = vmatprep.subr.bf16.mxu0 %v6417_v43 }
0x1d05   : > { %6173 = vmatpush3.bf16.msra.mxu0 %v6417_v43 }
0x1d06   : > { %6174 = vmatprep.subr.bf16.mxu0 %v6418_v44 }
0x1d09   : > { %6175 = vmatpush3.bf16.msra.mxu0 %v6418_v44 }
0x1d0a   : > { %6176 = vmatprep.subr.bf16.mxu0 %v6419_v45 }
0x1d0d   : > { %6177 = vmatpush3.bf16.msra.mxu0 %v6419_v45 }
0x1db0   : > { %v6152_v46 = vpop.f32.mrf.mxu0 }
0x1db1   : > { %v5033_v47 = vadd.f32 %v6152_v46, %v7372_v30 }
0x1db2   : > { %v5016_v0 = vpop.f32.mrf.mxu0 }
0x1db3   : > { %v5031_v10 = vadd.f32 %v5016_v0, %v7376_v11  ;;  %v5037_v49 = vadd.f32 %v6420_v48, %v5033_v47  ;;  %v6422_v47 = vld [vmem:[%s7530_s6] ss:$0 sm:$0xff] }
0x1db4   : > { %v6153_v31 = vpop.f32.mrf.mxu0 }
0x1db5   : > { %v5035_v50 = vadd.f32 %v6420_v48, %v5031_v10  ;;  %v5034_v54 = vadd.f32 %v6153_v31, %v7380_v1  ;;  %v5041_v11 = vadd.f32 %v5037_v49, %v7043_v22 }
0x1db6   : > { %v5019_v16 = vpop.f32.mrf.mxu0 }
0x1db7   : > { %v5032_v19 = vadd.f32 %v5019_v16, %v7382_v27  ;;  %v5039_v62 = vadd.f32 %v5035_v50, %v7036_v33  ;;  %v5038_v63 = vadd.f32 %v6420_v48, %v5034_v54  ;;  %v5049_v6 = vsel %vm505_vm0, %v5041_v11, 0.0 }
0x1db9   : > { %v5036_v2 = vadd.f32 %v6420_v48, %v5032_v19  ;;  %v5043_v30 = vsel %vm505_vm0, %v5039_v62, 0.0  ;;  %v5042_v1 = vadd.f32 %v5038_v63, %v7045_v23  ;;  %v6423_v19 = vld [vmem:[%s7532_s8] ss:$0 sm:$0xff] }
0x1dba   : > { %5044 = vadd.xlane.f32.xlu0 %v5043_v30 }
0x1dbb   : > { %v5040_v7 = vadd.f32 %v5036_v2, %v7038_v9  ;;  %v5052_v27 = vsel %vm505_vm0, %v5042_v1, 0.0 }
0x1dbd   : > { %v5046_v26 = vsel %vm505_vm0, %v5040_v7, 0.0 }
0x1dbe   : > { %5050 = vadd.xlane.f32.xlu0 %v5049_v6  ;;  %5047 = vadd.xlane.f32.xlu1 %v5046_v26 }
0x1dc2   : > { %5053 = vadd.xlane.f32.xlu0 %v5052_v27 }
0x1e43   : > { %v5045_v33 = vpop.xlane.xlu0 %5044 }
0x1e44   : > { %v5055_v24 = vmul.f32 0.03125, %v5045_v33 }
0x1e46   : > { %v5059_v25 = vsub.f32 %v5039_v62, %v5055_v24 }
0x1e47   : > { %v5051_v29 = vpop.xlane.xlu0 %5050  ;;  %v5048_v3 = vpop.xlane.xlu1 %5047 }
0x1e48   : > { %v5057_v22 = vmul.f32 0.03125, %v5051_v29  ;;  %v5056_v57 = vmul.f32 0.03125, %v5048_v3  ;;  %v5063_v58 = vmul.f32 %v5059_v25, %v5059_v25 }
0x1e4a   : > { %v5061_v9 = vsub.f32 %v5041_v11, %v5057_v22  ;;  %v5060_v15 = vsub.f32 %v5040_v7, %v5056_v57  ;;  %v5067_v20 = vsel %vm505_vm0, %v5063_v58, 0.0 }
0x1e4b   : > { %v5054_v34 = vpop.xlane.xlu0 %5053  ;;  %5068 = vadd.xlane.f32.xlu1 %v5067_v20 }
0x1e4c   : > { %v5058_v23 = vmul.f32 0.03125, %v5054_v34  ;;  %v5065_v52 = vmul.f32 %v5061_v9, %v5061_v9  ;;  %v5064_v4 = vmul.f32 %v5060_v15, %v5060_v15 }
0x1e4e   : > { %v5062_v5 = vsub.f32 %v5042_v1, %v5058_v23  ;;  %v5073_v12 = vsel %vm505_vm0, %v5065_v52, 0.0  ;;  %v5070_v17 = vsel %vm505_vm0, %v5064_v4, 0.0 }
0x1e4f   : > { %5074 = vadd.xlane.f32.xlu1 %v5073_v12  ;;  %5071 = vadd.xlane.f32.xlu0 %v5070_v17 }
0x1e50   : > { %v5066_v59 = vmul.f32 %v5062_v5, %v5062_v5 }
0x1e52   : > { %v5076_v28 = vsel %vm505_vm0, %v5066_v59, 0.0 }
0x1e53   : > { %5077 = vadd.xlane.f32.xlu0 %v5076_v28 }
0x1ed4   : > { %v5069_v8 = vpop.xlane.xlu1 %5068 }
0x1ed5   : > { %v5079_v36 = vmul.f32 0.03125, %v5069_v8 }
0x1ed7   : > { %v5083_v61 = vadd.f32 1e-05, %v5079_v36 }
0x1ed8   : > { %v5072_v21 = vpop.xlane.xlu0 %5071  ;;  %v5075_v51 = vpop.xlane.xlu1 %5074 }
0x1ed9   : > { %6375 = vrsqrt.f32 %v5083_v61  ;;  %v5080_v37 = vmul.f32 0.03125, %v5072_v21  ;;  %v5081_v56 = vmul.f32 0.03125, %v5075_v51 }
0x1edb   : > { %v5084_v55 = vadd.f32 1e-05, %v5080_v37  ;;  %v5085_v60 = vadd.f32 1e-05, %v5081_v56 }
0x1edc   : > { %v5078_v32 = vpop.xlane.xlu0 %5077 }
0x1edd   : > { %6377 = vrsqrt.f32 %v5084_v55  ;;  %v5082_v38 = vmul.f32 0.03125, %v5078_v32 }
0x1ede   : > { %6379 = vrsqrt.f32 %v5085_v60 }
0x1edf   : > { %v5086_v13 = vadd.f32 1e-05, %v5082_v38 }
0x1ee1   : > { %6381 = vrsqrt.f32 %v5086_v13 }
0x1ee6   : > { %v6376_v14 = vpop.eup %6375 }
0x1ee7   : > { %v5091_v35 = vmul.f32 %v6376_v14, %v5059_v25 }
0x1ee9   : > { %v5095_v41 = vmul.f32 %v6421_v40, %v5091_v35 }
0x1eea   : > { %v6378_v53 = vpop.eup %6377 }
0x1eeb   : > { %v6380_v18 = vpop.eup %6379  ;;  %v5092_v39 = vmul.f32 %v6378_v53, %v5060_v15  ;;  %v7474_v0 = vadd.f32 %v6422_v47, %v5095_v41 }
0x1eec   : > { %v5093_v42 = vmul.f32 %v6380_v18, %v5061_v9 }
0x1eed   : > { %v5096_v43 = vmul.f32 %v6421_v40, %v5092_v39 }
0x1eee   : > { %v6382_v44 = vpop.eup %6381  ;;  %v5097_v45 = vmul.f32 %v6421_v40, %v5093_v42 }
0x1eef   : > { %v5094_v46 = vmul.f32 %v6382_v44, %v5062_v5  ;;  %v7476_v10 = vadd.f32 %v6422_v47, %v5096_v43 }
0x1ef0   : > { %v7481_v49 = vadd.f32 %v6422_v47, %v5097_v45 }
0x1ef1   : > { %v5098_v31 = vmul.f32 %v6421_v40, %v5094_v46  ;;  %v5103_v48 = vpack.c.bf16 %v7476_v10, %v7474_v0  ;;  %v6424_v40 = vld [vmem:[%s7534_s10] ss:$0 sm:$0xff] }
0x1ef3   : > { %6158 = vmatprep.mubr.msk.bf16.mxu1 %vm505_vm0, %v5103_v48  ;;  %v7483_v50 = vadd.f32 %v6422_v47, %v5098_v31 }
0x1ef5   : > { %v5104_v54 = vpack.c.bf16 %v7483_v50, %v7481_v49 }
0x1ef7   : > { %6159 = vmatmul.mubr.msk.bf16.vlgmr.msra.gmra.mxu1 %vm505_vm0, %v5104_v54 }
0x1fb7   : > { %v6160_v16 = vpop.f32.mrf.mxu1 }
0x1fb8   : > { %v5154_v62 = vadd.f32 %v6423_v19, %v6160_v16 }
0x1fb9   : > { %v5145_v63 = vpop.f32.mrf.mxu1 }
0x1fba   : > { %v5166_v2 = vmul.f32 %v5154_v62, %v5154_v62  ;;  %v5146_v30 = vadd.f32 %v6423_v19, %v5145_v63  ;;  %v5162_v60 = vmul.f32 0.5, %v5154_v62 }
0x1fbb   : > { %v6161_v11 = vpop.f32.mrf.mxu1 }
0x1fbc   : > { %v5170_v7 = vmul.f32 %v5166_v2, %v5154_v62  ;;  %v5164_v6 = vmul.f32 %v5146_v30, %v5146_v30  ;;  %v5157_v26 = vadd.f32 %v6423_v19, %v6161_v11  ;;  %v5160_v37 = vmul.f32 0.5, %v5146_v30 }
0x1fbd   : > { %v5148_v1 = vpop.f32.mrf.mxu1 }
0x1fbe   : > { %v5174_v27 = vmul.f32 0.044715, %v5170_v7  ;;  %v5168_v33 = vmul.f32 %v5164_v6, %v5146_v30  ;;  %v5167_v24 = vmul.f32 %v5157_v26, %v5157_v26  ;;  %v5149_v25 = vadd.f32 %v6423_v19, %v5148_v1 }
0x1fbf   : > { %v5163_v51 = vmul.f32 0.5, %v5157_v26 }
0x1fc0   : > { %v5178_v29 = vadd.f32 %v5174_v27, %v5154_v62  ;;  %v5172_v3 = vmul.f32 0.044715, %v5168_v33  ;;  %v5171_v22 = vmul.f32 %v5167_v24, %v5157_v26  ;;  %v5165_v57 = vmul.f32 %v5149_v25, %v5149_v25 }
0x1fc1   : > { %v5161_v56 = vmul.f32 0.5, %v5149_v25 }
0x1fc2   : > { %v5182_v58 = vmul.f32 0.7978846, %v5178_v29  ;;  %v5176_v9 = vadd.f32 %v5172_v3, %v5146_v30  ;;  %v5175_v15 = vmul.f32 0.044715, %v5171_v22  ;;  %v5169_v20 = vmul.f32 %v5165_v57, %v5149_v25 }
0x1fc4   : > { %v5180_v34 = vmul.f32 0.7978846, %v5176_v9  ;;  %v5179_v23 = vadd.f32 %v5175_v15, %v5157_v26  ;;  %v5173_v52 = vmul.f32 0.044715, %v5169_v20  ;;  %6383 = vtanh.f32 %v5182_v58 }
0x1fc6   : > { %v5183_v4 = vmul.f32 0.7978846, %v5179_v23  ;;  %6385 = vtanh.f32 %v5180_v34  ;;  %v5177_v5 = vadd.f32 %v5173_v52, %v5149_v25 }
0x1fc8   : > { %6387 = vtanh.f32 %v5183_v4  ;;  %v5181_v12 = vmul.f32 0.7978846, %v5177_v5 }
0x1fca   : > { %6389 = vtanh.f32 %v5181_v12 }
0x1fd1   : > { %v6384_v17 = vpop.eup %6383 }
0x1fd2   : > { %v5190_v21 = vadd.f32 1.0, %v6384_v17 }
0x1fd3   : > { %v6386_v59 = vpop.eup %6385 }
0x1fd4   : > { %v5188_v36 = vadd.f32 1.0, %v6386_v59  ;;  %v5194_v14 = vmul.f32 %v5190_v21, %v5162_v60 }
0x1fd5   : > { %v6388_v28 = vpop.eup %6387 }
0x1fd6   : > { %v5191_v8 = vadd.f32 1.0, %v6388_v28  ;;  %v5192_v38 = vmul.f32 %v5188_v36, %v5160_v37 }
0x1fd7   : > { %v6390_v61 = vpop.eup %6389 }
0x1fd8   : > { %v5189_v55 = vadd.f32 1.0, %v6390_v61  ;;  %v5195_v32 = vmul.f32 %v5191_v8, %v5163_v51  ;;  %v6425_v61 = vld [vmem:[%s7535_s11] ss:$0 sm:$0xff] }
0x1fda   : > { %v5193_v13 = vmul.f32 %v5189_v55, %v5161_v56  ;;  %v5197_v53 = vpack.c.bf16 %v5195_v32, %v5194_v14  ;;  %v6426_v56 = vld [vmem:[%s7536_s12] ss:$0 sm:$0xff] }
0x1fdc   : > { %v5196_v35 = vpack.c.bf16 %v5193_v13, %v5192_v38 }
0x1fde   : > { %6178 = vmatprep.mubr.bf16.mxu0 %v5196_v35 }
0x1fdf   : > { %6179 = vmatmul.mubr.bf16.vlgmr.msra.gmra.mxu0 %v5197_v53 }
0x209f   : > { %v6180_v18 = vpop.f32.mrf.mxu0 }
0x20a0   : > { %v5241_v41 = vadd.f32 %v6424_v40, %v6180_v18 }
0x20a1   : > { %v5232_v39 = vpop.f32.mrf.mxu0 }
0x20a2   : > { %v5233_v42 = vadd.f32 %v6424_v40, %v5232_v39  ;;  %v5249_v46 = vadd.f32 %v5241_v41, %v7481_v49 }
0x20a3   : > { %v6181_v43 = vpop.f32.mrf.mxu0 }
0x20a4   : > { %v5247_v44 = vadd.f32 %v5233_v42, %v7474_v0  ;;  %v5244_v47 = vadd.f32 %v6424_v40, %v6181_v43  ;;  %v5257_v62 = vsel %vm505_vm0, %v5249_v46, 0.0 }
0x20a5   : > { %v5235_v45 = vpop.f32.mrf.mxu0 }
0x20a6   : > { %v5236_v31 = vadd.f32 %v6424_v40, %v5235_v45  ;;  %v5251_v48 = vsel %vm505_vm0, %v5247_v44, 0.0  ;;  %v5250_v16 = vadd.f32 %v5244_v47, %v7483_v50 }
0x20a7   : > { %5252 = vadd.xlane.f32.xlu1 %v5251_v48 }
0x20a8   : > { %v5248_v54 = vadd.f32 %v5236_v31, %v7476_v10  ;;  %v5260_v0 = vsel %vm505_vm0, %v5250_v16, 0.0 }
0x20aa   : > { %v5254_v19 = vsel %vm505_vm0, %v5248_v54, 0.0 }
0x20ab   : > { %5255 = vadd.xlane.f32.xlu0 %v5254_v19  ;;  %5258 = vadd.xlane.f32.xlu1 %v5257_v62 }
0x20af   : > { %5261 = vadd.xlane.f32.xlu0 %v5260_v0 }
0x2130   : > { %v5253_v63 = vpop.xlane.xlu1 %5252 }
0x2131   : > { %v5263_v49 = vmul.f32 0.03125, %v5253_v63 }
0x2133   : > { %v5267_v2 = vsub.f32 %v5247_v44, %v5263_v49 }
0x2134   : > { %v5256_v30 = vpop.xlane.xlu0 %5255  ;;  %v5259_v11 = vpop.xlane.xlu1 %5258 }
0x2135   : > { %v5264_v7 = vmul.f32 0.03125, %v5256_v30  ;;  %v5265_v6 = vmul.f32 0.03125, %v5259_v11  ;;  %v5271_v26 = vmul.f32 %v5267_v2, %v5267_v2 }
0x2137   : > { %v5268_v10 = vsub.f32 %v5248_v54, %v5264_v7  ;;  %v5269_v1 = vsub.f32 %v5249_v46, %v5265_v6  ;;  %v5275_v50 = vsel %vm505_vm0, %v5271_v26, 0.0 }
0x2138   : > { %v5262_v27 = vpop.xlane.xlu0 %5261  ;;  %5276 = vadd.xlane.f32.xlu1 %v5275_v50 }
0x2139   : > { %v5266_v33 = vmul.f32 0.03125, %v5262_v27  ;;  %v5272_v24 = vmul.f32 %v5268_v10, %v5268_v10  ;;  %v5273_v25 = vmul.f32 %v5269_v1, %v5269_v1 }
0x213b   : > { %v5270_v29 = vsub.f32 %v5250_v16, %v5266_v33  ;;  %v5278_v3 = vsel %vm505_vm0, %v5272_v24, 0.0  ;;  %v5281_v22 = vsel %vm505_vm0, %v5273_v25, 0.0 }
0x213c   : > { %5279 = vadd.xlane.f32.xlu0 %v5278_v3  ;;  %5282 = vadd.xlane.f32.xlu1 %v5281_v22 }
0x213d   : > { %v5274_v57 = vmul.f32 %v5270_v29, %v5270_v29 }
0x213f   : > { %v5284_v58 = vsel %vm505_vm0, %v5274_v57, 0.0 }
0x2140   : > { %5285 = vadd.xlane.f32.xlu0 %v5284_v58 }
0x21c1   : > { %v5277_v9 = vpop.xlane.xlu1 %5276 }
0x21c2   : > { %v5287_v15 = vmul.f32 0.03125, %v5277_v9 }
0x21c4   : > { %v5291_v20 = vadd.f32 1e-05, %v5287_v15 }
0x21c5   : > { %v5280_v34 = vpop.xlane.xlu0 %5279  ;;  %v5283_v23 = vpop.xlane.xlu1 %5282 }
0x21c6   : > { %6391 = vrsqrt.f32 %v5291_v20  ;;  %v5288_v52 = vmul.f32 0.03125, %v5280_v34  ;;  %v5289_v4 = vmul.f32 0.03125, %v5283_v23 }
0x21c8   : > { %v5292_v5 = vadd.f32 1e-05, %v5288_v52  ;;  %v5293_v12 = vadd.f32 1e-05, %v5289_v4 }
0x21c9   : > { %v5286_v17 = vpop.xlane.xlu0 %5285 }
0x21ca   : > { %6393 = vrsqrt.f32 %v5292_v5  ;;  %v5290_v59 = vmul.f32 0.03125, %v5286_v17 }
0x21cb   : > { %6395 = vrsqrt.f32 %v5293_v12 }
0x21cc   : > { %v5294_v28 = vadd.f32 1e-05, %v5290_v59 }
0x21ce   : > { %6397 = vrsqrt.f32 %v5294_v28 }
0x21d3   : > { %v6392_v8 = vpop.eup %6391 }
0x21d4   : > { %v5299_v36 = vmul.f32 %v6392_v8, %v5267_v2 }
0x21d6   : > { %v5303_v21 = vmul.f32 %v6425_v61, %v5299_v36 }
0x21d7   : > { %v6394_v51 = vpop.eup %6393 }
0x21d8   : > { %v6396_v37 = vpop.eup %6395  ;;  %v5307_v55 = vadd.f32 %v6426_v56, %v5303_v21  ;;  %v5300_v60 = vmul.f32 %v6394_v51, %v5268_v10 }
0x21d9   : > { %v5301_v32 = vmul.f32 %v6396_v37, %v5269_v1 }
0x21da   : > { %5311 = vst.msk [vmem:[%s442_s23] sm:$0xff] %vm505_vm0, %v5307_v55  ;;  %v5304_v38 = vmul.f32 %v6425_v61, %v5300_v60 }
0x21db   : > { %v6398_v13 = vpop.eup %6397  ;;  %v5305_v14 = vmul.f32 %v6425_v61, %v5301_v32 }
0x21dc   : > { %v5308_v35 = vadd.f32 %v6426_v56, %v5304_v38  ;;  %v5302_v53 = vmul.f32 %v6398_v13, %v5270_v29 }
0x21dd   : > { %v5309_v18 = vadd.f32 %v6426_v56, %v5305_v14 }
0x21de   : > { %5312 = vst.msk [vmem:[%s442_s23 + $0x8] sm:$0xff] %vm505_vm0, %v5308_v35  ;;  %v5306_v39 = vmul.f32 %v6425_v61, %v5302_v53 }
0x21df   : > { %5313 = vst.msk [vmem:[%s442_s23 + $0x10] sm:$0xff] %vm505_vm0, %v5309_v18 }
0x21e0   : > { %v5310_v40 = vadd.f32 %v6426_v56, %v5306_v39 }
0x21e2   : > { %5314 = vst.msk [vmem:[%s442_s23 + $0x18] sm:$0xff] %vm505_vm0, %v5310_v40 }
0x21e3 PF: > { %s23_s25 = sadd.s32 1, %s6433_s25  }
0x21e4   : > { %p20_p4 = scmp.ge.s32.totalorder %s23_s25, 4  }
0x21e6   :  { %22 = sbr.rel (!%p20_p4) target bundleno = 1 (0x1), region = 102 }

</bundles_post_ra>
